<compile_context>
chip_gen: v5e
topology: v5e:2x2
jax: 0.10.0
libtpu: 0.0.40
codegen_flags: <defaults>
</compile_context>

<pallas_src>
import functools

import jax
import jax.numpy as jnp
import numpy as np
from jax import lax
from jax.experimental import pallas as pl
from jax.experimental.pallas import tpu as pltpu


# ---------------------------------------------------------------------------
# Fused 3x3 conv (pad=1, stride=1) + bias + ReLU on a flattened (H*W, cb) image
# ---------------------------------------------------------------------------
def _conv2_3x3(h1, w2k_ref, b2, *, H, W):
    """h1: (H*W, cb) bf16.  w2k_ref: (3, 3*cb, cb) bf16 (BN scale folded)."""
    M = H * W
    Mp = (H + 2) * W
    cb = h1.shape[1]

    def zrows(r):
        return jnp.zeros((r, cb), jnp.bfloat16)

    # Zero-pad one image row above/below in the flattened row-major layout:
    #   hp_c[j] = h1[j - W]        (dx =  0)
    #   hp_l[j] = h1[j - (W + 1)]  (dx = -1)
    #   hp_r[j] = h1[j - (W - 1)]  (dx = +1)
    hp_c = jnp.concatenate([zrows(W), h1, zrows(W)], axis=0)
    hp_l = jnp.concatenate([zrows(W + 1), h1, zrows(W - 1)], axis=0)
    hp_r = jnp.concatenate([zrows(W - 1), h1, zrows(W + 1)], axis=0)
    # Mask taps that wrapped across an image row (left/right zero padding).
    col = lax.broadcasted_iota(jnp.int32, (Mp, 1), 0) % W
    hp_l = jnp.where(col > 0, hp_l, jnp.zeros_like(hp_l))
    hp_r = jnp.where(col < (W - 1), hp_r, jnp.zeros_like(hp_r))

    # K-concat: one (Mp, 3*cb) slab; each dy tap is a single K=3*cb matmul on
    # a sublane-aligned row slice of it (W % 8 == 0).
    hp3 = jnp.concatenate([hp_l, hp_c, hp_r], axis=1)

    acc = jnp.dot(hp3[0:M], w2k_ref[0], preferred_element_type=jnp.float32)
    acc = acc + jnp.dot(hp3[W:W + M], w2k_ref[1],
                        preferred_element_type=jnp.float32)
    acc = acc + jnp.dot(hp3[2 * W:2 * W + M], w2k_ref[2],
                        preferred_element_type=jnp.float32)
    return jnp.maximum(acc + b2, 0.0).astype(jnp.bfloat16)


# ---------------------------------------------------------------------------
# Kernels (one image per grid step)
# ---------------------------------------------------------------------------
def _kernel_proj(x_ref, wc_ref, b1_ref, bs_ref, w2k_ref, b2_ref, w3_ref,
                 b3_ref, o_ref, *, H, W, cout):
    x32 = x_ref[0]                                  # (M, Cin), caller's dtype
    xb = x32.astype(jnp.bfloat16)
    # Fused conv1 + 1x1 projection shortcut: ONE MXU pass over x, N=cout+cb.
    z = jnp.dot(xb, wc_ref[...], preferred_element_type=jnp.float32)
    sc = z[:, :cout] + bs_ref[...]                  # projection shortcut (f32)
    h1 = jnp.maximum(z[:, cout:] + b1_ref[...], 0.0).astype(jnp.bfloat16)
    h2 = _conv2_3x3(h1, w2k_ref, b2_ref[...], H=H, W=W)
    y = jnp.dot(h2, w3_ref[...], preferred_element_type=jnp.float32) + b3_ref[...]
    o_ref[0] = jnp.maximum(y + sc, 0.0).astype(o_ref.dtype)


def _kernel_identity(x_ref, w1_ref, b1_ref, w2k_ref, b2_ref, w3_ref, b3_ref,
                     o_ref, *, H, W):
    x32 = x_ref[0]
    xb = x32.astype(jnp.bfloat16)
    h1 = jnp.maximum(
        jnp.dot(xb, w1_ref[...], preferred_element_type=jnp.float32)
        + b1_ref[...], 0.0).astype(jnp.bfloat16)
    h2 = _conv2_3x3(h1, w2k_ref, b2_ref[...], H=H, W=W)
    y = jnp.dot(h2, w3_ref[...], preferred_element_type=jnp.float32) + b3_ref[...]
    # Identity residual from the un-rounded input, add + ReLU in f32.
    o_ref[0] = jnp.maximum(y + x32.astype(jnp.float32), 0.0).astype(o_ref.dtype)


# ---------------------------------------------------------------------------
# Wrappers
# ---------------------------------------------------------------------------
def bottleneck_forward_nhwc(x_nhwc, params):
    """x_nhwc: (N, H, W, Cin).  Returns (N, H, W, Cout) bfloat16."""
    N, H, W, Cin = x_nhwc.shape
    M = H * W
    cb = params["w1"].shape[-1]
    cout = params["w3"].shape[-1]
    has_proj = "ws" in params

    # Free reshape (metadata only); the bf16 cast of x happens inside the
    # kernel, so there is no extra activation HBM pass.
    x = x_nhwc.reshape(N, M, Cin)

    # Fold eval-mode BN scales into the weights in f32, then cast the matmul
    # operands to bf16.  Biases stay f32 for the epilogues.
    w1f = (params["w1"].reshape(Cin, cb) * params["s1"]).astype(jnp.bfloat16)
    w2f = params["w2"] * params["s2"].reshape(1, 1, 1, cb)
    w2k = w2f.astype(jnp.bfloat16).reshape(3, 3 * cb, cb)
    w3f = (params["w3"].reshape(cb, cout) * params["s3"]).astype(jnp.bfloat16)
    b1, b2, b3 = params["b1"], params["b2"], params["b3"]

    def full(shape):
        if len(shape) == 2:
            return pl.BlockSpec(shape, lambda n: (0, 0))
        return pl.BlockSpec(shape, lambda n: (0, 0, 0))

    in_specs = [pl.BlockSpec((1, M, Cin), lambda n: (n, 0, 0))]
    args = [x]
    flops_per_img = 2 * M * 9 * cb * cb + 2 * M * cb * cout
    if has_proj:
        wsf = (params["ws"].reshape(Cin, cout) * params["ss"]).astype(jnp.bfloat16)
        wc = jnp.concatenate([wsf, w1f], axis=1)       # (Cin, cout + cb)
        in_specs += [full((Cin, cout + cb)), full((1, cb)), full((1, cout))]
        args += [wc, b1, params["bs"]]
        kernel = functools.partial(_kernel_proj, H=H, W=W, cout=cout)
        flops_per_img += 2 * M * Cin * (cout + cb)
    else:
        in_specs += [full((Cin, cb)), full((1, cb))]
        args += [w1f, b1]
        kernel = functools.partial(_kernel_identity, H=H, W=W)
        flops_per_img += 2 * M * Cin * cb

    in_specs += [full((3, 3 * cb, cb)), full((1, cb)),
                 full((cb, cout)), full((1, cout))]
    args += [w2k, b2, w3f, b3]

    weight_bytes = sum(int(np.prod(a.shape)) * a.dtype.itemsize
                       for a in args[1:])
    bytes_accessed = int(N * M * (Cin * x.dtype.itemsize + cout * 2)
                         + weight_bytes)

    # VMEM budget derived from the actual block + intermediate sizes (+slack).
    Mp = (H + 2) * W
    blk_bytes = 2 * (M * Cin * x.dtype.itemsize + M * cout * 2)   # dbl-buffered
    interm_bytes = (Mp * 6 * cb * 2              # hp_l/c/r + hp3 (bf16)
                    + M * (cout + 2 * cb) * 4    # conv1/shortcut + conv2 acc
                    + M * cout * 4               # conv3 accumulator (f32)
                    + M * 2 * cb * 2)            # h1 / h2 (bf16)
    vmem_limit = int(min(max(2 * (blk_bytes + 2 * weight_bytes + interm_bytes),
                             32 * 1024 * 1024), 100 * 1024 * 1024))

    out = pl.pallas_call(
        kernel,
        out_shape=jax.ShapeDtypeStruct((N, M, cout), jnp.bfloat16),
        grid_spec=pltpu.PrefetchScalarGridSpec(
            num_scalar_prefetch=0,
            grid=(N,),
            in_specs=in_specs,
            out_specs=pl.BlockSpec((1, M, cout), lambda n: (n, 0, 0)),
        ),
        compiler_params=pltpu.CompilerParams(
            dimension_semantics=("parallel",),
            vmem_limit_bytes=vmem_limit,
        ),
        cost_estimate=pl.CostEstimate(
            flops=N * flops_per_img,
            transcendentals=0,
            bytes_accessed=bytes_accessed,
        ),
    )(*args)
    return out.reshape(N, H, W, cout)


def bottleneck_forward(x_nchw, params):
    # Layout-compat wrapper matching the PyTorch module (NCHW in / NCHW out).
    # Prefer bottleneck_forward_nhwc end-to-end to avoid these transposes.
    x = jnp.transpose(x_nchw, (0, 2, 3, 1))
    out = bottleneck_forward_nhwc(x, params)
    return jnp.transpose(out, (0, 3, 1, 2))


# ---------------------------------------------------------------------------
# Parameter init (deterministic, c2_msra_fill-style) with eval-mode BN folded
# into per-channel (scale, bias).
# ---------------------------------------------------------------------------
def _msra(key, kh, kw, cin, cout):
    fan_out = cout * kh * kw
    std = np.sqrt(2.0 / fan_out)
    return jax.random.normal(key, (kh, kw, cin, cout), jnp.float32) * std  # HWIO


def _bn_fold(key, c, eps=1e-5):
    k1, k2, k3, k4 = jax.random.split(key, 4)
    gamma = 1.0 + 0.2 * jax.random.normal(k1, (c,), jnp.float32)
    beta = 0.1 * jax.random.normal(k2, (c,), jnp.float32)
    mean = 0.1 * jax.random.normal(k3, (c,), jnp.float32)
    var = 0.5 + jax.random.uniform(k4, (c,), jnp.float32)
    scale = gamma / jnp.sqrt(var + eps)
    bias = beta - mean * scale
    return scale.reshape(1, c), bias.reshape(1, c)


def init_bottleneck_params(key, in_channels, out_channels, bottleneck_channels):
    keys = jax.random.split(key, 8)
    p = {}
    p["w1"] = _msra(keys[0], 1, 1, in_channels, bottleneck_channels)
    p["s1"], p["b1"] = _bn_fold(keys[1], bottleneck_channels)
    p["w2"] = _msra(keys[2], 3, 3, bottleneck_channels, bottleneck_channels)
    p["s2"], p["b2"] = _bn_fold(keys[3], bottleneck_channels)
    p["w3"] = _msra(keys[4], 1, 1, bottleneck_channels, out_channels)
    p["s3"], p["b3"] = _bn_fold(keys[5], out_channels)
    if in_channels != out_channels:
        p["ws"] = _msra(keys[6], 1, 1, in_channels, out_channels)
        p["ss"], p["bs"] = _bn_fold(keys[7], out_channels)
    return p


# ---------------------------------------------------------------------------
# Pure-JAX f32 reference (module semantics) for the correctness check
# ---------------------------------------------------------------------------
def bottleneck_reference(x_nchw, params):
    dn = ("NHWC", "HWIO", "NHWC")
    x = jnp.transpose(x_nchw, (0, 2, 3, 1))

    def cbn(h, w, s, b, pad):
        y = lax.conv_general_dilated(h, w, (1, 1), pad, dimension_numbers=dn)
        return y * s.reshape(1, 1, 1, -1) + b.reshape(1, 1, 1, -1)

    h = jax.nn.relu(cbn(x, params["w1"], params["s1"], params["b1"], "VALID"))
    h = jax.nn.relu(cbn(h, params["w2"], params["s2"], params["b2"],
                        ((1, 1), (1, 1))))
    h = cbn(h, params["w3"], params["s3"], params["b3"], "VALID")
    if "ws" in params:
        sc = cbn(x, params["ws"], params["ss"], params["bs"], "VALID")
    else:
        sc = x
    out = jax.nn.relu(h + sc)
    return jnp.transpose(out, (0, 3, 1, 2))


if __name__ == "__main__":
    key = jax.random.PRNGKey(0)

    N, H, W = 2, 16, 16
    configs = [
        # (name, in_channels, bottleneck_channels, out_channels)
        ("projection_shortcut", 64, 64, 256),
        ("identity_shortcut", 256, 64, 256),
    ]

    fwd = jax.jit(bottleneck_forward)
    for i, (name, cin, cb, cout) in enumerate(configs):
        k_x, k_p = jax.random.split(jax.random.fold_in(key, i))
        x = jax.random.normal(k_x, (N, cin, H, W), jnp.float32)   # NCHW
        params = init_bottleneck_params(k_p, cin, cout, cb)

        out = jax.block_until_ready(fwd(x, params))
        ref = jax.block_until_ready(bottleneck_reference(x, params))
        assert out.shape == (N, cout, H, W), (name, out.shape)
        # bf16 matmul operands + bf16 output vs. the f32 reference.
        np.testing.assert_allclose(np.asarray(out.astype(jnp.float32)),
                                   np.asarray(ref),
                                   rtol=5e-2, atol=2.5e-1)

    print("KERNEL_OK")
</pallas_src>

<mosaic_0001>
module attributes {stable_mosaic.version = 11 : i64} {
  func.func @_kernel_proj(%arg0: i32, %arg1: memref<1x256x64xf32, #tpu.memory_space<vmem>>, %arg2: memref<64x320xbf16, #tpu.memory_space<vmem>>, %arg3: memref<1x64xf32, #tpu.memory_space<vmem>>, %arg4: memref<1x256xf32, #tpu.memory_space<vmem>>, %arg5: memref<3x192x64xbf16, #tpu.memory_space<vmem>>, %arg6: memref<1x64xf32, #tpu.memory_space<vmem>>, %arg7: memref<64x256xbf16, #tpu.memory_space<vmem>>, %arg8: memref<1x256xf32, #tpu.memory_space<vmem>>, %arg9: memref<1x256x256xbf16, #tpu.memory_space<vmem>>) attributes {dimension_semantics = [#tpu.dimension_semantics<parallel>], iteration_bounds = array<i64: 2>, scalar_prefetch = 0 : i64, scratch_operands = 0 : i64, tpu.core_type = #tpu.core_type<tc>, window_params = [{transform_indices = @transform_0, window_bounds = array<i64: 1, 256, 64>}, {pipeline_mode = #tpu.pipeline_mode<synchronous>, transform_indices = @transform_1, window_bounds = array<i64: 64, 320>}, {pipeline_mode = #tpu.pipeline_mode<synchronous>, transform_indices = @transform_2, window_bounds = array<i64: 1, 64>}, {pipeline_mode = #tpu.pipeline_mode<synchronous>, transform_indices = @transform_3, window_bounds = array<i64: 1, 256>}, {pipeline_mode = #tpu.pipeline_mode<synchronous>, transform_indices = @transform_4, window_bounds = array<i64: 3, 192, 64>}, {pipeline_mode = #tpu.pipeline_mode<synchronous>, transform_indices = @transform_5, window_bounds = array<i64: 1, 64>}, {pipeline_mode = #tpu.pipeline_mode<synchronous>, transform_indices = @transform_6, window_bounds = array<i64: 64, 256>}, {pipeline_mode = #tpu.pipeline_mode<synchronous>, transform_indices = @transform_7, window_bounds = array<i64: 1, 256>}, {transform_indices = @transform_8, window_bounds = array<i64: 1, 256, 256>}]} {
    %c0 = arith.constant 0 : index
    %c0_0 = arith.constant 0 : index
    %c0_1 = arith.constant 0 : index
    %0 = vector.load %arg1[%c0, %c0_0, %c0_1] : memref<1x256x64xf32, #tpu.memory_space<vmem>>, vector<1x256x64xf32>
    %1 = vector.shape_cast %0 : vector<1x256x64xf32> to vector<256x64xf32>
    %2 = arith.truncf %1 : vector<256x64xf32> to vector<256x64xbf16>
    %c0_2 = arith.constant 0 : index
    %c0_3 = arith.constant 0 : index
    %3 = vector.load %arg2[%c0_2, %c0_3] : memref<64x320xbf16, #tpu.memory_space<vmem>>, vector<64x320xbf16>
    %cst = arith.constant dense<0.000000e+00> : vector<256x320xf32>
    %4 = tpu.matmul %2, %3, %cst {dimension_numbers = #tpu.dot_dimension_numbers<[1], [0], [0], [1], [0, 0, 1, 1], [], []>} : vector<256x64xbf16>, vector<64x320xbf16>, vector<256x320xf32> -> vector<256x320xf32>
    %5 = vector.extract_strided_slice %4 {offsets = [0, 0], sizes = [256, 256], strides = [1, 1]} : vector<256x320xf32> to vector<256x256xf32>
    %c0_4 = arith.constant 0 : index
    %c0_5 = arith.constant 0 : index
    %6 = vector.load %arg4[%c0_4, %c0_5] : memref<1x256xf32, #tpu.memory_space<vmem>>, vector<1x256xf32>
    %7 = vector.broadcast %6 : vector<1x256xf32> to vector<256x256xf32>
    %8 = arith.addf %5, %7 : vector<256x256xf32>
    %9 = vector.extract_strided_slice %4 {offsets = [0, 256], sizes = [256, 64], strides = [1, 1]} : vector<256x320xf32> to vector<256x64xf32>
    %c0_6 = arith.constant 0 : index
    %c0_7 = arith.constant 0 : index
    %10 = vector.load %arg3[%c0_6, %c0_7] : memref<1x64xf32, #tpu.memory_space<vmem>>, vector<1x64xf32>
    %11 = vector.broadcast %10 : vector<1x64xf32> to vector<256x64xf32>
    %12 = arith.addf %9, %11 : vector<256x64xf32>
    %cst_8 = arith.constant 0.000000e+00 : f32
    %13 = vector.broadcast %cst_8 : f32 to vector<256x64xf32>
    %14 = arith.maximumf %12, %13 : vector<256x64xf32>
    %15 = arith.truncf %14 : vector<256x64xf32> to vector<256x64xbf16>
    %c0_9 = arith.constant 0 : index
    %c0_10 = arith.constant 0 : index
    %16 = vector.load %arg6[%c0_9, %c0_10] : memref<1x64xf32, #tpu.memory_space<vmem>>, vector<1x64xf32>
    %cst_11 = arith.constant 0.000000e+00 : bf16
    %17 = vector.broadcast %cst_11 : bf16 to vector<16x64xbf16>
    %cst_12 = arith.constant 0.000000e+00 : bf16
    %18 = vector.broadcast %cst_12 : bf16 to vector<16x64xbf16>
    %19 = tpu.concatenate %17, %15, %18 in 0 : vector<16x64xbf16>, vector<256x64xbf16>, vector<16x64xbf16> -> vector<288x64xbf16>
    %cst_13 = arith.constant 0.000000e+00 : bf16
    %20 = vector.broadcast %cst_13 : bf16 to vector<17x64xbf16>
    %cst_14 = arith.constant 0.000000e+00 : bf16
    %21 = vector.broadcast %cst_14 : bf16 to vector<15x64xbf16>
    %22 = tpu.concatenate %20, %15, %21 in 0 : vector<17x64xbf16>, vector<256x64xbf16>, vector<15x64xbf16> -> vector<288x64xbf16>
    %cst_15 = arith.constant 0.000000e+00 : bf16
    %23 = vector.broadcast %cst_15 : bf16 to vector<15x64xbf16>
    %cst_16 = arith.constant 0.000000e+00 : bf16
    %24 = vector.broadcast %cst_16 : bf16 to vector<17x64xbf16>
    %25 = tpu.concatenate %23, %15, %24 in 0 : vector<15x64xbf16>, vector<256x64xbf16>, vector<17x64xbf16> -> vector<288x64xbf16>
    %26 = tpu.iota {dimensions = array<i32: 0>} : vector<288x1xi32>
    %c16_i32 = arith.constant 16 : i32
    %c0_i32 = arith.constant 0 : i32
    %27 = arith.cmpi eq, %c16_i32, %c0_i32 : i32
    %c1_i32 = arith.constant 1 : i32
    %28 = arith.select %27, %c1_i32, %c16_i32 : i32
    %29 = vector.broadcast %28 : i32 to vector<288x1xi32>
    %30 = arith.remsi %26, %29 : vector<288x1xi32>
    %c0_i32_17 = arith.constant 0 : i32
    %31 = vector.broadcast %c0_i32_17 : i32 to vector<288x1xi32>
    %32 = arith.cmpi ne, %30, %31 : vector<288x1xi32>
    %c0_i32_18 = arith.constant 0 : i32
    %33 = vector.broadcast %c0_i32_18 : i32 to vector<288x1xi32>
    %34 = arith.cmpi slt, %30, %33 : vector<288x1xi32>
    %c0_i32_19 = arith.constant 0 : i32
    %35 = arith.cmpi slt, %28, %c0_i32_19 : i32
    %36 = vector.broadcast %35 : i1 to vector<288x1xi1>
    %37 = vector.broadcast %36 : vector<288x1xi1> to vector<288x1xi1>
    %38 = arith.xori %34, %37 : vector<288x1xi1>
    %39 = arith.andi %38, %32 : vector<288x1xi1>
    %40 = vector.broadcast %28 : i32 to vector<288x1xi32>
    %41 = arith.addi %30, %40 : vector<288x1xi32>
    %42 = arith.select %39, %41, %30 : vector<288x1xi1>, vector<288x1xi32>
    %c0_i32_20 = arith.constant 0 : i32
    %43 = vector.broadcast %c0_i32_20 : i32 to vector<288x1xi32>
    %44 = arith.cmpi sgt, %42, %43 : vector<288x1xi32>
    %cst_21 = arith.constant 0.000000e+00 : bf16
    %45 = vector.broadcast %cst_21 : bf16 to vector<288x64xbf16>
    %46 = vector.shape_cast %44 : vector<288x1xi1> to vector<288x1xi1>
    %47 = vector.broadcast %46 : vector<288x1xi1> to vector<288x64xi1>
    %48 = arith.select %47, %22, %45 : vector<288x64xi1>, vector<288x64xbf16>
    %c15_i32 = arith.constant 15 : i32
    %49 = vector.broadcast %c15_i32 : i32 to vector<288x1xi32>
    %50 = arith.cmpi slt, %42, %49 : vector<288x1xi32>
    %cst_22 = arith.constant 0.000000e+00 : bf16
    %51 = vector.broadcast %cst_22 : bf16 to vector<288x64xbf16>
    %52 = vector.shape_cast %50 : vector<288x1xi1> to vector<288x1xi1>
    %53 = vector.broadcast %52 : vector<288x1xi1> to vector<288x64xi1>
    %54 = arith.select %53, %25, %51 : vector<288x64xi1>, vector<288x64xbf16>
    %55 = tpu.concatenate %48, %19, %54 in 1 : vector<288x64xbf16>, vector<288x64xbf16>, vector<288x64xbf16> -> vector<288x192xbf16>
    %56 = vector.extract_strided_slice %55 {offsets = [0, 0], sizes = [256, 192], strides = [1, 1]} : vector<288x192xbf16> to vector<256x192xbf16>
    %c0_23 = arith.constant 0 : index
    %c0_24 = arith.constant 0 : index
    %c0_25 = arith.constant 0 : index
    %57 = vector.load %arg5[%c0_23, %c0_24, %c0_25] : memref<3x192x64xbf16, #tpu.memory_space<vmem>>, vector<1x192x64xbf16>
    %58 = vector.shape_cast %57 : vector<1x192x64xbf16> to vector<192x64xbf16>
    %cst_26 = arith.constant dense<0.000000e+00> : vector<256x64xf32>
    %59 = tpu.matmul %56, %58, %cst_26 {dimension_numbers = #tpu.dot_dimension_numbers<[1], [0], [0], [1], [0, 0, 1, 1], [], []>} : vector<256x192xbf16>, vector<192x64xbf16>, vector<256x64xf32> -> vector<256x64xf32>
    %60 = vector.extract_strided_slice %55 {offsets = [16, 0], sizes = [256, 192], strides = [1, 1]} : vector<288x192xbf16> to vector<256x192xbf16>
    %c1 = arith.constant 1 : index
    %c0_27 = arith.constant 0 : index
    %c0_28 = arith.constant 0 : index
    %61 = vector.load %arg5[%c1, %c0_27, %c0_28] : memref<3x192x64xbf16, #tpu.memory_space<vmem>>, vector<1x192x64xbf16>
    %62 = vector.shape_cast %61 : vector<1x192x64xbf16> to vector<192x64xbf16>
    %cst_29 = arith.constant dense<0.000000e+00> : vector<256x64xf32>
    %63 = tpu.matmul %60, %62, %cst_29 {dimension_numbers = #tpu.dot_dimension_numbers<[1], [0], [0], [1], [0, 0, 1, 1], [], []>} : vector<256x192xbf16>, vector<192x64xbf16>, vector<256x64xf32> -> vector<256x64xf32>
    %64 = arith.addf %59, %63 : vector<256x64xf32>
    %65 = vector.extract_strided_slice %55 {offsets = [32, 0], sizes = [256, 192], strides = [1, 1]} : vector<288x192xbf16> to vector<256x192xbf16>
    %c2 = arith.constant 2 : index
    %c0_30 = arith.constant 0 : index
    %c0_31 = arith.constant 0 : index
    %66 = vector.load %arg5[%c2, %c0_30, %c0_31] : memref<3x192x64xbf16, #tpu.memory_space<vmem>>, vector<1x192x64xbf16>
    %67 = vector.shape_cast %66 : vector<1x192x64xbf16> to vector<192x64xbf16>
    %cst_32 = arith.constant dense<0.000000e+00> : vector<256x64xf32>
    %68 = tpu.matmul %65, %67, %cst_32 {dimension_numbers = #tpu.dot_dimension_numbers<[1], [0], [0], [1], [0, 0, 1, 1], [], []>} : vector<256x192xbf16>, vector<192x64xbf16>, vector<256x64xf32> -> vector<256x64xf32>
    %69 = arith.addf %64, %68 : vector<256x64xf32>
    %70 = vector.broadcast %16 : vector<1x64xf32> to vector<256x64xf32>
    %71 = arith.addf %69, %70 : vector<256x64xf32>
    %cst_33 = arith.constant 0.000000e+00 : f32
    %72 = vector.broadcast %cst_33 : f32 to vector<256x64xf32>
    %73 = arith.maximumf %71, %72 : vector<256x64xf32>
    %74 = arith.truncf %73 : vector<256x64xf32> to vector<256x64xbf16>
    %c0_34 = arith.constant 0 : index
    %c0_35 = arith.constant 0 : index
    %75 = vector.load %arg7[%c0_34, %c0_35] : memref<64x256xbf16, #tpu.memory_space<vmem>>, vector<64x256xbf16>
    %cst_36 = arith.constant dense<0.000000e+00> : vector<256x256xf32>
    %76 = tpu.matmul %74, %75, %cst_36 {dimension_numbers = #tpu.dot_dimension_numbers<[1], [0], [0], [1], [0, 0, 1, 1], [], []>} : vector<256x64xbf16>, vector<64x256xbf16>, vector<256x256xf32> -> vector<256x256xf32>
    %c0_37 = arith.constant 0 : index
    %c0_38 = arith.constant 0 : index
    %77 = vector.load %arg8[%c0_37, %c0_38] : memref<1x256xf32, #tpu.memory_space<vmem>>, vector<1x256xf32>
    %78 = vector.broadcast %77 : vector<1x256xf32> to vector<256x256xf32>
    %79 = arith.addf %76, %78 : vector<256x256xf32>
    %80 = arith.addf %79, %8 : vector<256x256xf32>
    %cst_39 = arith.constant 0.000000e+00 : f32
    %81 = vector.broadcast %cst_39 : f32 to vector<256x256xf32>
    %82 = arith.maximumf %80, %81 : vector<256x256xf32>
    %83 = arith.truncf %82 : vector<256x256xf32> to vector<256x256xbf16>
    %c0_40 = arith.constant 0 : index
    %c0_41 = arith.constant 0 : index
    %c0_42 = arith.constant 0 : index
    %84 = vector.load %arg9[%c0_40, %c0_41, %c0_42] : memref<1x256x256xbf16, #tpu.memory_space<vmem>>, vector<1x256x256xbf16>
    %85 = vector.shape_cast %84 : vector<1x256x256xbf16> to vector<256x256xbf16>
    %86 = vector.shape_cast %83 : vector<256x256xbf16> to vector<1x256x256xbf16>
    tpu.vector_store %arg9[%c0_40, %c0_41, %c0_42], %86 {strides = array<i32>} : memref<1x256x256xbf16, #tpu.memory_space<vmem>>, vector<1x256x256xbf16>,
    return
  }
  func.func @transform_0(%arg0: i32) -> (i32, i32, i32) {
    %c0_i32 = arith.constant 0 : i32
    %c0_i32_0 = arith.constant 0 : i32
    %c0_i32_1 = arith.constant 0 : i32
    return %arg0, %c0_i32, %c0_i32_0 : i32, i32, i32
  }
  func.func @transform_1(%arg0: i32) -> (i32, i32) {
    %c0_i32 = arith.constant 0 : i32
    %c0_i32_0 = arith.constant 0 : i32
    %c0_i32_1 = arith.constant 0 : i32
    return %c0_i32, %c0_i32_0 : i32, i32
  }
  func.func @transform_2(%arg0: i32) -> (i32, i32) {
    %c0_i32 = arith.constant 0 : i32
    %c0_i32_0 = arith.constant 0 : i32
    %c0_i32_1 = arith.constant 0 : i32
    return %c0_i32, %c0_i32_0 : i32, i32
  }
  func.func @transform_3(%arg0: i32) -> (i32, i32) {
    %c0_i32 = arith.constant 0 : i32
    %c0_i32_0 = arith.constant 0 : i32
    %c0_i32_1 = arith.constant 0 : i32
    return %c0_i32, %c0_i32_0 : i32, i32
  }
  func.func @transform_4(%arg0: i32) -> (i32, i32, i32) {
    %c0_i32 = arith.constant 0 : i32
    %c0_i32_0 = arith.constant 0 : i32
    %c0_i32_1 = arith.constant 0 : i32
    %c0_i32_2 = arith.constant 0 : i32
    return %c0_i32, %c0_i32_0, %c0_i32_1 : i32, i32, i32
  }
  func.func @transform_5(%arg0: i32) -> (i32, i32) {
    %c0_i32 = arith.constant 0 : i32
    %c0_i32_0 = arith.constant 0 : i32
    %c0_i32_1 = arith.constant 0 : i32
    return %c0_i32, %c0_i32_0 : i32, i32
  }
  func.func @transform_6(%arg0: i32) -> (i32, i32) {
    %c0_i32 = arith.constant 0 : i32
    %c0_i32_0 = arith.constant 0 : i32
    %c0_i32_1 = arith.constant 0 : i32
    return %c0_i32, %c0_i32_0 : i32, i32
  }
  func.func @transform_7(%arg0: i32) -> (i32, i32) {
    %c0_i32 = arith.constant 0 : i32
    %c0_i32_0 = arith.constant 0 : i32
    %c0_i32_1 = arith.constant 0 : i32
    return %c0_i32, %c0_i32_0 : i32, i32
  }
  func.func @transform_8(%arg0: i32) -> (i32, i32, i32) {
    %c0_i32 = arith.constant 0 : i32
    %c0_i32_0 = arith.constant 0 : i32
    %c0_i32_1 = arith.constant 0 : i32
    return %arg0, %c0_i32, %c0_i32_0 : i32, i32, i32
  }
}

</mosaic_0001>

<bundles_post_ra>
// kernel: bottleneck_forward.1
= control target key start
LH: loop header
LB: loop body
LE: loop exit
PB: predicated region body
PF: predicated region fallthrough
CT: control target
= control target key end

     0   :  { %13 = vsyncpa [#allocation3], 0  ;;  %s7079_s0 = inlined_call_operand.vmem [shape: f32[2,256,64], index: 0, kind: input, shape index: {}]   ;;  %s7080_s1 = inlined_call_operand.vmem [shape: bf16[64,320], index: 1, kind: input, shape index: {}]   ;;  %s7081_s2 = inlined_call_operand.vmem [shape: f32[1,64], index: 2, kind: input, shape index: {}]   ;;  %s7082_s3 = inlined_call_operand.vmem [shape: f32[1,256], index: 3, kind: input, shape index: {}]   ;;  %s7083_s4 = inlined_call_operand.vmem [shape: bf16[3,192,64], index: 4, kind: input, shape index: {}]   ;;  %s7084_s5 = inlined_call_operand.vmem [shape: f32[1,64], index: 5, kind: input, shape index: {}]   ;;  %s7085_s6 = inlined_call_operand.vmem [shape: bf16[64,256], index: 6, kind: input, shape index: {}]   ;;  %s7086_s7 = inlined_call_operand.vmem [shape: f32[1,256], index: 7, kind: input, shape index: {}]   ;;  %s7087_s8 = inlined_call_operand.hbm [shape: bf16[2,256,256], index: 8, kind: output, shape index: {}]  }
   0x1   :  { %15 = vsyncpa [#allocation3 + $0x1], 0  ;;  %s4763_s27 = smov 0   ;;  %s4765_s28 = smov 0  }
   0x2   :  { %s4767_s29 = smov 0   ;;  %s4769_s30 = smov 0  }
   0x3 LB: > { %s4784_s9 = sadd.s32 4294967295, %s4711_s30   ;;  %s4051_s10 = sadd.s32 4294967294, %s4711_s30   ;;  %s4711_s30 = sphi %s4769_s30, %s7398_s30   ;;  %s4707_s29 = sphi %s4767_s29, %s7397_s29   ;;  %s4703_s28 = sphi %s4765_s28, %s7396_s28   ;;  %s4699_s27 = sphi %s4763_s27, %s7395_s27  }
   0x4   : > { %s4788_s11 = sadd.s32 1, %s4711_s30   ;;  %s201_s12 = sadd.s32 1, %s4707_s29 }
   0x5   : > { %s198_s13 = ssub.s32 %s4711_s30, %s4788_s11  ;;  %p211_p0 = scmp.ne.s32.totalorder %s4707_s29, %s4703_s28 }
   0x6   : > { %p199_p1 = scmp.eq.s32.totalorder %s198_s13, 0  ;;  %p212_p2 = scmp.eq.s32.totalorder %s4784_s9, 1 }
   0x7   : > { %p217_p3 = scmp.ne.s32.totalorder %s4703_s28, %s4699_s27  ;;  %p218_p4 = scmp.eq.s32.totalorder %s4051_s10, 1 }
   0x8   : > { %s4799_s14 = scalar_select %p199_p1, %s4707_s29, %s201_s12  }
   0x9   : > { %p4801_p5 = por %p212_p2, %p211_p0  ;;  %p4805_p6 = por %p218_p4, %p217_p3 }
   0xa   : > { %p4054_p7 = scmp.ge.s32.totalorder %s4711_s30, 1  ;;  %p265_p8 = scmp.lt.s32.totalorder %s4711_s30, 3 }
   0xc   : > { %p266_p9 = pnand %p4054_p7, %p265_p8 }
   0xe   : > { %269 = sbr.rel (%p266_p9) target bundleno = 1102 (0x44e), region = 52 }
  0x13   : > { %v4096_v0 = vld [vmem:[%s7080_s1 + $0x48] sm:$0xf]  ;;  %v4543_v1 = vld [vmem:[%s7080_s1 + $0x50] sm:$0xf0]  ;;  %v4104_v2 = vld [vmem:[%s7080_s1 + $0x50] sm:$0xf] }
  0x14   : > { %v4097_v3 = vor.u32 %v4543_v1, %v4096_v0  ;;  %v4544_v4 = vld [vmem:[%s7080_s1 + $0x58] sm:$0xf0]  ;;  %v4084_v5 = vld [vmem:[%s7080_s1 + $0x30] sm:$0xf]  ;;  %v4092_v8 = vld [vmem:[%s7080_s1 + $0x38] sm:$0xf] }
  0x15   : > { %v4540_v6 = vld [vmem:[%s7080_s1 + $0x38] sm:$0xf0]  ;;  %v4829_v7 = vor.u32 %v4544_v4, %v4104_v2  ;;  %v4541_v9 = vld [vmem:[%s7080_s1 + $0x40] sm:$0xf0]  ;;  %v4072_v12 = vld [vmem:[%s7080_s1 + $0x18] sm:$0xf] }
  0x16   : > { %488 = vmatpush.bf16.msra.mxu0 %v4097_v3  ;;  %4590 = vmatpush.bf16.msra.mxu3 %v4097_v3  ;;  %v4085_v10 = vor.u32 %v4540_v6, %v4084_v5  ;;  %v4838_v11 = vor.u32 %v4541_v9, %v4092_v8  ;;  %v4537_v13 = vld [vmem:[%s7080_s1 + $0x20] sm:$0xf0]  ;;  %v4080_v14 = vld [vmem:[%s7080_s1 + $0x20] sm:$0xf]  ;;  %v4538_v15 = vld [vmem:[%s7080_s1 + $0x28] sm:$0xf0] }
  0x17   : > { %666 = vmatpush.bf16.msra.mxu2 %v4829_v7  ;;  %p299_p10 = scmp.lt.s32.totalorder %s4784_s9, 1  ;;  %v4073_v16 = vor.u32 %v4537_v13, %v4072_v12  ;;  %v4855_v17 = vor.u32 %v4538_v15, %v4080_v14  ;;  %v4060_v18 = vld [vmem:[%s7080_s1] sm:$0xf]  ;;  %v4534_v19 = vld [vmem:[%s7080_s1 + $0x8] sm:$0xf0]  ;;  %vm435_vm0 = vcmask 523264  }
  0x18   : > { %v4068_v20 = vld [vmem:[%s7080_s1 + $0x8] sm:$0xf]  ;;  %v4535_v21 = vld [vmem:[%s7080_s1 + $0x10] sm:$0xf0]  ;;  %v4061_v22 = vor.u32 %v4534_v19, %v4060_v18  ;;  %v4542_v36 = vld [vmem:[%s7080_s1 + $0x4c] sm:$0xf] }
  0x19   : > { %s300_s12 = scalar_select %p299_p10, %s4784_s9, 1  ;;  %v4069_v26 = vor.u32 %v4535_v21, %v4068_v20  ;;  %v4098_v37 = vld [vmem:[%s7080_s1 + $0x54] sm:$0xf0]  ;;  %v4539_v39 = vld [vmem:[%s7080_s1 + $0x34] sm:$0xf]  ;;  %vm4714_vm3 = vmmov 1  }
  0x1a   : > { %489 = vmatpush.bf16.msra.mxu0 %v4085_v10  ;;  %4591 = vmatpush.bf16.msra.mxu3 %v4085_v10  ;;  %v4101_v38 = vor.u32 %v4542_v36, %v4098_v37  ;;  %v4086_v40 = vld [vmem:[%s7080_s1 + $0x3c] sm:$0xf0]  ;;  %v4536_v42 = vld [vmem:[%s7080_s1 + $0x1c] sm:$0xf]  ;;  %v4074_v43 = vld [vmem:[%s7080_s1 + $0x24] sm:$0xf0] }
  0x1b   : > { %667 = vmatpush.bf16.msra.mxu2 %v4838_v11  ;;  %s4532_s24 = sshll.u32 %s300_s12, 8  ;;  %v4089_v41 = vor.u32 %v4539_v39, %v4086_v40  ;;  %v4077_v44 = vor.u32 %v4536_v42, %v4074_v43  ;;  %v4533_v45 = vld [vmem:[%s7080_s1 + $0x4] sm:$0xf]  ;;  %v4062_v46 = vld [vmem:[%s7080_s1 + $0xc] sm:$0xf0]  ;;  %v4568_v60 = vld [vmem:[%s7083_s4 + $0xb8] sm:$0xff] }
  0x1c   : > { %s4872_s10 = scalar_lea.vmem %s7079_s0, %s4532_s24  ;;  %577 = vmatpush.bf16.msra.mxu1 %v4101_v38  ;;  %v4065_v51 = vor.u32 %v4533_v45, %v4062_v46  ;;  %v4567_v6 = vld [vmem:[%s7083_s4 + $0xb0] sm:$0xff]  ;;  %v4996_v15 = vld [vmem:[%s7081_s2] ss:$0 sm:$0xff]  ;;  %s4713_s19 = smov 64   ;;  %v1220_v45 = vlaneseq  ;;  %vm1792_vm4 = vmpackc.low %vm4714_vm3, %vm4714_vm3  ;;  %vm1002_vm7 = vsmask.f32 256 }
  0x1d   : > { %v307_v23 = vld [vmem:[%s4872_s10] sm:$0xff]  ;;  %v308_v24 = vld [vmem:[%s4872_s10 + $0x8] sm:$0xff]  ;;  %v309_v30 = vld [vmem:[%s4872_s10 + $0x10] sm:$0xff]  ;;  %vm1151_vm8 = vsmask.f32 7424  ;;  %vm1216_vm9 = vcmask 1047552  }
  0x1e   : > { %490 = vmatpush.bf16.msra.mxu0 %v4073_v16  ;;  %4592 = vmatpush.bf16.msra.mxu3 %v4073_v16  ;;  %v331_v25 = vld [vmem:[%s4872_s10 + $0xc0] sm:$0xff]  ;;  %v332_v27 = vld [vmem:[%s4872_s10 + $0xc8] sm:$0xff]  ;;  %v339_v28 = vpack.c.bf16 %v308_v24, %v307_v23  ;;  %v310_v31 = vld [vmem:[%s4872_s10 + $0x18] sm:$0xff]  ;;  %s296_s21 = sand.u32 1, %s4703_s28   ;;  %s4589_s24 = sshll.u32 %s4784_s9, 8 }
  0x1f   : > { %668 = vmatpush.bf16.msra.mxu2 %v4855_v17  ;;  %v4879_v29 = vpack.c.bf16 %v332_v27, %v331_v25  ;;  %v333_v32 = vld [vmem:[%s4872_s10 + $0xd0] sm:$0xff]  ;;  %v334_v33 = vld [vmem:[%s4872_s10 + $0xd8] sm:$0xff]  ;;  %v340_v34 = vpack.c.bf16 %v310_v31, %v309_v30  ;;  %v311_v47 = vld [vmem:[%s4872_s10 + $0x20] sm:$0xff]  ;;  %s4055_s22 = sshll.u32 %s296_s21, 8  ;;  %s3985_s12 = scalar_lea.hbm %s7087_s8, %s4589_s24 }
  0x20   : > { %v4889_v35 = vpack.c.bf16 %v334_v33, %v333_v32  ;;  %578 = vmatpush.bf16.msra.mxu1 %v4089_v41  ;;  %v312_v48 = vld [vmem:[%s4872_s10 + $0x28] sm:$0xff]  ;;  %v335_v49 = vld [vmem:[%s4872_s10 + $0xe0] sm:$0xff]  ;;  %v313_v54 = vld [vmem:[%s4872_s10 + $0x30] sm:$0xff]  ;;  %s6768_s23 = scalar_lea.vmem [#allocation2], %s4055_s22  ;;  %s3974_s13 = scalar_lea.sflag [#allocation3], %s296_s21 }
  0x21   : > { %v336_v50 = vld [vmem:[%s4872_s10 + $0xe8] sm:$0xff]  ;;  %v341_v52 = vpack.c.bf16 %v312_v48, %v311_v47  ;;  %v314_v55 = vld [vmem:[%s4872_s10 + $0x38] sm:$0xff]  ;;  %v337_v56 = vld [vmem:[%s4872_s10 + $0xf0] sm:$0xff]  ;;  %s3986_s9 = sshll.u32 %s6768_s23, 4  ;;  %s4669_s22 = scalar_lea.hbm %s7087_s8, 512  ;;  %s3987_s9 = int_to_ptr.vmem [resolvable:$true] %s3986_s9 }
  0x22   : > { %491 = vmatpush.bf16.msra.mxu0 %v4061_v22  ;;  %4593 = vmatpush.bf16.msra.mxu3 %v4061_v22  ;;  %v4923_v53 = vpack.c.bf16 %v336_v50, %v335_v49  ;;  %v338_v57 = vld [vmem:[%s4872_s10 + $0xf8] sm:$0xff]  ;;  %v342_v58 = vpack.c.bf16 %v314_v55, %v313_v54  ;;  %v315_v61 = vld [vmem:[%s4872_s10 + $0x40] sm:$0xff]  ;;  %v316_v62 = vld [vmem:[%s4872_s10 + $0x48] sm:$0xff] }
  0x23   : > { %669 = vmatpush.bf16.msra.mxu2 %v4069_v26  ;;  %v4937_v59 = vpack.c.bf16 %v338_v57, %v337_v56  ;;  %v343_v63 = vpack.c.bf16 %v316_v62, %v315_v61  ;;  %v317_v0 = vld [vmem:[%s4872_s10 + $0x50] sm:$0xff]  ;;  %v318_v1 = vld [vmem:[%s4872_s10 + $0x58] sm:$0xff]  ;;  %v319_v3 = vld [vmem:[%s4872_s10 + $0x60] sm:$0xff]  ;;  %v5061_v57 = vshrl.u32 %v1220_v45, 7 }
  0x24   : > { %579 = vmatpush.bf16.msra.mxu1 %v4077_v44  ;;  %v344_v2 = vpack.c.bf16 %v318_v1, %v317_v0  ;;  %v320_v4 = vld [vmem:[%s4872_s10 + $0x68] sm:$0xff]  ;;  %v322_v8 = vld [vmem:[%s4872_s10 + $0x78] sm:$0xff]  ;;  %v323_v10 = vld [vmem:[%s4872_s10 + $0x80] sm:$0xff] }
  0x25   : > { %4106 = vmatmul.msk.bf16.vlgmr.msra.gmra.mxu0 %vm435_vm0, %v339_v28  ;;  %4118 = vmatmul.msk.bf16.vlgmr.msra.gmra.mxu3 %vm435_vm0, %v4879_v29  ;;  %v345_v5 = vpack.c.bf16 %v320_v4, %v319_v3  ;;  %v325_v19 = vld [vmem:[%s4872_s10 + $0x90] sm:$0xff]  ;;  %v326_v20 = vld [vmem:[%s4872_s10 + $0x98] sm:$0xff]  ;;  %v327_v43 = vld [vmem:[%s4872_s10 + $0xa0] sm:$0xff]  ;;  %v1224_v61 = vadd.s32 24, %v5061_v57 }
  0x26   : > { %4138 = vmatmul.msk.bf16.vlgmr.msra.gmra.mxu2 %vm435_vm0, %v339_v28  ;;  %4594 = vmatpush.bf16.msrb.mxu3 %v4101_v38  ;;  %v5005_v24 = vpack.c.bf16 %v326_v20, %v325_v19  ;;  %v4555_v36 = vld [vmem:[%s7083_s4 + $0x50] sm:$0xff]  ;;  %v4553_v54 = vld [vmem:[%s7083_s4 + $0x40] sm:$0xff]  ;;  %vm5172_vm13 = vmand %vm1216_vm9, %vm1151_vm8 }
  0x27   : > { %2771 = vmatpush.bf16.msrb.mxu0 %v4568_v60  ;;  %v1282_v4 = vand.u32 15, %v1224_v61 }
  0x28   : > { %580 = vmatpush.bf16.msra.mxu1 %v4065_v51 }
  0x29   : > { %vm5083_vm1 = vcmp.lt.s32.totalorder %v1282_v4, 15 }
  0x2a   : > { %4595 = vmatpush.bf16.msrb.mxu3 %v4089_v41  ;;  %v4554_v41 = vld [vmem:[%s7083_s4 + $0x48] sm:$0xff]  ;;  %vm2151_vm5 = vmpackc.low %vm5083_vm1, %vm5083_vm1 }
  0x2b   : > { %4122 = vmatmul.msk.bf16.vlgmr.msra.gmra.mxu1 %vm435_vm0, %v339_v28  ;;  %2772 = vmatpush.bf16.msrb.mxu0 %v4567_v6 }
  0x2e   : > { %4596 = vmatpush.bf16.msrb.mxu3 %v4077_v44  ;;  %v328_v44 = vld [vmem:[%s4872_s10 + $0xa8] sm:$0xff] }
  0x32   : > { %4597 = vmatpush.bf16.msrb.mxu3 %v4065_v51  ;;  %v5050_v51 = vpack.c.bf16 %v328_v44, %v327_v43 }
  0x35   : > { %4107 = vmatmul.msk.bf16.gmra.mxu0 %vm435_vm0, %v340_v34  ;;  %4119 = vmatmul.msk.bf16.gmra.mxu3 %vm435_vm0, %v4889_v35 }
  0x36   : > { %4139 = vmatmul.msk.bf16.gmra.mxu2 %vm435_vm0, %v340_v34  ;;  %4598 = vmatpush.bf16.msra.mxu3 %v4829_v7  ;;  %v321_v7 = vld [vmem:[%s4872_s10 + $0x70] sm:$0xff] }
  0x37   : > { %v346_v9 = vpack.c.bf16 %v322_v8, %v321_v7 }
  0x3a   : > { %4599 = vmatpush.bf16.msra.mxu3 %v4838_v11  ;;  %v324_v11 = vld [vmem:[%s4872_s10 + $0x88] sm:$0xff] }
  0x3b   : > { %4123 = vmatmul.msk.bf16.gmra.mxu1 %vm435_vm0, %v340_v34  ;;  %v4980_v12 = vpack.c.bf16 %v324_v11, %v323_v10  ;;  %v4566_v34 = vld [vmem:[%s7083_s4 + $0xa8] sm:$0xff] }
  0x3c   : > { %2773 = vmatpush.bf16.msrb.mxu0 %v4566_v34 }
  0x3e   : > { %4600 = vmatpush.bf16.msra.mxu3 %v4855_v17 }
  0x42   : > { %4601 = vmatpush.bf16.msra.mxu3 %v4069_v26 }
  0x45   : > { %4108 = vmatmul.msk.bf16.gmra.mxu0 %vm435_vm0, %v341_v52  ;;  %4120 = vmatmul.msk.bf16.gmra.mxu3 %vm435_vm0, %v4923_v53 }
  0x46   : > { %4140 = vmatmul.msk.bf16.gmra.mxu2 %vm435_vm0, %v341_v52 }
  0x4b   : > { %4124 = vmatmul.msk.bf16.gmra.mxu1 %vm435_vm0, %v341_v52  ;;  %v4565_v52 = vld [vmem:[%s7083_s4 + $0xa0] sm:$0xff] }
  0x4c   : > { %2774 = vmatpush.bf16.msrb.mxu0 %v4565_v52 }
  0x55   : > { %4109 = vmatmul.msk.bf16.gmra.mxu0 %vm435_vm0, %v342_v58  ;;  %4121 = vmatmul.msk.bf16.gmra.mxu3 %vm435_vm0, %v4937_v59 }
  0x56   : > { %4141 = vmatmul.msk.bf16.gmra.mxu2 %vm435_vm0, %v342_v58 }
  0x5b   : > { %4125 = vmatmul.msk.bf16.gmra.mxu1 %vm435_vm0, %v342_v58 }
  0x65   : > { %4110 = vmatmul.msk.bf16.gmra.mxu0 %vm435_vm0, %v343_v63  ;;  %4134 = vmatmul.msk.bf16.vlgmr.msrb.gmra.mxu3 %vm435_vm0, %v4879_v29 }
  0x66   : > { %4142 = vmatmul.msk.bf16.gmra.mxu2 %vm435_vm0, %v343_v63 }
  0x6b   : > { %4126 = vmatmul.msk.bf16.gmra.mxu1 %vm435_vm0, %v343_v63  ;;  %v1222_v63 = vadd.s32 8, %v5061_v57 }
  0x6d   : > { %v1268_v6 = vand.u32 15, %v1222_v63 }
  0x6f   : > { %vm5094_vm2 = vcmp.lt.s32.totalorder %v1268_v6, 15 }
  0x70   : > { %vm2149_vm6 = vmpackc.low %vm5094_vm2, %vm5094_vm2 }
  0x75   : > { %4111 = vmatmul.msk.bf16.gmra.mxu0 %vm435_vm0, %v344_v2  ;;  %4135 = vmatmul.msk.bf16.gmra.mxu3 %vm435_vm0, %v4889_v35 }
  0x76   : > { %4143 = vmatmul.msk.bf16.gmra.mxu2 %vm435_vm0, %v344_v2 }
  0x7b   : > { %4127 = vmatmul.msk.bf16.gmra.mxu1 %vm435_vm0, %v344_v2 }
  0x85   : > { %4112 = vmatmul.msk.bf16.gmra.mxu0 %vm435_vm0, %v345_v5  ;;  %4136 = vmatmul.msk.bf16.gmra.mxu3 %vm435_vm0, %v4923_v53 }
  0x86   : > { %4144 = vmatmul.msk.bf16.gmra.mxu2 %vm435_vm0, %v345_v5 }
  0x8b   : > { %4128 = vmatmul.msk.bf16.gmra.mxu1 %vm435_vm0, %v345_v5 }
  0x95   : > { %4113 = vmatmul.msk.bf16.gmra.mxu0 %vm435_vm0, %v346_v9  ;;  %4137 = vmatmul.msk.bf16.gmra.mxu3 %vm435_vm0, %v4937_v59 }
  0x96   : > { %4145 = vmatmul.msk.bf16.gmra.mxu2 %vm435_vm0, %v346_v9 }
  0x9b   : > { %4129 = vmatmul.msk.bf16.gmra.mxu1 %vm435_vm0, %v346_v9 }
  0xa2   : > { %v4982_v13 = vpop.f32.mrf.mxu0 }
  0xa3   : > { %7103 = vst [vmem:[#allocation5_spill] sm:$0xff] %v4982_v13 }
  0xa5   : > { %4114 = vmatmul.msk.bf16.gmra.mxu0 %vm435_vm0, %v4980_v12  ;;  %4150 = vmatmul.msk.bf16.vlgmr.msra.gmra.mxu3 %vm435_vm0, %v4879_v29  ;;  %v4556_v29 = vld [vmem:[%s7083_s4 + $0x58] sm:$0xff] }
  0xa6   : > { %4146 = vmatmul.msk.bf16.gmra.mxu2 %vm435_vm0, %v4980_v12 }
  0xa7   : > { %3024 = vmatpush.bf16.msrb.mxu2 %v4556_v29 }
  0xa8   : > { %v4991_v14 = vpop.f32.mrf.mxu3 }
  0xa9   : > { %7104 = vst [vmem:[#allocation6_spill] sm:$0xff] %v4991_v14  ;;  %v671_v16 = vpop.f32.mrf.mxu2 }
  0xaa   : > { %v4998_v17 = vpop.f32.mrf.mxu0  ;;  %v825_v18 = vadd.f32 %v4996_v15, %v671_v16  ;;  %v330_v16 = vld [vmem:[%s4872_s10 + $0xb8] sm:$0xff] }
  0xab   : > { %7105 = vst [vmem:[#allocation7_spill] sm:$0xff] %v4998_v17  ;;  %3025 = vmatpush.bf16.msrb.mxu2 %v4555_v36  ;;  %4130 = vmatmul.msk.bf16.gmra.mxu1 %vm435_vm0, %v4980_v12  ;;  %v329_v12 = vld [vmem:[%s4872_s10 + $0xb0] sm:$0xff]  ;;  %s3988_s10 = sshll.u32 %s3985_s12, 4  ;;  %s3989_s10 = int_to_ptr.hbm [resolvable:$true] %s3988_s10 }
  0xac   : > { %v857_v21 = vmax.f32 %v825_v18, 0.0  ;;  %s4663_s17 = sshra.s32 %s3989_s10, 4  ;;  %s4664_s17 = int_to_ptr.hbm [resolvable:$true] %s4663_s17 }
  0xad   : > { %s4665_s18 = scalar_lea.hbm %s4664_s17, 256  ;;  %p4670_p0 = scmp.lt.s32.totalorder %s4664_s17, %s7087_s8 }
  0xae   : > { %v889_v27 = vpack.c.bf16 %v857_v21, %v857_v21  ;;  %v4564_v21 = vld [vmem:[%s7083_s4 + $0x98] sm:$0xff]  ;;  %p4666_p11 = scmp.ne.s32.totalorder %s4664_s17, %s4665_s18  ;;  %p4671_p1 = scmp.lt.s32.totalorder %s4669_s22, %s4665_s18 }
  0xaf   : > { %3026 = vmatpush.bf16.msrb.mxu2 %v4554_v41  ;;  %2678 = vmatpush.bf16.msrb.mxu3 %v4564_v21  ;;  %v1226_v41 = vadd.s32 40, %v5061_v57 }
  0xb0   : > { %v5003_v22 = vpop.f32.mrf.mxu3  ;;  %v954_v31 = vunpack.c.l.b16 %v889_v27  ;;  %v5107_v27 = vpack.c.bf16 %v330_v16, %v329_v12  ;;  %p4667_p12 = pnand %p4666_p11, %p4801_p5  ;;  %p4672_p2 = por %p4671_p1, %p4670_p0 }
  0xb1   : > { %7106 = vst [vmem:[#allocation8_spill] sm:$0xff] %v5003_v22  ;;  %v673_v23 = vpop.f32.mrf.mxu2 }
  0xb2   : > { %v826_v25 = vadd.f32 %v4996_v15, %v673_v23  ;;  %v5008_v26 = vpop.f32.mrf.mxu0  ;;  %p4668_p13 = pneg %p4667_p12 }
  0xb3   : > { %7107 = vst [vmem:[#allocation9_spill] sm:$0xff] %v5008_v26  ;;  %3027 = vmatpush.bf16.msrb.mxu2 %v4553_v54 }
  0xb4   : > { %v858_v28 = vmax.f32 %v826_v25, 0.0  ;;  %p4673_p3 = pnand %p4672_p2, %p4668_p13 }
  0xb5   : > { %4115 = vmatmul.msk.bf16.gmra.mxu0 %vm435_vm0, %v5005_v24  ;;  %4151 = vmatmul.msk.bf16.gmra.mxu3 %vm435_vm0, %v4889_v35 }
  0xb6   : > { %v890_v30 = vpack.c.bf16 %v858_v28, %v858_v28  ;;  %4147 = vmatmul.msk.bf16.gmra.mxu2 %vm435_vm0, %v5005_v24 }
  0xb8   : > { %v955_v32 = vunpack.c.l.b16 %v890_v30  ;;  %v5020_v33 = vpop.f32.mrf.mxu3 }
  0xb9   : > { %7108 = vst [vmem:[#allocation10_spill] sm:$0xff] %v5020_v33  ;;  %v676_v35 = vpop.f32.mrf.mxu2 }
  0xba   : > { %v5028_v37 = vpop.f32.mrf.mxu0  ;;  %v5030_v38 = vpack.c.b16 %v955_v32, %v954_v31  ;;  %v827_v39 = vadd.f32 %v4996_v15, %v676_v35  ;;  %v7090_v31 = vmov 0  }
  0xbb   : > { %7109 = vst [vmem:[#allocation11_spill] sm:$0xff] %v5028_v37  ;;  %v1826_v32 = vsel %vm1792_vm4, 65537, %v7090_v31  ;;  %v2185_v34 = vsel %vm2151_vm5, 65537, %v7090_v31  ;;  %4131 = vmatmul.msk.bf16.gmra.mxu1 %vm435_vm0, %v5005_v24  ;;  %v5144_v63 = vunpack.c.l.b16 %v7090_v31 }
  0xbc   : > { %2406 = vrot.lane.b32.xlu0 %v5030_v38, %s4713_s19  ;;  %v1004_v40 = vshrl.u32 %v5030_v38, 16  ;;  %v1007_v42 = vshll.u32 %v5030_v38, 16  ;;  %v859_v47 = vmax.f32 %v827_v39, 0.0  ;;  %v2183_v39 = vsel %vm2149_vm6, 65537, %v7090_v31  ;;  %v4562_v38 = vld [vmem:[%s7083_s4 + $0x88] sm:$0xff] }
  0xbd   : > { %v1860_v44 = vunpack.c.l.b16 %v1826_v32  ;;  %v2219_v45 = vunpack.c.l.b16 %v2185_v34 }
  0xbe   : > { %v1006_v46 = vrot.slane %v1004_v40, 7  ;;  %v891_v58 = vpack.c.bf16 %v859_v47, %v859_v47  ;;  %v1152_v24 = vrot.slane %v1007_v42, 1 }
  0xbf   : > { %v5139_v61 = vunpack.i.l.s16 %v1860_v44  ;;  %v1228_v44 = vadd.s32 56, %v5061_v57 }
  0xc0   : > { %v5044_v48 = vpop.f32.mrf.mxu3  ;;  %v5048_v49 = vor.u32 %v1007_v42, %v1006_v46  ;;  %v956_v0 = vunpack.c.l.b16 %v891_v58  ;;  %v1153_v12 = vor.u32 %v1152_v24, %v1004_v40  ;;  %v1218_v32 = vsel %vm5172_vm13, 0, %v1152_v24 }
  0xc1   : > { %7110 = vst [vmem:[#allocation12_spill] sm:$0xff] %v5044_v48  ;;  %v678_v50 = vpop.f32.mrf.mxu2  ;;  %vm5167_vm12 = vcmp.ne.s32.totalorder %v5139_v61, %v5144_v63 }
  0xc2   : > { %v828_v55 = vadd.f32 %v4996_v15, %v678_v50  ;;  %v5059_v56 = vpop.f32.mrf.mxu0 }
  0xc3   : > { %7111 = vst [vmem:[#allocation13_spill] sm:$0xff] %v5059_v56 }
  0xc4   : > { %v860_v60 = vmax.f32 %v828_v55, 0.0  ;;  %v1296_v55 = vand.u32 15, %v1226_v41 }
  0xc5   : > { %4116 = vmatmul.msk.bf16.gmra.mxu0 %vm435_vm0, %v5050_v51  ;;  %4152 = vmatmul.msk.bf16.gmra.mxu3 %vm435_vm0, %v4923_v53 }
  0xc6   : > { %v892_v62 = vpack.c.bf16 %v860_v60, %v860_v60  ;;  %4148 = vmatmul.msk.bf16.gmra.mxu2 %vm435_vm0, %v5050_v51  ;;  %vm5153_vm10 = vcmp.lt.s32.totalorder %v1296_v55, 15  ;;  %v1310_v55 = vand.u32 15, %v1228_v44 }
  0xc7   : > { %vm2153_vm15 = vmpackc.low %vm5153_vm10, %vm5153_vm10 }
  0xc8   : > { %v957_v1 = vunpack.c.l.b16 %v892_v62  ;;  %v5073_v2 = vpop.f32.mrf.mxu3  ;;  %v4191_v62 = vunpack.i.l.s16 %v2219_v45  ;;  %vm5219_vm3 = vcmp.lt.s32.totalorder %v1310_v55, 15  ;;  %v4559_v55 = vld [vmem:[%s7083_s4 + $0x70] sm:$0xff] }
  0xc9   : > { %7112 = vst [vmem:[#allocation14_spill] sm:$0xff] %v5073_v2  ;;  %v681_v3 = vpop.f32.mrf.mxu2  ;;  %vm2155_vm5 = vmpackc.low %vm5219_vm3, %vm5219_vm3 }
  0xca   : > { %v5075_v53 = vpop.f32.mrf.mxu0  ;;  %v5077_v5 = vpack.c.b16 %v957_v1, %v956_v0  ;;  %v829_v7 = vadd.f32 %v4996_v15, %v681_v3  ;;  %v5147_v0 = vunpack.c.h.b16 %v7090_v31 }
  0xcb   : > { %7113 = vst [vmem:[#allocation15_spill] sm:$0xff] %v5075_v53  ;;  %4132 = vmatmul.msk.bf16.gmra.mxu1 %vm435_vm0, %v5050_v51 }
  0xcc   : > { %2408 = vrot.lane.b32.xlu0 %v5077_v5, %s4713_s19  ;;  %v1011_v8 = vshrl.u32 %v5077_v5, 16  ;;  %v1014_v11 = vshll.u32 %v5077_v5, 16  ;;  %v861_v19 = vmax.f32 %v829_v7, 0.0  ;;  %vm2279_vm11 = vcmp.ne.s32.totalorder %v4191_v62, %v5147_v0 }
  0xcd   : > { %vm2280_vm1 = vmpackc.low %vm2279_vm11, %vm5167_vm12 }
  0xce   : > { %v5089_v10 = vrot.slane %v1011_v8, 7  ;;  %v893_v35 = vpack.c.bf16 %v861_v19, %v861_v19  ;;  %v1154_v6 = vrot.slane %v1014_v11, 1 }
  0xd0   : > { %v5098_v20 = vpop.f32.mrf.mxu3  ;;  %v1016_v23 = vor.u32 %v1014_v11, %v5089_v10  ;;  %v958_v47 = vunpack.c.l.b16 %v893_v35  ;;  %v2187_v35 = vsel %vm2153_vm15, 65537, %v7090_v31 }
  0xd1   : > { %7118 = vst [vmem:[#allocation16_spill] sm:$0xff] %v5098_v20  ;;  %v683_v25 = vpop.f32.mrf.mxu2 }
  0xd2   : > { %v830_v28 = vadd.f32 %v4996_v15, %v683_v25  ;;  %v5113_v29 = vpop.f32.mrf.mxu0  ;;  %v5116_v30 = vsel %vm1002_vm7, %v1006_v46, %v1016_v23  ;;  %v2217_v46 = vunpack.c.l.b16 %v2183_v39  ;;  %v1155_v23 = vsel %vm1151_vm8, %v1153_v12, %v1154_v6 }
  0xd3   : > { %7119 = vst [vmem:[#allocation17_spill] sm:$0xff] %v5113_v29  ;;  %v2387_v41 = vsel %vm2280_vm1, %v1155_v23, 0 }
  0xd4   : > { %v862_v36 = vmax.f32 %v830_v28, 0.0  ;;  %v4189_v1 = vunpack.i.l.s16 %v2217_v46  ;;  %v2221_v46 = vunpack.c.l.b16 %v2187_v35 }
  0xd5   : > { %4117 = vmatmul.msk.bf16.gmra.mxu0 %vm435_vm0, %v5107_v27  ;;  %4153 = vmatmul.msk.bf16.gmra.mxu3 %vm435_vm0, %v4937_v59  ;;  %v4563_v59 = vld [vmem:[%s7083_s4 + $0x90] sm:$0xff] }
  0xd6   : > { %v894_v43 = vpack.c.bf16 %v862_v36, %v862_v36  ;;  %4149 = vmatmul.msk.bf16.gmra.mxu2 %vm435_vm0, %v5107_v27  ;;  %2679 = vmatpush.bf16.msrb.mxu3 %v4563_v59  ;;  %vm2272_vm14 = vcmp.ne.s32.totalorder %v4189_v1, %v5147_v0  ;;  %v4561_v59 = vld [vmem:[%s7083_s4 + $0x80] sm:$0xff]  ;;  %v4193_v1 = vunpack.i.l.s16 %v2221_v46  ;;  %v1230_v46 = vadd.s32 72, %v5061_v57 }
  0xd7   : > { %vm2273_vm2 = vmpackc.low %vm2272_vm14, %vm5167_vm12 }
  0xd8   : > { %v959_v50 = vunpack.c.l.b16 %v894_v43  ;;  %v5130_v52 = vpop.f32.mrf.mxu3  ;;  %v2386_v43 = vsel %vm2273_vm2, %v1218_v32, 0  ;;  %vm2286_vm4 = vcmp.ne.s32.totalorder %v4193_v1, %v5147_v0 }
  0xd9   : > { %7120 = vst [vmem:[#allocation18_spill] sm:$0xff] %v5130_v52  ;;  %v686_v54 = vpop.f32.mrf.mxu2  ;;  %vm2287_vm6 = vmpackc.low %vm2286_vm4, %vm5167_vm12 }
  0xda   : > { %v5135_v58 = vpop.f32.mrf.mxu0  ;;  %v5137_v60 = vpack.c.b16 %v959_v50, %v958_v47  ;;  %v831_v3 = vadd.f32 %v4996_v15, %v686_v54  ;;  %2680 = vmatpush.bf16.msrb.mxu3 %v4562_v38 }
  0xdb   : > { %7121 = vst [vmem:[#allocation19_spill] sm:$0xff] %v5135_v58  ;;  %4133 = vmatmul.msk.bf16.gmra.mxu1 %vm435_vm0, %v5107_v27 }
  0xdc   : > { %2410 = vrot.lane.b32.xlu1 %v5137_v60, %s4713_s19  ;;  %v1019_v4 = vshrl.u32 %v5137_v60, 16  ;;  %v1022_v9 = vshll.u32 %v5137_v60, 16  ;;  %v863_v18 = vmax.f32 %v831_v3, 0.0 }
  0xde   : > { %v5159_v42 = vrot.slane %v1019_v4, 7  ;;  %v895_v36 = vpack.c.bf16 %v863_v18, %v863_v18  ;;  %2681 = vmatpush.bf16.msrb.mxu3 %v4561_v59  ;;  %v1157_v7 = vrot.slane %v1022_v9, 1 }
  0xe0   : > { %v5177_v19 = vpop.f32.mrf.mxu3  ;;  %v1024_v40 = vor.u32 %v1022_v9, %v5159_v42  ;;  %v960_v47 = vunpack.c.l.b16 %v895_v36  ;;  %v4552_v9 = vld [vmem:[%s7083_s4 + $0x38] sm:$0xff] }
  0xe1   : > { %7128 = vst [vmem:[#allocation20_spill] sm:$0xff] %v5177_v19  ;;  %v688_v21 = vpop.f32.mrf.mxu2  ;;  %2931 = vmatpush.bf16.msrb.mxu1 %v4552_v9 }
  0xe2   : > { %v832_v25 = vadd.f32 %v4996_v15, %v688_v21  ;;  %v5190_v28 = vpop.f32.mrf.mxu0  ;;  %v5198_v34 = vsel %vm1002_vm7, %v5089_v10, %v1024_v40  ;;  %v1156_v40 = vor.u32 %v1154_v6, %v1011_v8 }
  0xe3   : > { %7129 = vst [vmem:[#allocation21_spill] sm:$0xff] %v5190_v28 }
  0xe4   : > { %v864_v39 = vmax.f32 %v832_v25, 0.0  ;;  %v4560_v25 = vld [vmem:[%s7083_s4 + $0x78] sm:$0xff]  ;;  %v1158_v5 = vsel %vm1151_vm8, %v1156_v40, %v1157_v7 }
  0xe5   : > { %4294 = vmatmul.msk.bf16.vlgmr.msrb.gmra.mxu0 %vm435_vm0, %v2387_v41  ;;  %2682 = vmatpush.bf16.msrb.mxu3 %v4560_v25  ;;  %v4551_v25 = vld [vmem:[%s7083_s4 + $0x30] sm:$0xff] }
  0xe6   : > { %v896_v45 = vpack.c.bf16 %v864_v39, %v864_v39  ;;  %4360 = vmatmul.msk.bf16.vlgmr.msrb.gmra.mxu2 %vm435_vm0, %v2386_v43  ;;  %v2189_v39 = vsel %vm2155_vm5, 65537, %v7090_v31  ;;  %2932 = vmatpush.bf16.msrb.mxu1 %v4551_v25 }
  0xe8   : > { %v961_v10 = vunpack.c.l.b16 %v896_v45  ;;  %v5206_v50 = vpop.f32.mrf.mxu3  ;;  %v5251_v45 = vsel %vm2287_vm6, %v1158_v5, 0  ;;  %v1159_v5 = vor.u32 %v1157_v7, %v1019_v4 }
  0xe9   : > { %7130 = vst [vmem:[#allocation22_spill] sm:$0xff] %v5206_v50  ;;  %v691_v54 = vpop.f32.mrf.mxu2  ;;  %2683 = vmatpush.bf16.msrb.mxu3 %v4559_v55  ;;  %v1232_v55 = vadd.s32 88, %v5061_v57 }
  0xea   : > { %v5211_v62 = vpop.f32.mrf.mxu0  ;;  %v5213_v24 = vpack.c.b16 %v961_v10, %v960_v47  ;;  %v833_v3 = vadd.f32 %v4996_v15, %v691_v54  ;;  %v2223_v10 = vunpack.c.l.b16 %v2189_v39 }
  0xeb   : > { %7131 = vst [vmem:[#allocation23_spill] sm:$0xff] %v5211_v62 }
  0xec   : > { %2412 = vrot.lane.b32.xlu1 %v5213_v24, %s4713_s19  ;;  %v1027_v51 = vshrl.u32 %v5213_v24, 16  ;;  %v1030_v38 = vshll.u32 %v5213_v24, 16  ;;  %v865_v21 = vmax.f32 %v833_v3, 0.0  ;;  %v1324_v3 = vand.u32 15, %v1230_v46 }
  0xee   : > { %v1029_v18 = vrot.slane %v1027_v51, 7  ;;  %v897_v43 = vpack.c.bf16 %v865_v21, %v865_v21  ;;  %v4195_v21 = vunpack.i.l.s16 %v2223_v10  ;;  %v1160_v9 = vrot.slane %v1030_v38, 1 }
  0xef   : > { %vm5272_vm9 = vcmp.lt.s32.totalorder %v1324_v3, 15 }
  0xf0   : > { %v5229_v23 = vpop.f32.mrf.mxu3  ;;  %v1032_v32 = vor.u32 %v1030_v38, %v1029_v18  ;;  %vm2293_vm10 = vcmp.ne.s32.totalorder %v4195_v21, %v5147_v0  ;;  %vm2157_vm11 = vmpackc.low %vm5272_vm9, %vm5272_vm9  ;;  %v4558_v38 = vld [vmem:[%s7083_s4 + $0x68] sm:$0xff]  ;;  %v1161_v46 = vsel %vm1151_vm8, %v1159_v5, %v1160_v9  ;;  %v4557_v5 = vld [vmem:[%s7083_s4 + $0x60] sm:$0xff] }
  0xf1   : > { %7134 = vst [vmem:[#allocation24_spill] sm:$0xff] %v5229_v23  ;;  %v693_v35 = vpop.f32.mrf.mxu2  ;;  %vm2294_vm14 = vmpackc.low %vm2293_vm10, %vm5167_vm12  ;;  %2684 = vmatpush.bf16.msrb.mxu3 %v4558_v38  ;;  %v1338_v38 = vand.u32 15, %v1232_v55 }
  0xf2   : > { %v834_v8 = vadd.f32 %v4996_v15, %v693_v35  ;;  %v5244_v6 = vpop.f32.mrf.mxu0  ;;  %v5248_v36 = vsel %vm1002_vm7, %v5159_v42, %v1032_v32  ;;  %v962_v42 = vunpack.c.l.b16 %v897_v43 }
  0xf3   : > { %7135 = vst [vmem:[#allocation25_spill] sm:$0xff] %v5244_v6  ;;  %vm5323_vm15 = vcmp.lt.s32.totalorder %v1338_v38, 15 }
  0xf4   : > { %v866_v44 = vmax.f32 %v834_v8, 0.0  ;;  %vm2159_vm2 = vmpackc.low %vm5323_vm15, %vm5323_vm15 }
  0xf5   : > { %4295 = vmatmul.msk.bf16.gmra.mxu0 %vm435_vm0, %v5251_v45  ;;  %2685 = vmatpush.bf16.msrb.mxu3 %v4557_v5 }
  0xf6   : > { %v898_v47 = vpack.c.bf16 %v866_v44, %v866_v44  ;;  %4361 = vmatmul.msk.bf16.gmra.mxu2 %vm435_vm0, %v2387_v41 }
  0xf8   : > { %v963_v59 = vunpack.c.l.b16 %v898_v47  ;;  %v5259_v54 = vpop.f32.mrf.mxu3  ;;  %v2191_v47 = vsel %vm2157_vm11, 65537, %v7090_v31 }
  0xf9   : > { %7136 = vst [vmem:[#allocation26_spill] sm:$0xff] %v5259_v54  ;;  %v696_v1 = vpop.f32.mrf.mxu2  ;;  %v2225_v3 = vunpack.c.l.b16 %v2191_v47 }
  0xfa   : > { %v5264_v12 = vpop.f32.mrf.mxu0  ;;  %v5266_v40 = vpack.c.b16 %v963_v59, %v962_v42  ;;  %v835_v41 = vadd.f32 %v4996_v15, %v696_v1  ;;  %v5300_v59 = vsel %vm2294_vm14, %v1161_v46, 0  ;;  %vm1147_vm14 = vcmask 1040384  }
  0xfb   : > { %7137 = vst [vmem:[#allocation27_spill] sm:$0xff] %v5264_v12  ;;  %v4197_v46 = vunpack.i.l.s16 %v2225_v3  ;;  %v1162_v3 = vor.u32 %v1160_v9, %v1027_v51 }
  0xfc   : > { %2414 = vrot.lane.b32.xlu2 %v5266_v40, %s4713_s19  ;;  %v7089_v27 = vshrl.u32 %v5266_v40, 16  ;;  %v1038_v35 = vshll.u32 %v5266_v40, 16  ;;  %v867_v8 = vmax.f32 %v835_v41, 0.0 }
  0xfd   : > { %vm2300_vm1 = vcmp.ne.s32.totalorder %v4197_v46, %v5147_v0  ;;  %v2193_v46 = vsel %vm2159_vm2, 65537, %v7090_v31 }
  0xfe   : > { %v1037_v32 = vrot.slane %v7089_v27, 7  ;;  %v899_v10 = vpack.c.bf16 %v867_v8, %v867_v8  ;;  %vm2301_vm3 = vmpackc.low %vm2300_vm1, %vm5167_vm12 }
  0xff   : > { %vm5431_vm1 = vmand %vm1147_vm14, %vm1002_vm7 }
 0x100   : > { %v5282_v39 = vpop.f32.mrf.mxu3  ;;  %v1040_v43 = vor.u32 %v1038_v35, %v1037_v32  ;;  %v964_v21 = vunpack.c.l.b16 %v899_v10  ;;  %v1163_v10 = vrot.slane %v1038_v35, 1  ;;  %v4576_v35 = vld [vmem:[%s7083_s4 + $0xf8] sm:$0xff] }
 0x101   : > { %7140 = vst [vmem:[#allocation28_spill] sm:$0xff] %v5282_v39  ;;  %v698_v44 = vpop.f32.mrf.mxu2  ;;  %3208 = vmatpush.bf16.msra.mxu3 %v4576_v35  ;;  %v2227_v35 = vunpack.c.l.b16 %v2193_v46 }
 0x102   : > { %v836_v60 = vadd.f32 %v4996_v15, %v698_v44  ;;  %v5294_v4 = vpop.f32.mrf.mxu0  ;;  %v5297_v7 = vsel %vm1002_vm7, %v1029_v18, %v1040_v43  ;;  %v1164_v38 = vsel %vm1151_vm8, %v1162_v3, %v1163_v10  ;;  %v1234_v3 = vadd.s32 104, %v5061_v57 }
 0x103   : > { %7141 = vst [vmem:[#allocation29_spill] sm:$0xff] %v5294_v4  ;;  %v5355_v27 = vsel %vm2301_vm3, %v1164_v38, 0  ;;  %v4199_v52 = vunpack.i.l.s16 %v2227_v35  ;;  %vm5438_vm3 = vcmp.ne.s32.totalorder %v5139_v61, %v5147_v0 }
 0x104   : > { %v868_v42 = vmax.f32 %v836_v60, 0.0 }
 0x105   : > { %4296 = vmatmul.msk.bf16.gmra.mxu0 %vm435_vm0, %v5300_v59  ;;  %vm2307_vm9 = vcmp.ne.s32.totalorder %v4199_v52, %v5147_v0 }
 0x106   : > { %v900_v1 = vpack.c.bf16 %v868_v42, %v868_v42  ;;  %4362 = vmatmul.msk.bf16.gmra.mxu2 %vm435_vm0, %v5251_v45  ;;  %vm2308_vm11 = vmpackc.low %vm2307_vm9, %vm5167_vm12 }
 0x108   : > { %v965_v41 = vunpack.c.l.b16 %v900_v1  ;;  %v5307_v18 = vpop.f32.mrf.mxu3 }
 0x109   : > { %7142 = vst [vmem:[#allocation30_spill] sm:$0xff] %v5307_v18  ;;  %v701_v8 = vpop.f32.mrf.mxu2 }
 0x10a   : > { %v5315_v43 = vpop.f32.mrf.mxu0  ;;  %v5317_v44 = vpack.c.b16 %v965_v41, %v964_v21  ;;  %v837_v60 = vadd.f32 %v4996_v15, %v701_v8  ;;  %v1223_v21 = vadd.s32 16, %v5061_v57 }
 0x10b   : > { %7143 = vst [vmem:[#allocation31_spill] sm:$0xff] %v5315_v43  ;;  %v5680_v43 = vld [vmem:[%s7081_s2] ss:$0 sm:$0xff] }
 0x10c   : > { %2416 = vrot.lane.b32.xlu2 %v5317_v44, %s4713_s19  ;;  %v7088_v47 = vshrl.u32 %v5317_v44, 16  ;;  %v1046_v1 = vshll.u32 %v5317_v44, 16  ;;  %v869_v41 = vmax.f32 %v837_v60, 0.0  ;;  %v1275_v60 = vand.u32 15, %v1223_v21 }
 0x10e   : > { %v5329_v55 = vrot.slane %v7088_v47, 7  ;;  %v901_v42 = vpack.c.bf16 %v869_v41, %v869_v41  ;;  %vm5362_vm4 = vcmp.gt.s32.totalorder %v1275_v60, 0  ;;  %v5382_v60 = vrot.slane %v1046_v1, 1 }
 0x10f   : > { %vm1791_vm5 = vmpackc.low %vm5362_vm4, %vm5362_vm4 }
 0x110   : > { %v5336_v25 = vpop.f32.mrf.mxu3  ;;  %v1048_v5 = vor.u32 %v1046_v1, %v5329_v55 }
 0x111   : > { %7146 = vst [vmem:[#allocation32_spill] sm:$0xff] %v5336_v25  ;;  %v703_v8 = vpop.f32.mrf.mxu2 }
 0x112   : > { %v838_v24 = vadd.f32 %v4996_v15, %v703_v8  ;;  %v5349_v51 = vpop.f32.mrf.mxu0  ;;  %v5352_v9 = vsel %vm1002_vm7, %v1037_v32, %v1048_v5  ;;  %v966_v5 = vunpack.c.l.b16 %v901_v42  ;;  %v4580_v8 = vld [vmem:[%s7083_s4 + $0x118] sm:$0xff]  ;;  %v7152_v42 = vmov 0  }
 0x113   : > { %7147 = vst [vmem:[#allocation33_spill] sm:$0xff] %v5349_v51  ;;  %3301 = vmatpush.bf16.msra.mxu0 %v4580_v8  ;;  %v7155_v8 = vshrl.u32 %v5266_v40, 16 }
 0x114   : > { %v870_v47 = vmax.f32 %v838_v24, 0.0  ;;  %v1352_v24 = vand.u32 15, %v1234_v3  ;;  %v1825_v3 = vsel %vm1791_vm5, 65537, %v7152_v42 }
 0x115   : > { %4297 = vmatmul.msk.bf16.gmra.mxu0 %vm435_vm0, %v5355_v27  ;;  %v1165_v1 = vor.u32 %v1163_v10, %v7155_v8  ;;  %v1236_v8 = vadd.s32 120, %v5061_v57 }
 0x116   : > { %v902_v19 = vpack.c.bf16 %v870_v47, %v870_v47  ;;  %4363 = vmatmul.msk.bf16.gmra.mxu2 %vm435_vm0, %v5300_v59  ;;  %vm5385_vm6 = vcmp.lt.s32.totalorder %v1352_v24, 15  ;;  %v1859_v24 = vunpack.c.l.b16 %v1825_v3 }
 0x117   : > { %vm2161_vm10 = vmpackc.low %vm5385_vm6, %vm5385_vm6  ;;  %v1167_v20 = vsel %vm1151_vm8, %v1165_v1, %v5382_v60 }
 0x118   : > { %v967_v21 = vunpack.c.l.b16 %v902_v19  ;;  %v5366_v41 = vpop.f32.mrf.mxu3  ;;  %v5420_v1 = vsel %vm2308_vm11, %v1167_v20, 0  ;;  %v4154_v2 = vunpack.i.l.s16 %v1859_v24  ;;  %v1252_v20 = vadd.s32 248, %v5061_v57 }
 0x119   : > { %7150 = vst [vmem:[#allocation34_spill] sm:$0xff] %v5366_v41  ;;  %v706_v38 = vpop.f32.mrf.mxu2 }
 0x11a   : > { %v5371_v31 = vpop.f32.mrf.mxu0  ;;  %v5373_v47 = vpack.c.b16 %v967_v21, %v966_v5  ;;  %v839_v19 = vadd.f32 %v4996_v15, %v706_v38  ;;  %v1225_v21 = vadd.s32 32, %v5061_v57  ;;  %v2195_v5 = vsel %vm2161_vm10, 65537, %v7152_v42 }
 0x11b   : > { %7151 = vst [vmem:[#allocation35_spill] sm:$0xff] %v5371_v31  ;;  %vm1914_vm2 = vcmp.ne.s32.totalorder %v4154_v2, %v5144_v63  ;;  %v1149_v2 = vsel %vm5431_vm1, 0, %v5048_v49  ;;  %v1231_v31 = vadd.s32 80, %v5061_v57 }
 0x11c   : > { %2418 = vrot.lane.b32.xlu0 %v5373_v47, %s4713_s19  ;;  %v7092_v46 = vshrl.u32 %v5373_v47, 16  ;;  %v1054_v32 = vshll.u32 %v5373_v47, 16  ;;  %v871_v38 = vmax.f32 %v839_v19, 0.0  ;;  %v1289_v19 = vand.u32 15, %v1225_v21  ;;  %vm1916_vm5 = vmpackc.low %vm5438_vm3, %vm1914_vm2 }
 0x11e   : > { %v5391_v35 = vrot.slane %v7092_v46, 7  ;;  %v4550_v46 = vld [vmem:[%s7083_s4 + $0x28] sm:$0xff]  ;;  %vm5426_vm15 = vcmp.gt.s32.totalorder %v1289_v19, 0 }
 0x11f   : > { %2933 = vmatpush.bf16.msrb.mxu1 %v4550_v46  ;;  %v2229_v46 = vunpack.c.l.b16 %v2195_v5  ;;  %vm1793_vm4 = vmpackc.low %vm5426_vm15, %vm5426_vm15 }
 0x120   : > { %v5398_v41 = vpop.f32.mrf.mxu3  ;;  %v1056_v25 = vor.u32 %v1054_v32, %v5391_v35 }
 0x121   : > { %7156 = vst [vmem:[#allocation36_spill] sm:$0xff] %v5398_v41  ;;  %v708_v52 = vpop.f32.mrf.mxu2  ;;  %v903_v41 = vpack.c.bf16 %v871_v38, %v871_v38 }
 0x122   : > { %v840_v40 = vadd.f32 %v4996_v15, %v708_v52  ;;  %v5412_v10 = vpop.f32.mrf.mxu0  ;;  %v5416_v3 = vsel %vm1002_vm7, %v5329_v55, %v1056_v25  ;;  %v1366_v25 = vand.u32 15, %v1236_v8  ;;  %v4201_v8 = vunpack.i.l.s16 %v2229_v46 }
 0x123   : > { %7157 = vst [vmem:[#allocation37_spill] sm:$0xff] %v5412_v10  ;;  %v968_v21 = vunpack.c.l.b16 %v903_v41  ;;  %v1827_v46 = vsel %vm1793_vm4, 65537, %v7152_v42 }
 0x124   : > { %v872_v18 = vmax.f32 %v840_v40, 0.0  ;;  %vm5455_vm6 = vcmp.lt.s32.totalorder %v1366_v25, 15  ;;  %vm2314_vm9 = vcmp.ne.s32.totalorder %v4201_v8, %v5147_v0  ;;  %v1861_v54 = vunpack.c.l.b16 %v1827_v46 }
 0x125   : > { %4298 = vmatmul.msk.bf16.gmra.mxu0 %vm435_vm0, %v5420_v1  ;;  %vm2163_vm10 = vmpackc.low %vm5455_vm6, %vm5455_vm6 }
 0x126   : > { %v904_v52 = vpack.c.bf16 %v872_v18, %v872_v18  ;;  %4364 = vmatmul.msk.bf16.gmra.mxu2 %vm435_vm0, %v5355_v27  ;;  %vm2315_vm11 = vmpackc.low %vm2314_vm9, %vm5167_vm12 }
 0x128   : > { %v969_v38 = vunpack.c.l.b16 %v904_v52  ;;  %v731_v40 = vpop.f32.mrf.mxu3 }
 0x129   : > { %v711_v24 = vpop.f32.mrf.mxu2  ;;  %v849_v19 = vadd.f32 %v4996_v15, %v731_v40  ;;  %v5465_v40 = vrot.slane %v1054_v32, 1  ;;  %v7167_v32 = vshrl.u32 %v5317_v44, 16 }
 0x12a   : > { %v5446_v41 = vpop.f32.mrf.mxu0  ;;  %v5448_v5 = vpack.c.b16 %v969_v38, %v968_v21  ;;  %v841_v52 = vadd.f32 %v4996_v15, %v711_v24  ;;  %v1227_v21 = vadd.s32 48, %v5061_v57  ;;  %v2029_v24 = vsel %vm1916_vm5, %v1149_v2, 0  ;;  %v4575_v2 = vld [vmem:[%s7083_s4 + $0xf0] sm:$0xff] }
 0x12b   : > { %7164 = vst [vmem:[#allocation38_spill] sm:$0xff] %v5446_v41  ;;  %v881_v38 = vmax.f32 %v849_v19, 0.0  ;;  %v1168_v19 = vor.u32 %v5382_v60, %v7167_v32  ;;  %v2197_v60 = vsel %vm2163_vm10, 65537, %v7152_v42  ;;  %3209 = vmatpush.bf16.msra.mxu3 %v4575_v2 }
 0x12c   : > { %2420 = vrot.lane.b32.xlu1 %v5448_v5, %s4713_s19  ;;  %v7093_v55 = vshrl.u32 %v5448_v5, 16  ;;  %v1062_v25 = vshll.u32 %v5448_v5, 16  ;;  %v1303_v23 = vand.u32 15, %v1227_v21  ;;  %v2231_v61 = vunpack.c.l.b16 %v2197_v60 }
 0x12d   : > { %v913_v50 = vpack.c.bf16 %v881_v38, %v881_v38  ;;  %v1170_v44 = vsel %vm1151_vm8, %v1168_v19, %v5465_v40  ;;  %v4156_v38 = vunpack.i.l.s16 %v1861_v54 }
 0x12e   : > { %v5469_v49 = vrot.slane %v7093_v55, 7  ;;  %v2407_v39 = vpop.permute.xlu0 %2406  ;;  %v873_v55 = vmax.f32 %v841_v52, 0.0  ;;  %v5509_v32 = vsel %vm2315_vm11, %v1170_v44, 0  ;;  %vm5513_vm14 = vcmp.gt.s32.totalorder %v1303_v23, 0  ;;  %v4549_v23 = vld [vmem:[%s7083_s4 + $0x20] sm:$0xff] }
 0x12f   : > { %v5477_v48 = vsel %vm435_vm0, %v2029_v24, %v2407_v39  ;;  %v978_v19 = vunpack.c.l.b16 %v913_v50  ;;  %vm1921_vm15 = vcmp.ne.s32.totalorder %v4156_v38, %v5144_v63  ;;  %v4203_v50 = vunpack.i.l.s16 %v2231_v61  ;;  %vm1795_vm2 = vmpackc.low %vm5513_vm14, %vm5513_vm14  ;;  %2934 = vmatpush.bf16.msrb.mxu1 %v4549_v23 }
 0x130   : > { %2686 = vmatmul.bf16.vlgmr.msrb.gmra.mxu3 %v5477_v48  ;;  %v733_v33 = vpop.f32.mrf.mxu3  ;;  %v1064_v22 = vor.u32 %v1062_v25, %v5469_v49  ;;  %v905_v8 = vpack.c.bf16 %v873_v55, %v873_v55  ;;  %vm5535_vm4 = vmpackc.low %vm5438_vm3, %vm1921_vm15 }
 0x131   : > { %v713_v14 = vpop.f32.mrf.mxu2  ;;  %v850_v39 = vadd.f32 %v4996_v15, %v733_v33  ;;  %vm2321_vm5 = vcmp.ne.s32.totalorder %v4203_v50, %v5147_v0 }
 0x132   : > { %v842_v52 = vadd.f32 %v4996_v15, %v713_v14  ;;  %v5501_v46 = vpop.f32.mrf.mxu0  ;;  %v5505_v33 = vsel %vm1002_vm7, %v5391_v35, %v1064_v22  ;;  %v1238_v22 = vadd.s32 136, %v5061_v57  ;;  %v970_v55 = vunpack.c.l.b16 %v905_v8  ;;  %vm2322_vm9 = vmpackc.low %vm2321_vm5, %vm5167_vm12 }
 0x133   : > { %7168 = vst [vmem:[#allocation39_spill] sm:$0xff] %v5501_v46  ;;  %v882_v21 = vmax.f32 %v850_v39, 0.0  ;;  %v1829_v8 = vsel %vm1795_vm2, 65537, %v7152_v42  ;;  %v5547_v14 = vrot.slane %v1062_v25, 1 }
 0x134   : > { %v874_v24 = vmax.f32 %v842_v52, 0.0  ;;  %2404 = vrot.lane.b32.xlu1 %v7152_v42, %s4713_s19  ;;  %v1380_v52 = vand.u32 15, %v1238_v22  ;;  %v1863_v23 = vunpack.c.l.b16 %v1829_v8 }
 0x135   : > { %v914_v41 = vpack.c.bf16 %v882_v21, %v882_v21  ;;  %4299 = vmatmul.msk.bf16.gmra.mxu0 %vm435_vm0, %v5509_v32 }
 0x136   : > { %v906_v54 = vpack.c.bf16 %v874_v24, %v874_v24  ;;  %4365 = vmatmul.msk.bf16.gmra.mxu2 %vm435_vm0, %v5420_v1  ;;  %v1229_v24 = vadd.s32 64, %v5061_v57  ;;  %vm5550_vm6 = vcmp.lt.s32.totalorder %v1380_v52, 15 }
 0x137   : > { %v979_v35 = vunpack.c.l.b16 %v914_v41  ;;  %vm2165_vm10 = vmpackc.low %vm5550_vm6, %vm5550_vm6 }
 0x138   : > { %v971_v2 = vunpack.c.l.b16 %v906_v54  ;;  %v736_v39 = vpop.f32.mrf.mxu3  ;;  %v1317_v52 = vand.u32 15, %v1229_v24 }
 0x139   : > { %v716_v44 = vpop.f32.mrf.mxu2  ;;  %v5527_v60 = vpack.c.b16 %v979_v35, %v978_v19 }
 0x13a   : > { %v5529_v21 = vpop.f32.mrf.mxu0  ;;  %v5531_v41 = vpack.c.b16 %v971_v2, %v970_v55  ;;  %v843_v61 = vadd.f32 %v4996_v15, %v716_v44  ;;  %v2030_v55 = vsel %vm5535_vm4, %v5116_v30, 0  ;;  %v7176_v2 = vshrl.u32 %v5373_v47, 16 }
 0x13b   : > { %7171 = vst [vmem:[#allocation40_spill] sm:$0xff] %v5529_v21  ;;  %v851_v21 = vadd.f32 %v4996_v15, %v736_v39  ;;  %v4158_v39 = vunpack.i.l.s16 %v1863_v23  ;;  %vm5586_vm11 = vcmp.gt.s32.totalorder %v1317_v52, 0 }
 0x13c   : > { %2430 = vrot.lane.b32.xlu1 %v5527_v60, %s4713_s19  ;;  %2422 = vrot.lane.b32.xlu2 %v5531_v41, %s4713_s19  ;;  %v7094_v19 = vshrl.u32 %v5531_v41, 16  ;;  %v1171_v25 = vor.u32 %v5465_v40, %v7176_v2  ;;  %v1070_v50 = vshll.u32 %v5531_v41, 16  ;;  %v2199_v2 = vsel %vm2165_vm10, 65537, %v7152_v42  ;;  %vm1797_vm15 = vmpackc.low %vm5586_vm11, %vm5586_vm11 }
 0x13d   : > { %v883_v46 = vmax.f32 %v851_v21, 0.0  ;;  %v2233_v52 = vunpack.c.l.b16 %v2199_v2  ;;  %vm1928_vm14 = vcmp.ne.s32.totalorder %v4158_v39, %v5144_v63 }
 0x13e   : > { %v5556_v54 = vrot.slane %v7094_v19, 7  ;;  %v2409_v35 = vpop.permute.xlu0 %2408  ;;  %v875_v19 = vmax.f32 %v843_v61, 0.0  ;;  %v1173_v47 = vsel %vm1151_vm8, %v1171_v25, %v5547_v14  ;;  %vm5622_vm4 = vmpackc.low %vm5438_vm3, %vm1928_vm14 }
 0x13f   : > { %v5566_v44 = vsel %vm435_vm0, %v2030_v55, %v2409_v35  ;;  %v1240_v35 = vadd.s32 152, %v5061_v57  ;;  %v5583_v55 = vsel %vm2322_vm9, %v1173_v47, 0  ;;  %v915_v21 = vpack.c.bf16 %v883_v46, %v883_v46  ;;  %v4548_v46 = vld [vmem:[%s7083_s4 + $0x18] sm:$0xff] }
 0x140   : > { %2691 = vmatmul.bf16.gmra.mxu3 %v5566_v44  ;;  %v738_v30 = vpop.f32.mrf.mxu3  ;;  %v1072_v8 = vor.u32 %v1070_v50, %v5556_v54  ;;  %v4205_v2 = vunpack.i.l.s16 %v2233_v52  ;;  %2935 = vmatpush.bf16.msrb.mxu1 %v4548_v46  ;;  %v2031_v46 = vsel %vm5622_vm4, %v5198_v34, 0 }
 0x141   : > { %v718_v40 = vpop.f32.mrf.mxu2  ;;  %v852_v38 = vadd.f32 %v4996_v15, %v738_v30  ;;  %v907_v30 = vpack.c.bf16 %v875_v19, %v875_v19  ;;  %v1394_v47 = vand.u32 15, %v1240_v35  ;;  %v1831_v35 = vsel %vm1797_vm15, 65537, %v7152_v42 }
 0x142   : > { %v844_v24 = vadd.f32 %v4996_v15, %v718_v40  ;;  %v5580_v61 = vpop.f32.mrf.mxu0  ;;  %v5592_v25 = vsel %vm1002_vm7, %v5469_v49, %v1072_v8  ;;  %v1865_v39 = vunpack.c.l.b16 %v1831_v35  ;;  %vm2328_vm6 = vcmp.ne.s32.totalorder %v4205_v2, %v5147_v0 }
 0x143   : > { %7177 = vst [vmem:[#allocation41_spill] sm:$0xff] %v5580_v61  ;;  %v884_v10 = vmax.f32 %v852_v38, 0.0  ;;  %v5594_v61 = vpop.f32.mrf.mxu1  ;;  %v972_v49 = vunpack.c.l.b16 %v907_v30  ;;  %vm5610_vm2 = vcmp.lt.s32.totalorder %v1394_v47, 15  ;;  %v980_v30 = vunpack.c.l.b16 %v915_v21  ;;  %vm2329_vm9 = vmpackc.low %vm2328_vm6, %vm5167_vm12 }
 0x144   : > { %v876_v40 = vmax.f32 %v844_v24, 0.0  ;;  %7180 = vst [vmem:[#allocation42_spill] sm:$0xff] %v5594_v61  ;;  %vm2167_vm5 = vmpackc.low %vm5610_vm2, %vm5610_vm2 }
 0x145   : > { %4300 = vmatmul.msk.bf16.gmra.mxu0 %vm435_vm0, %v5583_v55  ;;  %v916_v38 = vpack.c.bf16 %v884_v10, %v884_v10  ;;  %v1331_v10 = vand.u32 15, %v1231_v31 }
 0x146   : > { %v908_v23 = vpack.c.bf16 %v876_v40, %v876_v40  ;;  %4366 = vmatmul.msk.bf16.gmra.mxu2 %vm435_vm0, %v5509_v32 }
 0x147   : > { %vm5687_vm10 = vcmp.gt.s32.totalorder %v1331_v10, 0 }
 0x148   : > { %v973_v19 = vunpack.c.l.b16 %v908_v23  ;;  %v741_v8 = vpop.f32.mrf.mxu3  ;;  %v981_v23 = vunpack.c.l.b16 %v916_v38  ;;  %vm1799_vm11 = vmpackc.low %vm5687_vm10, %vm5687_vm10 }
 0x149   : > { %v721_v24 = vpop.f32.mrf.mxu2  ;;  %v853_v21 = vadd.f32 %v4996_v15, %v741_v8  ;;  %v7188_v8 = vshrl.u32 %v5448_v5, 16  ;;  %v4574_v5 = vld [vmem:[%s7083_s4 + $0xe8] sm:$0xff] }
 0x14a   : > { %v5605_v40 = vpop.f32.mrf.mxu0  ;;  %v5607_v51 = vpack.c.b16 %v973_v19, %v972_v49  ;;  %v845_v52 = vadd.f32 %v4996_v15, %v721_v24  ;;  %v5632_v19 = vrot.slane %v1070_v50, 1  ;;  %v7187_v50 = vshrl.u32 %v5527_v60, 16  ;;  %3210 = vmatpush.bf16.msra.mxu3 %v4574_v5 }
 0x14b   : > { %7181 = vst [vmem:[#allocation43_spill] sm:$0xff] %v5605_v40  ;;  %v5630_v49 = vpop.f32.mrf.mxu1  ;;  %v5659_v22 = vpack.c.b16 %v981_v23, %v980_v30  ;;  %v4160_v30 = vunpack.i.l.s16 %v1865_v39  ;;  %v885_v23 = vmax.f32 %v853_v21, 0.0  ;;  %v7192_v39 = vshll.u32 %v5527_v60, 16 }
 0x14c   : > { %2424 = vrot.lane.b32.xlu0 %v5607_v51, %s4713_s19  ;;  %v7095_v47 = vshrl.u32 %v5607_v51, 16  ;;  %7186 = vst [vmem:[#allocation44_spill] sm:$0xff] %v5630_v49  ;;  %v5648_v35 = vrot.slane %v7187_v50, 7  ;;  %v877_v4 = vmax.f32 %v845_v52, 0.0  ;;  %v1078_v12 = vshll.u32 %v5607_v51, 16 }
 0x14d   : > { %vm1935_vm14 = vcmp.ne.s32.totalorder %v4160_v30, %v5144_v63 }
 0x14e   : > { %v5640_v38 = vrot.slane %v7095_v47, 7  ;;  %v2411_v24 = vpop.permute.xlu1 %2410  ;;  %v1174_v47 = vor.u32 %v5547_v14, %v7188_v8  ;;  %v5694_v21 = vor.u32 %v7192_v39, %v5648_v35  ;;  %v909_v6 = vpack.c.bf16 %v877_v4, %v877_v4  ;;  %vm5729_vm15 = vmpackc.low %vm5438_vm3, %vm1935_vm14 }
 0x14f   : > { %v5652_v31 = vsel %vm435_vm0, %v2031_v46, %v2411_v24  ;;  %v2201_v24 = vsel %vm2167_vm5, 65537, %v7152_v42  ;;  %v7194_v4 = vshrl.u32 %v5659_v22, 16 }
 0x150   : > { %2696 = vmatmul.bf16.gmra.mxu3 %v5652_v31  ;;  %v743_v34 = vpop.f32.mrf.mxu3  ;;  %v1176_v46 = vsel %vm1151_vm8, %v1174_v47, %v5632_v19  ;;  %v1080_v47 = vor.u32 %v1078_v12, %v5640_v38  ;;  %v2235_v40 = vunpack.c.l.b16 %v2201_v24  ;;  %v1242_v24 = vadd.s32 168, %v5061_v57 }
 0x151   : > { %v723_v14 = vpop.f32.mrf.mxu2  ;;  %v854_v52 = vadd.f32 %v4996_v15, %v743_v34  ;;  %v5696_v62 = vsel %vm2329_vm9, %v1176_v46, 0  ;;  %v5712_v46 = vrot.slane %v7194_v4, 7  ;;  %v1833_v4 = vsel %vm1799_vm11, 65537, %v7152_v42 }
 0x152   : > { %v846_v50 = vadd.f32 %v5680_v43, %v723_v14  ;;  %v5683_v8 = vpop.f32.mrf.mxu0  ;;  %v5702_v5 = vsel %vm1002_vm7, %v5556_v54, %v1080_v47  ;;  %v4579_v54 = vld [vmem:[%s7083_s4 + $0x110] sm:$0xff]  ;;  %v1408_v28 = vand.u32 15, %v1242_v24  ;;  %v5740_v24 = vrot.slane %v1078_v12, 1 }
 0x153   : > { %7189 = vst [vmem:[#allocation45_spill] sm:$0xff] %v5683_v8  ;;  %v886_v34 = vmax.f32 %v854_v52, 0.0  ;;  %v5698_v8 = vpop.f32.mrf.mxu1  ;;  %v917_v52 = vpack.c.bf16 %v885_v23, %v885_v23  ;;  %v974_v23 = vunpack.c.l.b16 %v909_v6  ;;  %3302 = vmatpush.bf16.msra.mxu0 %v4579_v54 }
 0x154   : > { %v878_v14 = vmax.f32 %v846_v50, 0.0  ;;  %7193 = vst [vmem:[#allocation46_spill] sm:$0xff] %v5698_v8  ;;  %vm5748_vm4 = vcmp.lt.s32.totalorder %v1408_v28, 15 }
 0x155   : > { %4301 = vmatmul.msk.bf16.gmra.mxu0 %vm435_vm0, %v5696_v62  ;;  %v918_v15 = vpack.c.bf16 %v886_v34, %v886_v34  ;;  %v4207_v34 = vunpack.i.l.s16 %v2235_v40  ;;  %v982_v2 = vunpack.c.l.b16 %v917_v52  ;;  %v7198_v40 = vshll.u32 %v5659_v22, 16  ;;  %vm2169_vm6 = vmpackc.low %vm5748_vm4, %vm5748_vm4 }
 0x156   : > { %v910_v39 = vpack.c.bf16 %v878_v14, %v878_v14  ;;  %4367 = vmatmul.msk.bf16.gmra.mxu2 %vm435_vm0, %v5583_v55 }
 0x157   : > { %v983_v58 = vunpack.c.l.b16 %v918_v15  ;;  %v1112_v30 = vor.u32 %v7198_v40, %v5712_v46  ;;  %vm2335_vm2 = vcmp.ne.s32.totalorder %v4207_v34, %v5147_v0  ;;  %v7202_v34 = vshrl.u32 %v5531_v41, 16 }
 0x158   : > { %v975_v50 = vunpack.c.l.b16 %v910_v39  ;;  %v746_v47 = vpop.f32.mrf.mxu3  ;;  %vm5767_vm5 = vmpackc.low %vm2335_vm2, %vm5167_vm12 }
 0x159   : > { %v726_v14 = vpop.f32.mrf.mxu2  ;;  %v855_v10 = vadd.f32 %v5680_v43, %v746_v47 }
 0x15a   : > { %v5723_v29 = vpop.f32.mrf.mxu0  ;;  %v5725_v53 = vpack.c.b16 %v975_v50, %v974_v23  ;;  %v847_v39 = vadd.f32 %v5680_v43, %v726_v14  ;;  %v2032_v23 = vsel %vm5729_vm15, %v5248_v36, 0  ;;  %v1867_v50 = vunpack.c.l.b16 %v1833_v4 }
 0x15b   : > { %7195 = vst [vmem:[#allocation47_spill] sm:$0xff] %v5723_v29  ;;  %v5743_v52 = vpop.f32.mrf.mxu1  ;;  %v887_v54 = vmax.f32 %v855_v10, 0.0  ;;  %v1177_v10 = vor.u32 %v5632_v19, %v7202_v34  ;;  %v5760_v29 = vpack.c.b16 %v983_v58, %v982_v2  ;;  %v1233_v4 = vadd.s32 96, %v5061_v57 }
 0x15c   : > { %2426 = vrot.lane.b32.xlu2 %v5725_v53, %s4713_s19  ;;  %v7096_v15 = vshrl.u32 %v5725_v53, 16  ;;  %7199 = vst [vmem:[#allocation48_spill] sm:$0xff] %v5743_v52  ;;  %v1086_v12 = vshll.u32 %v5725_v53, 16  ;;  %v879_v6 = vmax.f32 %v847_v39, 0.0  ;;  %v4162_v56 = vunpack.i.l.s16 %v1867_v50 }
 0x15d   : > { %v1179_v41 = vsel %vm1151_vm8, %v1177_v10, %v5740_v24  ;;  %v919_v2 = vpack.c.bf16 %v887_v54, %v887_v54  ;;  %v4547_v10 = vld [vmem:[%s7083_s4 + $0x10] sm:$0xff]  ;;  %v5793_v58 = vsel %vm1002_vm7, %v5648_v35, %v1112_v30  ;;  %v1345_v50 = vand.u32 15, %v1233_v4 }
 0x15e   : > { %v5754_v14 = vrot.slane %v7096_v15, 7  ;;  %v2413_v40 = vpop.permute.xlu1 %2412  ;;  %v1118_v35 = vshll.u32 %v5760_v29, 16  ;;  %2936 = vmatpush.bf16.msrb.mxu1 %v4547_v10  ;;  %v1244_v4 = vadd.s32 184, %v5061_v57  ;;  %vm1942_vm10 = vcmp.ne.s32.totalorder %v4162_v56, %v5144_v63  ;;  %v2415_v56 = vpop.permute.xlu2 %2414 }
 0x15f   : > { %v5763_v36 = vsel %vm435_vm0, %v2032_v23, %v2413_v40  ;;  %v984_v28 = vunpack.c.l.b16 %v919_v2  ;;  %vm5814_vm9 = vcmp.gt.s32.totalorder %v1345_v50, 0  ;;  %vm1944_vm14 = vmpackc.low %vm5438_vm3, %vm1942_vm10 }
 0x160   : > { %2701 = vmatmul.bf16.gmra.mxu3 %v5763_v36  ;;  %v748_v15 = vpop.f32.mrf.mxu3  ;;  %v1088_v19 = vor.u32 %v1086_v12, %v5754_v14  ;;  %vm1801_vm11 = vmpackc.low %vm5814_vm9, %vm5814_vm9 }
 0x161   : > { %v728_v23 = vpop.f32.mrf.mxu2  ;;  %v856_v40 = vadd.f32 %v5680_v43, %v748_v15  ;;  %v5797_v15 = vsel %vm5767_vm5, %v1179_v41, 0 }
 0x162   : > { %v848_v39 = vadd.f32 %v5680_v43, %v728_v23  ;;  %v5782_v34 = vpop.f32.mrf.mxu0  ;;  %v5789_v47 = vsel %vm1002_vm7, %v5640_v38, %v1088_v19  ;;  %v2203_v43 = vsel %vm2169_vm6, 65537, %v7152_v42  ;;  %v911_v23 = vpack.c.bf16 %v879_v6, %v879_v6 }
 0x163   : > { %v888_v54 = vmax.f32 %v856_v40, 0.0  ;;  %v7205_v38 = vshrl.u32 %v5760_v29, 16  ;;  %v5807_v30 = vpop.f32.mrf.mxu1  ;;  %v2237_v40 = vunpack.c.l.b16 %v2203_v43 }
 0x164   : > { %v880_v52 = vmax.f32 %v848_v39, 0.0  ;;  %2432 = vrot.lane.b32.xlu2 %v5659_v22, %s4713_s19  ;;  %7206 = vst [vmem:[#allocation49_spill] sm:$0xff] %v5807_v30  ;;  %v976_v37 = vunpack.c.l.b16 %v911_v23  ;;  %v1181_v23 = vrot.slane %v1086_v12, 1  ;;  %v7212_v12 = vshrl.u32 %v5607_v51, 16 }
 0x165   : > { %v5804_v19 = vrot.slane %v7205_v38, 7  ;;  %v920_v41 = vpack.c.bf16 %v888_v54, %v888_v54  ;;  %4302 = vmatmul.msk.bf16.gmra.mxu0 %vm435_vm0, %v5797_v15  ;;  %v1422_v54 = vand.u32 15, %v1244_v4  ;;  %v4209_v26 = vunpack.i.l.s16 %v2237_v40 }
 0x166   : > { %v912_v6 = vpack.c.bf16 %v880_v52, %v880_v52  ;;  %4368 = vmatmul.msk.bf16.gmra.mxu2 %vm435_vm0, %v5696_v62  ;;  %v2033_v4 = vsel %vm1944_vm14, %v5297_v7, 0  ;;  %v1180_v40 = vor.u32 %v5740_v24, %v7212_v12 }
 0x167   : > { %v985_v39 = vunpack.c.l.b16 %v920_v41  ;;  %v1120_v2 = vor.u32 %v1118_v35, %v5804_v19  ;;  %vm5843_vm15 = vcmp.lt.s32.totalorder %v1422_v54, 15  ;;  %vm2342_vm2 = vcmp.ne.s32.totalorder %v4209_v26, %v5147_v0  ;;  %v4573_v26 = vld [vmem:[%s7083_s4 + $0xe0] sm:$0xff] }
 0x168   : > { %v977_v30 = vunpack.c.l.b16 %v912_v6  ;;  %v5853_v6 = vsel %vm435_vm0, %v2033_v4, %v2415_v56  ;;  %vm2171_vm4 = vmpackc.low %vm5843_vm15, %vm5843_vm15  ;;  %3211 = vmatpush.bf16.msra.mxu3 %v4573_v26 }
 0x169   : > { %v5820_v10 = vpack.c.b16 %v985_v39, %v984_v28  ;;  %v5831_v43 = vsel %vm1002_vm7, %v5712_v46, %v1120_v2  ;;  %v1235_v39 = vadd.s32 112, %v5061_v57  ;;  %v1182_v2 = vsel %vm1151_vm8, %v1180_v40, %v1181_v23  ;;  %vm2343_vm5 = vmpackc.low %vm2342_vm2, %vm5167_vm12 }
 0x16a   : > { %v5822_v8 = vpop.f32.mrf.mxu0  ;;  %v5824_v52 = vpack.c.b16 %v977_v30, %v976_v37  ;;  %v1835_v30 = vsel %vm1801_vm11, 65537, %v7152_v42  ;;  %v2205_v56 = vsel %vm2171_vm4, 65537, %v7152_v42  ;;  %v5883_v4 = vsel %vm2343_vm5, %v1182_v2, 0 }
 0x16b   : > { %2436 = vrot.lane.b32.xlu1 %v5820_v10, %s4713_s19  ;;  %v5840_v50 = vpop.f32.mrf.mxu1  ;;  %v1869_v38 = vunpack.c.l.b16 %v1835_v30  ;;  %v1359_v30 = vand.u32 15, %v1235_v39  ;;  %v1126_v46 = vshll.u32 %v5820_v10, 16  ;;  %v2239_v40 = vunpack.c.l.b16 %v2205_v56 }
 0x16c   : > { %2428 = vrot.lane.b32.xlu0 %v5824_v52, %s4713_s19  ;;  %v7097_v37 = vshrl.u32 %v5824_v52, 16  ;;  %7209 = vst [vmem:[#allocation50_spill] sm:$0xff] %v5840_v50  ;;  %v1094_v41 = vshll.u32 %v5824_v52, 16  ;;  %v5893_v39 = vrot.slane %v1118_v35, 1 }
 0x16d   : > { %v4164_v12 = vunpack.i.l.s16 %v1869_v38  ;;  %vm5899_vm6 = vcmp.gt.s32.totalorder %v1359_v30, 0  ;;  %v4211_v50 = vunpack.i.l.s16 %v2239_v40  ;;  %v4546_v30 = vld [vmem:[%s7083_s4 + $0x8] sm:$0xff] }
 0x16e   : > { %v1093_v28 = vrot.slane %v7097_v37, 7  ;;  %v5907_v37 = vrot.slane %v1126_v46, 1  ;;  %vm1803_vm10 = vmpackc.low %vm5899_vm6, %vm5899_vm6  ;;  %2937 = vmatpush.bf16.msrb.mxu1 %v4546_v30  ;;  %v1184_v40 = vrot.slane %v1094_v41, 1 }
 0x16f   : > { %vm1949_vm9 = vcmp.ne.s32.totalorder %v4164_v12, %v5144_v63  ;;  %v1837_v38 = vsel %vm1803_vm10, 65537, %v7152_v42  ;;  %vm2349_vm15 = vcmp.ne.s32.totalorder %v4211_v50, %v5147_v0  ;;  %v4545_v50 = vld [vmem:[%s7083_s4] sm:$0xff] }
 0x170   : > { %2706 = vmatmul.bf16.gmra.mxu3 %v5853_v6  ;;  %v1096_v7 = vor.u32 %v1094_v41, %v1093_v28  ;;  %v5871_v51 = vsel %vm1002_vm7, %v1093_v28, %v5694_v21  ;;  %v7098_v28 = vshrl.u32 %v5820_v10, 16  ;;  %vm1951_vm11 = vmpackc.low %vm5438_vm3, %vm1949_vm9 }
 0x171   : > { %vm2350_vm2 = vmpackc.low %vm2349_vm15, %vm5167_vm12 }
 0x172   : > { %v5873_v24 = vpop.f32.mrf.mxu0  ;;  %v5877_v54 = vsel %vm1002_vm7, %v5754_v14, %v1096_v7  ;;  %v1246_v14 = vadd.s32 200, %v5061_v57  ;;  %v5897_v26 = vrot.slane %v7098_v28, 7  ;;  %v7216_v7 = vshrl.u32 %v5760_v29, 16  ;;  %2938 = vmatpush.bf16.msrb.mxu1 %v4545_v50 }
 0x173   : > { %v5885_v21 = vpop.f32.mrf.mxu1  ;;  %v1237_v28 = vadd.s32 128, %v5061_v57 }
 0x174   : > { %2434 = vrot.lane.b32.xlu0 %v5760_v29, %s4713_s19  ;;  %7213 = vst [vmem:[#allocation51_spill] sm:$0xff] %v5885_v21  ;;  %v1195_v2 = vor.u32 %v5893_v39, %v7216_v7  ;;  %v1128_v56 = vor.u32 %v1126_v46, %v5897_v26  ;;  %v1436_v35 = vand.u32 15, %v1246_v14  ;;  %v2417_v46 = vpop.permute.xlu2 %2416  ;;  %v2034_v7 = vsel %vm1951_vm11, %v5352_v9, 0 }
 0x175   : > { %4303 = vmatmul.msk.bf16.gmra.mxu0 %vm435_vm0, %v5883_v4 }
 0x176   : > { %4369 = vmatmul.msk.bf16.gmra.mxu2 %vm435_vm0, %v5797_v15  ;;  %v5920_v29 = vsel %vm1151_vm8, %v1195_v2, %v5907_v37  ;;  %v5924_v12 = vsel %vm1002_vm7, %v5804_v19, %v1128_v56  ;;  %vm2071_vm14 = vcmp.lt.s32.totalorder %v1436_v35, 15  ;;  %v5934_v2 = vsel %vm435_vm0, %v2034_v7, %v2417_v46 }
 0x177   : > { %v7218_v19 = vshrl.u32 %v5725_v53, 16  ;;  %vm2173_vm7 = vmpackc.low %vm2071_vm14, %vm2071_vm14  ;;  %v1248_v35 = vadd.s32 216, %v5061_v57  ;;  %v1255_v7 = vadd.s32 272, %v5061_v57 }
 0x178   : > { %v2207_v53 = vsel %vm2173_vm7, 65537, %v7152_v42 }
 0x179   : > { %v1183_v56 = vor.u32 %v1181_v23, %v7218_v19  ;;  %v1373_v23 = vand.u32 15, %v1237_v28  ;;  %v2241_v19 = vunpack.c.l.b16 %v2207_v53  ;;  %v1499_v28 = vand.u32 15, %v1255_v7 }
 0x17a   : > { %v5910_v21 = vpop.f32.mrf.mxu0  ;;  %v7223_v53 = vshll.u32 %v5527_v60, 16 }
 0x17b   : > { %v5928_v14 = vpop.f32.mrf.mxu1  ;;  %v1185_v41 = vsel %vm1151_vm8, %v1183_v56, %v1184_v40  ;;  %vm1703_vm4 = vcmp.gt.s32.totalorder %v1373_v23, 0  ;;  %v1450_v56 = vand.u32 15, %v1248_v35  ;;  %vm5973_vm11 = vcmp.gt.s32.totalorder %v1499_v28, 0 }
 0x17c   : > { %7217 = vst [vmem:[#allocation52_spill] sm:$0xff] %v5928_v14  ;;  %v1871_v14 = vunpack.c.l.b16 %v1837_v38  ;;  %v5950_v30 = vsel %vm2350_vm2, %v1185_v41, 0  ;;  %vm1805_vm6 = vmpackc.low %vm1703_vm4, %vm1703_vm4  ;;  %v1187_v23 = vrot.slane %v7223_v53, 1 }
 0x17d   : > { %vm5964_vm10 = vcmp.lt.s32.totalorder %v1450_v56, 15  ;;  %v1839_v35 = vsel %vm1805_vm6, 65537, %v7152_v42  ;;  %v5988_v56 = vpop.f32.mrf.mxu2  ;;  %vm1823_vm7 = vmpackc.low %vm5973_vm11, %vm5973_vm11 }
 0x17e   : > { %v4166_v46 = vunpack.i.l.s16 %v1871_v14  ;;  %v4213_v14 = vunpack.i.l.s16 %v2241_v19  ;;  %vm2175_vm15 = vmpackc.low %vm5964_vm10, %vm5964_vm10  ;;  %7227 = vst [vmem:[#allocation55_spill] sm:$0xff] %v5988_v56  ;;  %v1873_v28 = vunpack.c.l.b16 %v1839_v35  ;;  %v1857_v35 = vsel %vm1823_vm7, 65537, %v7152_v42 }
 0x17f   : > { %v2209_v50 = vsel %vm2175_vm15, 65537, %v7152_v42 }
 0x180   : > { %2711 = vmatmul.bf16.gmra.mxu3 %v5934_v2  ;;  %vm1956_vm5 = vcmp.ne.s32.totalorder %v4166_v46, %v5144_v63  ;;  %vm2356_vm14 = vcmp.ne.s32.totalorder %v4213_v14, %v5147_v0  ;;  %v2243_v17 = vunpack.c.l.b16 %v2209_v50  ;;  %v4578_v46 = vld [vmem:[%s7083_s4 + $0x108] sm:$0xff] }
 0x181   : > { %vm1958_vm9 = vmpackc.low %vm5438_vm3, %vm1956_vm5  ;;  %3303 = vmatpush.bf16.msra.mxu0 %v4578_v46 }
 0x182   : > { %v5943_v9 = vpop.f32.mrf.mxu0  ;;  %v2035_v19 = vsel %vm1958_vm9, %v5416_v3, 0  ;;  %v4572_v3 = vld [vmem:[%s7083_s4 + $0xd8] sm:$0xff]  ;;  %vm2357_vm2 = vmpackc.low %vm2356_vm14, %vm5167_vm12 }
 0x183   : > { %v5952_v38 = vpop.f32.mrf.mxu1  ;;  %3212 = vmatpush.bf16.msra.mxu3 %v4572_v3  ;;  %v1891_v3 = vunpack.c.l.b16 %v1857_v35 }
 0x184   : > { %7219 = vst [vmem:[#allocation53_spill] sm:$0xff] %v5952_v38  ;;  %v7222_v38 = vshrl.u32 %v5824_v52, 16 }
 0x185   : > { %4304 = vmatmul.msk.bf16.gmra.mxu0 %vm435_vm0, %v5950_v30  ;;  %v6017_v50 = vpop.f32.mrf.mxu2  ;;  %v4186_v13 = vunpack.i.l.s16 %v1891_v3 }
 0x186   : > { %4370 = vmatmul.msk.bf16.gmra.mxu2 %vm435_vm0, %v5883_v4  ;;  %v1186_v49 = vor.u32 %v1184_v40, %v7222_v38  ;;  %v1239_v38 = vadd.s32 144, %v5061_v57  ;;  %7230 = vst [vmem:[#allocation58_spill] sm:$0xff] %v6017_v50 }
 0x187   : > { %vm2026_vm14 = vcmp.ne.s32.totalorder %v4186_v13, %v5144_v63  ;;  %v1150_v13 = vsel %vm5431_vm1, %v5897_v26, 0 }
 0x188   : > { %v1188_v14 = vsel %vm1151_vm8, %v1186_v49, %v1187_v23  ;;  %v1250_v49 = vadd.s32 232, %v5061_v57 }
 0x18a   : > { %v5960_v41 = vpop.f32.mrf.mxu0 }
 0x18b   : > { %v5982_v52 = vpop.f32.mrf.mxu1 }
 0x18c   : > { %7226 = vst [vmem:[#allocation54_spill] sm:$0xff] %v5982_v52  ;;  %v4168_v52 = vunpack.i.l.s16 %v1873_v28  ;;  %v1464_v28 = vand.u32 15, %v1250_v49 }
 0x18e   : > { %v2419_v7 = vpop.permute.xlu0 %2418  ;;  %vm1963_vm5 = vcmp.ne.s32.totalorder %v4168_v52, %v5144_v63  ;;  %vm6029_vm11 = vcmp.lt.s32.totalorder %v1464_v28, 15 }
 0x18f   : > { %v5985_v40 = vsel %vm435_vm0, %v2035_v19, %v2419_v7  ;;  %v1387_v7 = vand.u32 15, %v1239_v38  ;;  %v6004_v19 = vsel %vm2357_vm2, %v1188_v14, 0  ;;  %v4215_v38 = vunpack.i.l.s16 %v2243_v17  ;;  %vm1965_vm9 = vmpackc.low %vm5438_vm3, %vm1963_vm5 }
 0x190   : > { %2716 = vmatmul.bf16.gmra.mxu3 %v5985_v40  ;;  %7228 = vst [vmem:[#allocation56_spill] sm:$0xff] %v6004_v19  ;;  %v7232_v17 = vshll.u32 %v5659_v22, 16  ;;  %v2036_v3 = vsel %vm1965_vm9, %v5505_v33, 0  ;;  %vm2177_vm7 = vmpackc.low %vm6029_vm11, %vm6029_vm11 }
 0x191   : > { %vm1705_vm4 = vcmp.gt.s32.totalorder %v1387_v7, 0  ;;  %vm2363_vm10 = vcmp.ne.s32.totalorder %v4215_v38, %v5147_v0  ;;  %v7231_v7 = vshrl.u32 %v5527_v60, 16  ;;  %v1241_v60 = vadd.s32 160, %v5061_v57  ;;  %vm2028_vm2 = vmpackc.low %vm5438_vm3, %vm2026_vm14 }
 0x192   : > { %v6001_v53 = vpop.f32.mrf.mxu0  ;;  %vm1807_vm6 = vmpackc.low %vm1705_vm4, %vm1705_vm4  ;;  %v1190_v52 = vrot.slane %v7232_v17, 1  ;;  %v2211_v28 = vsel %vm2177_vm7, 65537, %v7152_v42  ;;  %v6056_v17 = vpop.f32.mrf.mxu2  ;;  %v2045_v49 = vsel %vm2028_vm2, %v1150_v13, 0 }
 0x193   : > { %v6015_v14 = vpop.f32.mrf.mxu1  ;;  %v1189_v35 = vor.u32 %v1187_v23, %v7231_v7  ;;  %v1841_v46 = vsel %vm1807_vm6, 65537, %v7152_v42  ;;  %vm2364_vm15 = vmpackc.low %vm2363_vm10, %vm5167_vm12  ;;  %v1401_v7 = vand.u32 15, %v1241_v60  ;;  %7236 = vst [vmem:[#allocation60_spill] sm:$0xff] %v6056_v17  ;;  %v4587_v60 = vld [vmem:[%s7085_s6 + $0x34] sm:$0xf] }
 0x194   : > { %7229 = vst [vmem:[#allocation57_spill] sm:$0xff] %v6015_v14  ;;  %v1875_v23 = vunpack.c.l.b16 %v1841_v46  ;;  %vm4358_vm4 = vmneg %vm435_vm0 }
 0x195   : > { %4305 = vmatmul.msk.bf16.gmra.mxu0 %vm435_vm0, %v6004_v19  ;;  %v1191_v38 = vsel %vm1151_vm8, %v1189_v35, %v1190_v52  ;;  %vm6072_vm1 = vcmp.gt.s32.totalorder %v1401_v7, 0 }
 0x196   : > { %4371 = vmatmul.msk.bf16.gmra.mxu2 %vm435_vm0, %v5950_v30  ;;  %v6058_v46 = vsel %vm2364_vm15, %v1191_v38, 0  ;;  %v4170_v35 = vunpack.i.l.s16 %v1875_v23  ;;  %v4491_v38 = vld [vmem:[%s7085_s6 + $0x38] sm:$0xf0]  ;;  %vm1809_vm6 = vmpackc.low %vm6072_vm1, %vm6072_vm1  ;;  %v2423_v7 = vpop.permute.xlu2 %2422 }
 0x197   : > { %v4494_v13 = vor.u32 %v4587_v60, %v4491_v38  ;;  %v1254_v60 = vadd.s32 264, %v5061_v57 }
 0x198   : > { %vm1970_vm5 = vcmp.ne.s32.totalorder %v4170_v35, %v5144_v63  ;;  %v4588_v35 = vld [vmem:[%s7085_s6 + $0x34] sm:$0xf0] }
 0x199   : > { %3696 = vmatpush.bf16.msra.mxu2 %v4494_v13  ;;  %vm1972_vm9 = vmpackc.low %vm5438_vm3, %vm1970_vm5 }
 0x19a   : > { %v6019_v61 = vpop.f32.mrf.mxu0  ;;  %v6102_v23 = vpop.f32.mrf.mxu2  ;;  %v2037_v13 = vsel %vm1972_vm9, %v5592_v25, 0 }
 0x19b   : > { %7245 = vst [vmem:[#allocation64_spill] sm:$0xff] %v6102_v23 }
 0x19e   : > { %v2421_v14 = vpop.permute.xlu1 %2420 }
 0x19f   : > { %v6036_v50 = vsel %vm435_vm0, %v2036_v3, %v2421_v14  ;;  %v6053_v14 = vpop.f32.mrf.mxu1  ;;  %v2245_v3 = vunpack.c.l.b16 %v2211_v28  ;;  %v1478_v28 = vand.u32 15, %v1252_v20  ;;  %v7242_v20 = vshrl.u32 %v5659_v22, 16 }
 0x1a0   : > { %2721 = vmatmul.bf16.gmra.mxu3 %v6036_v50  ;;  %7235 = vst [vmem:[#allocation59_spill] sm:$0xff] %v6053_v14  ;;  %v1243_v22 = vadd.s32 176, %v5061_v57 }
 0x1a1   : > { %v4217_v56 = vunpack.i.l.s16 %v2245_v3  ;;  %v1843_v3 = vsel %vm1809_vm6, 65537, %v7152_v42  ;;  %vm6098_vm10 = vcmp.lt.s32.totalorder %v1478_v28, 15  ;;  %v4571_v28 = vld [vmem:[%s7083_s4 + $0xd0] sm:$0xff] }
 0x1a2   : > { %v6051_v33 = vpop.f32.mrf.mxu0  ;;  %vm2179_vm14 = vmpackc.low %vm6098_vm10, %vm6098_vm10  ;;  %3213 = vmatpush.bf16.msra.mxu3 %v4571_v28 }
 0x1a3   : > { %vm2370_vm11 = vcmp.ne.s32.totalorder %v4217_v56, %v5147_v0 }
 0x1a4   : > { %vm2371_vm15 = vmpackc.low %vm2370_vm11, %vm5167_vm12 }
 0x1a5   : > { %4306 = vmatmul.msk.bf16.gmra.mxu0 %vm435_vm0, %v6058_v46 }
 0x1a6   : > { %v2405_v26 = vpop.permute.xlu1 %2404  ;;  %4372 = vmatmul.msk.bf16.gmra.mxu2 %vm435_vm0, %v6004_v19 }
 0x1a7   : > { %4359 = vmatmul.msk.bf16.vlgmr.msrb.gmra.mxu1 %vm4358_vm4, %v2405_v26  ;;  %v6077_v14 = vsel %vm435_vm0, %v2045_v49, %v2405_v26  ;;  %v6087_v19 = vpop.f32.mrf.mxu1  ;;  %v4489_v49 = vld [vmem:[%s7085_s6 + $0x30] sm:$0xf]  ;;  %v1192_v26 = vor.u32 %v1190_v52, %v7242_v20  ;;  %v1877_v52 = vunpack.c.l.b16 %v1843_v3 }
 0x1a8   : > { %7239 = vst [vmem:[#allocation61_spill] sm:$0xff] %v6077_v14  ;;  %v4490_v38 = vor.u32 %v4588_v35, %v4489_v49  ;;  %v2213_v49 = vsel %vm2179_vm14, 65537, %v7152_v42  ;;  %v1415_v35 = vand.u32 15, %v1243_v22 }
 0x1a9   : > { %7241 = vst [vmem:[#allocation63_spill] sm:$0xff] %v6087_v19  ;;  %v6107_v19 = vsel %vm435_vm0, %v2037_v13, %v2423_v7  ;;  %v1194_v25 = vsel %vm1151_vm8, %v1192_v26, %v5893_v39  ;;  %v4172_v3 = vunpack.i.l.s16 %v1877_v52  ;;  %v2247_v39 = vunpack.c.l.b16 %v2213_v49 }
 0x1aa   : > { %v6080_v17 = vpop.f32.mrf.mxu0  ;;  %3607 = vmatpush.bf16.msra.mxu1 %v4490_v38  ;;  %v6126_v20 = vsel %vm2371_vm15, %v1194_v25, 0  ;;  %vm1709_vm8 = vcmp.gt.s32.totalorder %v1415_v35, 0  ;;  %v6136_v38 = vpop.f32.mrf.mxu2  ;;  %v1492_v13 = vand.u32 15, %v1254_v60 }
 0x1ab   : > { %7240 = vst [vmem:[#allocation62_spill] sm:$0xff] %v6080_v17  ;;  %vm1977_vm7 = vcmp.ne.s32.totalorder %v4172_v3, %v5144_v63  ;;  %v4219_v52 = vunpack.i.l.s16 %v2247_v39  ;;  %vm1811_vm2 = vmpackc.low %vm1709_vm8, %vm1709_vm8  ;;  %v1245_v3 = vadd.s32 192, %v5061_v57 }
 0x1ac   : > { %7247 = vst [vmem:[#allocation66_spill] sm:$0xff] %v6136_v38  ;;  %vm1979_vm4 = vmpackc.low %vm5438_vm3, %vm1977_vm7  ;;  %v1845_v25 = vsel %vm1811_vm2, 65537, %v7152_v42  ;;  %vm2079_vm1 = vcmp.lt.s32.totalorder %v1492_v13, 15  ;;  %v4569_v38 = vld [vmem:[%s7083_s4 + $0xc0] sm:$0xff] }
 0x1ad   : > { %vm2377_vm5 = vcmp.ne.s32.totalorder %v4219_v52, %v5147_v0  ;;  %v1879_v60 = vunpack.c.l.b16 %v1845_v25  ;;  %vm2181_vm6 = vmpackc.low %vm2079_vm1, %vm2079_vm1 }
 0x1ae   : > { %vm2378_vm9 = vmpackc.low %vm2377_vm5, %vm5167_vm12  ;;  %v2215_v52 = vsel %vm2181_vm6, 65537, %v7152_v42 }
 0x1af   : > { %v6133_v26 = vpop.f32.mrf.mxu1  ;;  %v6168_v25 = vsel %vm2378_vm9, %v5920_v29, 0  ;;  %v2249_v14 = vunpack.c.l.b16 %v2215_v52 }
 0x1b0   : > { %2726 = vmatmul.bf16.gmra.mxu3 %v6107_v19  ;;  %7246 = vst [vmem:[#allocation65_spill] sm:$0xff] %v6133_v26 }
 0x1b2   : > { %v6121_v56 = vpop.f32.mrf.mxu0  ;;  %v6157_v13 = vpop.f32.mrf.mxu2 }
 0x1b3   : > { %v6123_v7 = vpop.f32.mrf.mxu3  ;;  %7250 = vst [vmem:[#allocation69_spill] sm:$0xff] %v6157_v13 }
 0x1b5   : > { %4307 = vmatmul.msk.bf16.gmra.mxu0 %vm435_vm0, %v6126_v20 }
 0x1b6   : > { %4373 = vmatmul.msk.bf16.gmra.mxu2 %vm435_vm0, %v6058_v46  ;;  %v2427_v52 = vpop.permute.xlu2 %2426 }
 0x1b7   : > { %2944 = vmatmul.bf16.gmra.mxu1 %v5477_v48  ;;  %v2038_v48 = vsel %vm1979_vm4, %v5702_v5, 0  ;;  %v6153_v39 = vpop.f32.mrf.mxu1 }
 0x1b8   : > { %7249 = vst [vmem:[#allocation68_spill] sm:$0xff] %v6153_v39  ;;  %v4174_v39 = vunpack.i.l.s16 %v1879_v60 }
 0x1ba   : > { %v6139_v22 = vpop.f32.mrf.mxu0  ;;  %vm1984_vm11 = vcmp.ne.s32.totalorder %v4174_v39, %v5144_v63  ;;  %v6184_v60 = vpop.f32.mrf.mxu2 }
 0x1bb   : > { %7248 = vst [vmem:[#allocation67_spill] sm:$0xff] %v6139_v22  ;;  %v6141_v28 = vpop.f32.mrf.mxu3  ;;  %v4221_v22 = vunpack.i.l.s16 %v2249_v14  ;;  %vm1986_vm15 = vmpackc.low %vm5438_vm3, %vm1984_vm11 }
 0x1bc   : > { %7253 = vst [vmem:[#allocation72_spill] sm:$0xff] %v6184_v60 }
 0x1bd   : > { %vm2384_vm8 = vcmp.ne.s32.totalorder %v4221_v22, %v5147_v0 }
 0x1be   : > { %v2425_v49 = vpop.permute.xlu0 %2424  ;;  %vm2385_vm7 = vmpackc.low %vm2384_vm8, %vm5167_vm12 }
 0x1bf   : > { %v6149_v35 = vsel %vm435_vm0, %v2038_v48, %v2425_v49  ;;  %v1429_v49 = vand.u32 15, %v1245_v3  ;;  %v4577_v48 = vld [vmem:[%s7083_s4 + $0x100] sm:$0xff]  ;;  %v6178_v17 = vpop.f32.mrf.mxu1 }
 0x1c0   : > { %2731 = vmatmul.bf16.gmra.mxu3 %v6149_v35  ;;  %3304 = vmatpush.bf16.msra.mxu0 %v4577_v48  ;;  %7252 = vst [vmem:[#allocation71_spill] sm:$0xff] %v6178_v17  ;;  %v7254_v48 = vshrl.u32 %v5820_v10, 16  ;;  %v1247_v17 = vadd.s32 208, %v5061_v57  ;;  %v4570_v10 = vld [vmem:[%s7083_s4 + $0xc8] sm:$0xff] }
 0x1c1   : > { %vm1711_vm10 = vcmp.gt.s32.totalorder %v1429_v49, 0  ;;  %3214 = vmatpush.bf16.msra.mxu3 %v4570_v10 }
 0x1c2   : > { %v6159_v26 = vpop.f32.mrf.mxu0  ;;  %vm1813_vm14 = vmpackc.low %vm1711_vm10, %vm1711_vm10  ;;  %v1198_v49 = vor.u32 %v5907_v37, %v7254_v48  ;;  %v1443_v22 = vand.u32 15, %v1247_v17 }
 0x1c3   : > { %v6161_v5 = vpop.f32.mrf.mxu3  ;;  %v1847_v39 = vsel %vm1813_vm14, 65537, %v7152_v42 }
 0x1c4   : > { %v1881_v13 = vunpack.c.l.b16 %v1847_v39  ;;  %v1219_v37 = vsel %vm5172_vm13, %v1198_v49, 0  ;;  %v6214_v39 = vpop.f32.mrf.mxu2  ;;  %vm1713_vm12 = vcmp.gt.s32.totalorder %v1443_v22, 0  ;;  %v1249_v22 = vadd.s32 224, %v5061_v57 }
 0x1c5   : > { %4308 = vmatmul.msk.bf16.gmra.mxu0 %vm435_vm0, %v6168_v25  ;;  %7257 = vst [vmem:[#allocation75_spill] sm:$0xff] %v6214_v39  ;;  %vm1815_vm2 = vmpackc.low %vm1713_vm12, %vm1713_vm12  ;;  %3215 = vmatpush.bf16.msra.mxu3 %v4569_v38  ;;  %v2433_v38 = vpop.permute.xlu2 %2432 }
 0x1c6   : > { %4374 = vmatmul.msk.bf16.gmra.mxu2 %vm435_vm0, %v6126_v20  ;;  %v1849_v17 = vsel %vm1815_vm2, 65537, %v7152_v42  ;;  %v1457_v39 = vand.u32 15, %v1249_v22 }
 0x1c7   : > { %2949 = vmatmul.bf16.gmra.mxu1 %v5566_v44  ;;  %v6210_v48 = vpop.f32.mrf.mxu1 }
 0x1c8   : > { %7256 = vst [vmem:[#allocation74_spill] sm:$0xff] %v6210_v48  ;;  %vm1715_vm1 = vcmp.gt.s32.totalorder %v1457_v39, 0 }
 0x1c9   : > { %vm1817_vm6 = vmpackc.low %vm1715_vm1, %vm1715_vm1 }
 0x1ca   : > { %v6176_v3 = vpop.f32.mrf.mxu0  ;;  %v1851_v39 = vsel %vm1817_vm6, 65537, %v7152_v42 }
 0x1cb   : > { %7251 = vst [vmem:[#allocation70_spill] sm:$0xff] %v6176_v3  ;;  %v6180_v29 = vpop.f32.mrf.mxu3  ;;  %v2039_v3 = vsel %vm1986_vm15, %v5789_v47, 0 }
 0x1cc   : > { %v6193_v14 = vsel %vm435_vm0, %v2039_v3, %v2427_v52  ;;  %v6208_v3 = vsel %vm2385_vm7, %v1219_v37, 0  ;;  %v4176_v52 = vunpack.i.l.s16 %v1881_v13 }
 0x1cd   : > { %7255 = vst [vmem:[#allocation73_spill] sm:$0xff] %v6208_v3 }
 0x1ce   : > { %vm1991_vm13 = vcmp.ne.s32.totalorder %v4176_v52, %v5144_v63  ;;  %v1883_v52 = vunpack.c.l.b16 %v1849_v17 }
 0x1cf   : > { %vm1993_vm4 = vmpackc.low %vm5438_vm3, %vm1991_vm13  ;;  %v6228_v10 = vpop.f32.mrf.mxu1 }
 0x1d0   : > { %2736 = vmatmul.bf16.gmra.mxu3 %v6193_v14  ;;  %v2040_v49 = vsel %vm1993_vm4, %v5877_v54, 0  ;;  %7259 = vst [vmem:[#allocation77_spill] sm:$0xff] %v6228_v10  ;;  %v4178_v60 = vunpack.i.l.s16 %v1883_v52  ;;  %v4585_v54 = vld [vmem:[%s7085_s6 + $0x24] sm:$0xf]  ;;  %v2431_v52 = vpop.permute.xlu1 %2430  ;;  %v1251_v10 = vadd.s32 240, %v5061_v57 }
 0x1d2   : > { %v6204_v47 = vpop.f32.mrf.mxu0  ;;  %vm1998_vm5 = vcmp.ne.s32.totalorder %v4178_v60, %v5144_v63  ;;  %v4586_v60 = vld [vmem:[%s7085_s6 + $0x24] sm:$0xf0] }
 0x1d3   : > { %v6206_v0 = vpop.f32.mrf.mxu3  ;;  %vm2000_vm9 = vmpackc.low %vm5438_vm3, %vm1998_vm5 }
 0x1d5   : > { %4309 = vmatmul.msk.bf16.gmra.mxu0 %vm435_vm0, %v6208_v3 }
 0x1d6   : > { %4375 = vmatmul.msk.bf16.gmra.mxu2 %vm435_vm0, %v6168_v25 }
 0x1d7   : > { %2954 = vmatmul.bf16.gmra.mxu1 %v5652_v31  ;;  %v6249_v17 = vpop.f32.mrf.mxu1 }
 0x1d8   : > { %7260 = vst [vmem:[#allocation78_spill] sm:$0xff] %v6249_v17 }
 0x1da   : > { %v6220_v16 = vpop.f32.mrf.mxu0 }
 0x1db   : > { %7258 = vst [vmem:[#allocation76_spill] sm:$0xff] %v6220_v16  ;;  %v6222_v11 = vpop.f32.mrf.mxu3 }
 0x1de   : > { %v2429_v13 = vpop.permute.xlu0 %2428 }
 0x1df   : > { %v6231_v37 = vsel %vm435_vm0, %v2040_v49, %v2429_v13  ;;  %v4483_v13 = vld [vmem:[%s7085_s6 + $0x28] sm:$0xf0]  ;;  %v6275_v3 = vpop.f32.mrf.mxu1 }
 0x1e0   : > { %2741 = vmatmul.bf16.gmra.mxu3 %v6231_v37  ;;  %v4486_v49 = vor.u32 %v4585_v54, %v4483_v13  ;;  %v4481_v54 = vld [vmem:[%s7085_s6 + $0x20] sm:$0xf]  ;;  %7262 = vst [vmem:[#allocation80_spill] sm:$0xff] %v6275_v3 }
 0x1e1   : > { %v4482_v13 = vor.u32 %v4586_v60, %v4481_v54 }
 0x1e2   : > { %v6235_v48 = vpop.f32.mrf.mxu0  ;;  %3697 = vmatpush.bf16.msra.mxu2 %v4486_v49  ;;  %v2041_v49 = vsel %vm2000_vm9, %v5871_v51, 0  ;;  %v1471_v51 = vand.u32 15, %v1251_v10 }
 0x1e3   : > { %v6237_v16 = vpop.f32.mrf.mxu3  ;;  %v6266_v17 = vsel %vm435_vm0, %v2041_v49, %v2431_v52  ;;  %3608 = vmatpush.bf16.msra.mxu1 %v4482_v13  ;;  %v1253_v49 = vadd.s32 256, %v5061_v57 }
 0x1e4   : > { %vm1717_vm10 = vcmp.gt.s32.totalorder %v1471_v51, 0 }
 0x1e5   : > { %4448 = vmatmul.msk.bf16.vlgmr.msra.gmra.mxu0 %vm435_vm0, %v5251_v45  ;;  %vm1819_vm14 = vmpackc.low %vm1717_vm10, %vm1717_vm10 }
 0x1e6   : > { %v1853_v10 = vsel %vm1819_vm14, 65537, %v7152_v42 }
 0x1e7   : > { %2959 = vmatmul.bf16.gmra.mxu1 %v5763_v36  ;;  %v6289_v13 = vpop.f32.mrf.mxu1  ;;  %v1887_v51 = vunpack.c.l.b16 %v1853_v10 }
 0x1e8   : > { %7265 = vst [vmem:[#allocation83_spill] sm:$0xff] %v6289_v13 }
 0x1ea   : > { %v6251_v22 = vpop.f32.mrf.mxu0 }
 0x1eb   : > { %7261 = vst [vmem:[#allocation79_spill] sm:$0xff] %v6251_v22  ;;  %v6253_v45 = vpop.f32.mrf.mxu3  ;;  %v1885_v22 = vunpack.c.l.b16 %v1851_v39 }
 0x1ed   : > { %v4180_v52 = vunpack.i.l.s16 %v1885_v22 }
 0x1ef   : > { %vm2005_vm11 = vcmp.ne.s32.totalorder %v4180_v52, %v5144_v63  ;;  %v6304_v13 = vpop.f32.mrf.mxu1 }
 0x1f0   : > { %2746 = vmatmul.bf16.gmra.mxu3 %v6266_v17  ;;  %vm2007_vm15 = vmpackc.low %vm5438_vm3, %vm2005_vm11  ;;  %7266 = vst [vmem:[#allocation84_spill] sm:$0xff] %v6304_v13 }
 0x1f2   : > { %v6273_v23 = vpop.f32.mrf.mxu0 }
 0x1f3   : > { %v6277_v54 = vpop.f32.mrf.mxu3 }
 0x1f5   : > { %4449 = vmatmul.msk.bf16.gmra.mxu0 %vm435_vm0, %v5300_v59  ;;  %v2042_v59 = vsel %vm2007_vm15, %v5793_v58, 0 }
 0x1f6   : > { %v6294_v22 = vsel %vm435_vm0, %v2042_v59, %v2433_v38  ;;  %v2435_v38 = vpop.permute.xlu0 %2434 }
 0x1f7   : > { %2964 = vmatmul.bf16.gmra.mxu1 %v5853_v6 }
 0x1fa   : > { %v6283_v60 = vpop.f32.mrf.mxu0 }
 0x1fb   : > { %7263 = vst [vmem:[#allocation81_spill] sm:$0xff] %v6283_v60  ;;  %v6285_v39 = vpop.f32.mrf.mxu3  ;;  %v1485_v60 = vand.u32 15, %v1253_v49 }
 0x1fc   : > { %7264 = vst [vmem:[#allocation82_spill] sm:$0xff] %v6285_v39  ;;  %v4182_v39 = vunpack.i.l.s16 %v1887_v51 }
 0x1fd   : > { %vm1719_vm8 = vcmp.gt.s32.totalorder %v1485_v60, 0  ;;  %v6320_v60 = vpop.f32.mrf.mxu1 }
 0x1fe   : > { %vm2012_vm7 = vcmp.ne.s32.totalorder %v4182_v39, %v5144_v63  ;;  %vm1821_vm12 = vmpackc.low %vm1719_vm8, %vm1719_vm8  ;;  %7268 = vst [vmem:[#allocation86_spill] sm:$0xff] %v6320_v60 }
 0x1ff   : > { %vm2014_vm13 = vmpackc.low %vm5438_vm3, %vm2012_vm7  ;;  %v1855_v10 = vsel %vm1821_vm12, 65537, %v7152_v42 }
 0x200   : > { %2751 = vmatmul.bf16.gmra.mxu3 %v6294_v22  ;;  %v1889_v39 = vunpack.c.l.b16 %v1855_v10  ;;  %v2437_v10 = vpop.permute.xlu1 %2436 }
 0x202   : > { %v6298_v52 = vpop.f32.mrf.mxu0  ;;  %v4184_v13 = vunpack.i.l.s16 %v1889_v39 }
 0x203   : > { %v6300_v3 = vpop.f32.mrf.mxu3 }
 0x204   : > { %vm2019_vm2 = vcmp.ne.s32.totalorder %v4184_v13, %v5144_v63  ;;  %v2777_v63 = vadd.f32 %v5782_v34, %v6123_v7  ;;  %v4475_v34 = vld [vmem:[%s7085_s6 + $0x18] sm:$0xf0] }
 0x205   : > { %4450 = vmatmul.msk.bf16.gmra.mxu0 %vm435_vm0, %v5355_v27  ;;  %v2043_v27 = vsel %vm2014_vm13, %v5831_v43, 0  ;;  %v6330_v43 = vpop.f32.mrf.mxu1  ;;  %vm2021_vm4 = vmpackc.low %vm5438_vm3, %vm2019_vm2 }
 0x206   : > { %v6317_v59 = vsel %vm435_vm0, %v2043_v27, %v2435_v38  ;;  %7269 = vst [vmem:[#allocation87_spill] sm:$0xff] %v6330_v43  ;;  %v2044_v60 = vsel %vm2021_vm4, %v5924_v12, 0  ;;  %v4583_v12 = vld [vmem:[%s7085_s6 + $0x14] sm:$0xf] }
 0x207   : > { %2969 = vmatmul.bf16.gmra.mxu1 %v5934_v2  ;;  %v6340_v39 = vsel %vm435_vm0, %v2044_v60, %v2437_v10  ;;  %v4478_v7 = vor.u32 %v4583_v12, %v4475_v34  ;;  %v2779_v60 = vadd.f32 %v5822_v8, %v6141_v28  ;;  %v2782_v8 = vadd.f32 %v5873_v24, %v6161_v5 }
 0x208   : > { %v2787_v24 = vadd.f32 %v5943_v9, %v6206_v0  ;;  %v2792_v0 = vadd.f32 %v6001_v53, %v6237_v16 }
 0x209   : > { %3698 = vmatpush.bf16.msra.mxu2 %v4478_v7 }
 0x20a   : > { %v6308_v57 = vpop.f32.mrf.mxu0 }
 0x20b   : > { %7267 = vst [vmem:[#allocation85_spill] sm:$0xff] %v6308_v57  ;;  %v6310_v58 = vpop.f32.mrf.mxu3 }
 0x210   : > { %2756 = vmatmul.bf16.gmra.mxu3 %v6317_v59 }
 0x212   : > { %v6322_v49 = vpop.f32.mrf.mxu0 }
 0x213   : > { %v6324_v51 = vpop.f32.mrf.mxu3 }
 0x215   : > { %4451 = vmatmul.msk.bf16.gmra.mxu0 %vm435_vm0, %v5420_v1 }
 0x217   : > { %2974 = vmatmul.bf16.gmra.mxu1 %v5985_v40 }
 0x21a   : > { %v6336_v27 = vpop.f32.mrf.mxu0 }
 0x21b   : > { %v6332_v38 = vpop.f32.mrf.mxu3  ;;  %7270 = vst [vmem:[#allocation88_spill] sm:$0xff] %v6336_v27  ;;  %v4584_v27 = vld [vmem:[%s7085_s6 + $0x14] sm:$0xf0] }
 0x220   : > { %2761 = vmatmul.bf16.gmra.mxu3 %v6340_v39 }
 0x222   : > { %v6351_v18 = vpop.f32.mrf.mxu0 }
 0x223   : > { %v6345_v1 = vpop.f32.mrf.mxu3 }
 0x224   : > { %v2940_v13 = vpop.f32.mrf.mxu1 }
 0x225   : > { %v6347_v43 = vadd.f32 %v2940_v13, %v2777_v63  ;;  %4452 = vmatmul.msk.bf16.gmra.mxu0 %vm435_vm0, %v5509_v32  ;;  %v4473_v13 = vld [vmem:[%s7085_s6 + $0x10] sm:$0xf] }
 0x226   : > { %v4474_v12 = vor.u32 %v4584_v27, %v4473_v13 }
 0x227   : > { %2979 = vmatmul.bf16.gmra.mxu1 %v6036_v50 }
 0x228   : > { %3609 = vmatpush.bf16.msra.mxu1 %v4474_v12 }
 0x22a   : > { %v6372_v57 = vpop.f32.mrf.mxu0 }
 0x22b   : > { %v6362_v10 = vpop.f32.mrf.mxu3  ;;  %7271 = vst [vmem:[#allocation89_spill] sm:$0xff] %v6372_v57 }
 0x22c   : > { %v2942_v32 = vpop.f32.mrf.mxu1 }
 0x22d   : > { %v6364_v63 = vadd.f32 %v2942_v32, %v2779_v60 }
 0x230   : > { %3216 = vmatmul.bf16.vlgmr.msra.gmra.mxu3 %v5566_v44  ;;  %v2784_v44 = vadd.f32 %v5910_v21, %v6180_v29  ;;  %v2789_v21 = vadd.f32 %v5960_v41, %v6222_v11  ;;  %v6424_v11 = vpop.f32.mrf.mxu2 }
 0x232   : > { %v6384_v60 = vpop.f32.mrf.mxu0 }
 0x233   : > { %v6377_v28 = vpop.f32.mrf.mxu3 }
 0x234   : > { %v2945_v34 = vpop.f32.mrf.mxu1 }
 0x235   : > { %v6379_v7 = vadd.f32 %v2945_v34, %v2782_v8  ;;  %4453 = vmatmul.msk.bf16.gmra.mxu0 %vm435_vm0, %v5583_v55 }
 0x237   : > { %2984 = vmatmul.bf16.gmra.mxu1 %v6107_v19 }
 0x23a   : > { %v6397_v55 = vpop.f32.mrf.mxu0 }
 0x23b   : > { %v6388_v27 = vpop.f32.mrf.mxu3  ;;  %7273 = vst [vmem:[#allocation91_spill] sm:$0xff] %v6397_v55 }
 0x23c   : > { %7272 = vst [vmem:[#allocation90_spill] sm:$0xff] %v6388_v27  ;;  %v2947_v32 = vpop.f32.mrf.mxu1 }
 0x23d   : > { %v6390_v13 = vadd.f32 %v2947_v32, %v2784_v44 }
 0x240   : > { %3221 = vmatmul.bf16.gmra.mxu3 %v5652_v31 }
 0x242   : > { %v6410_v9 = vpop.f32.mrf.mxu0 }
 0x243   : > { %v6395_v5 = vpop.f32.mrf.mxu3 }
 0x244   : > { %v2950_v12 = vpop.f32.mrf.mxu1 }
 0x245   : > { %v6399_v8 = vadd.f32 %v2950_v12, %v2787_v24  ;;  %4454 = vmatmul.msk.bf16.gmra.mxu0 %vm435_vm0, %v5696_v62 }
 0x247   : > { %2989 = vmatmul.bf16.gmra.mxu1 %v6149_v35 }
 0x24a   : > { %v6422_v41 = vpop.f32.mrf.mxu0 }
 0x24b   : > { %v6406_v29 = vpop.f32.mrf.mxu3  ;;  %7275 = vst [vmem:[#allocation93_spill] sm:$0xff] %v6422_v41 }
 0x24c   : > { %7274 = vst [vmem:[#allocation92_spill] sm:$0xff] %v6406_v29  ;;  %v2952_v31 = vpop.f32.mrf.mxu1 }
 0x24d   : > { %v6408_v34 = vadd.f32 %v2952_v31, %v2789_v21 }
 0x250   : > { %3226 = vmatmul.bf16.gmra.mxu3 %v5763_v36  ;;  %v2794_v36 = vadd.f32 %v6019_v61, %v6253_v45  ;;  %v4581_v61 = vld [vmem:[%s7085_s6 + $0x4] sm:$0xf] }
 0x252   : > { %v6433_v12 = vpop.f32.mrf.mxu0 }
 0x253   : > { %v6415_v44 = vpop.f32.mrf.mxu3 }
 0x254   : > { %v2955_v62 = vpop.f32.mrf.mxu1 }
 0x255   : > { %v6417_v32 = vadd.f32 %v2955_v62, %v2792_v0  ;;  %4455 = vmatmul.msk.bf16.gmra.mxu0 %vm435_vm0, %v5797_v15  ;;  %v2797_v15 = vadd.f32 %v6051_v33, %v6277_v54  ;;  %v6439_v0 = vpop.f32.mrf.mxu2 }
 0x257   : > { %2994 = vmatmul.bf16.gmra.mxu1 %v6193_v14 }
 0x25a   : > { %v6454_v54 = vpop.f32.mrf.mxu0 }
 0x25b   : > { %v6428_v24 = vpop.f32.mrf.mxu3  ;;  %7278 = vst [vmem:[#allocation96_spill] sm:$0xff] %v6454_v54 }
 0x25c   : > { %7276 = vst [vmem:[#allocation94_spill] sm:$0xff] %v6428_v24  ;;  %v2957_v53 = vpop.f32.mrf.mxu1 }
 0x25d   : > { %v6430_v16 = vadd.f32 %v2957_v53, %v2794_v36  ;;  %v6458_v53 = vpop.f32.mrf.mxu2 }
 0x260   : > { %3231 = vmatmul.bf16.gmra.mxu3 %v5853_v6  ;;  %v4467_v6 = vld [vmem:[%s7085_s6 + $0x8] sm:$0xf0] }
 0x261   : > { %v4470_v33 = vor.u32 %v4581_v61, %v4467_v6  ;;  %v2802_v61 = vadd.f32 %v6121_v56, %v6300_v3  ;;  %v2807_v3 = vadd.f32 %v6159_v26, %v6324_v51  ;;  %v2812_v26 = vadd.f32 %v6204_v47, %v6345_v1 }
 0x262   : > { %v3306_v41 = vpop.f32.mrf.mxu0  ;;  %v2817_v1 = vadd.f32 %v6235_v48, %v6377_v28  ;;  %v2822_v48 = vadd.f32 %v6273_v23, %v6395_v5  ;;  %v7293_v5 = vld [vmem:[#allocation58_spill] sm:$0xff] }
 0x263   : > { %v6437_v21 = vpop.f32.mrf.mxu3  ;;  %3699 = vmatpush.bf16.msra.mxu2 %v4470_v33 }
 0x264   : > { %v2960_v31 = vpop.f32.mrf.mxu1 }
 0x265   : > { %v6441_v62 = vadd.f32 %v2960_v31, %v2797_v15  ;;  %4456 = vmatmul.msk.bf16.gmra.mxu0 %vm435_vm0, %v5883_v4  ;;  %v4465_v4 = vld [vmem:[%s7085_s6] sm:$0xf]  ;;  %v4582_v15 = vld [vmem:[%s7085_s6 + $0x4] sm:$0xf0]  ;;  %v6476_v55 = vpop.f32.mrf.mxu2 }
 0x266   : > { %v4466_v31 = vor.u32 %v4582_v15, %v4465_v4 }
 0x267   : > { %2999 = vmatmul.bf16.gmra.mxu1 %v6231_v37 }
 0x268   : > { %3610 = vmatpush.bf16.msra.mxu1 %v4466_v31 }
 0x26a   : > { %v3308_v4 = vpop.f32.mrf.mxu0 }
 0x26b   : > { %v6452_v45 = vpop.f32.mrf.mxu3 }
 0x26c   : > { %7277 = vst [vmem:[#allocation95_spill] sm:$0xff] %v6452_v45  ;;  %v6456_v36 = vpop.f32.mrf.mxu1 }
 0x26d   : > { %v6483_v56 = vpop.f32.mrf.mxu2 }
 0x270   : > { %3236 = vmatmul.bf16.gmra.mxu3 %v5934_v2 }
 0x273   : > { %v6469_v6 = vpop.f32.mrf.mxu3 }
 0x274   : > { %v2965_v33 = vpop.f32.mrf.mxu1 }
 0x275   : > { %v6471_v54 = vadd.f32 %v2965_v33, %v2802_v61  ;;  %4457 = vmatmul.msk.bf16.gmra.mxu0 %vm435_vm0, %v5950_v30  ;;  %v7280_v61 = vld [vmem:[#allocation56_spill] sm:$0xff]  ;;  %v3311_v33 = vpop.f32.mrf.mxu0 }
 0x277   : > { %3004 = vmatmul.bf16.gmra.mxu1 %v6266_v17 }
 0x27b   : > { %v6478_v57 = vpop.f32.mrf.mxu3 }
 0x27c   : > { %7279 = vst [vmem:[#allocation97_spill] sm:$0xff] %v6478_v57  ;;  %v6480_v2 = vpop.f32.mrf.mxu1 }
 0x280   : > { %3241 = vmatmul.bf16.gmra.mxu3 %v5985_v40  ;;  %v6498_v40 = vpop.f32.mrf.mxu2 }
 0x283   : > { %v6487_v15 = vpop.f32.mrf.mxu3 }
 0x284   : > { %v2970_v30 = vpop.f32.mrf.mxu1 }
 0x285   : > { %v6489_v31 = vadd.f32 %v2970_v30, %v2807_v3  ;;  %4458 = vmatmul.msk.bf16.gmra.mxu0 %vm435_vm0, %v7280_v61  ;;  %v3313_v3 = vpop.f32.mrf.mxu0 }
 0x287   : > { %3009 = vmatmul.bf16.gmra.mxu1 %v6294_v22 }
 0x288   : > { %v6509_v61 = vpop.f32.mrf.mxu2 }
 0x289   : > { %7282 = vst [vmem:[#allocation98_spill] sm:$0xff] %v6509_v61  ;;  %v3032_v61 = vadd.f32 %v7293_v5, %v6364_v63 }
 0x28b   : > { %v6494_v57 = vpop.f32.mrf.mxu3 }
 0x28c   : > { %7281 = vst [vmem:[#allocation56_spill] sm:$0xff] %v6494_v57  ;;  %v6496_v45 = vpop.f32.mrf.mxu1 }
 0x290   : > { %3246 = vmatmul.bf16.gmra.mxu3 %v6036_v50  ;;  %v6516_v50 = vpop.f32.mrf.mxu0  ;;  %v6519_v47 = vpop.f32.mrf.mxu2 }
 0x291   : > { %7285 = vst [vmem:[#allocation101_spill] sm:$0xff] %v6519_v47 }
 0x293   : > { %v6503_v51 = vpop.f32.mrf.mxu3 }
 0x294   : > { %v2975_v30 = vpop.f32.mrf.mxu1 }
 0x295   : > { %v6505_v24 = vadd.f32 %v2975_v30, %v2812_v26  ;;  %4459 = vmatmul.msk.bf16.gmra.mxu0 %vm435_vm0, %v6058_v46 }
 0x297   : > { %3014 = vmatmul.bf16.gmra.mxu1 %v6317_v59 }
 0x298   : > { %v6531_v27 = vpop.f32.mrf.mxu2 }
 0x299   : > { %7287 = vst [vmem:[#allocation103_spill] sm:$0xff] %v6531_v27 }
 0x29b   : > { %v6512_v57 = vpop.f32.mrf.mxu3 }
 0x29c   : > { %7283 = vst [vmem:[#allocation99_spill] sm:$0xff] %v6512_v57  ;;  %v6514_v29 = vpop.f32.mrf.mxu1  ;;  %v6529_v57 = vpop.f32.mrf.mxu0 }
 0x29d   : > { %7284 = vst [vmem:[#allocation100_spill] sm:$0xff] %v6514_v29 }
 0x2a0   : > { %3251 = vmatmul.bf16.gmra.mxu3 %v6107_v19 }
 0x2a3   : > { %v6523_v26 = vpop.f32.mrf.mxu3 }
 0x2a4   : > { %v2980_v46 = vpop.f32.mrf.mxu1  ;;  %v6538_v47 = vpop.f32.mrf.mxu0 }
 0x2a5   : > { %v6525_v30 = vadd.f32 %v2980_v46, %v2817_v1  ;;  %4460 = vmatmul.msk.bf16.gmra.mxu0 %vm435_vm0, %v6126_v20  ;;  %v6542_v46 = vpop.f32.mrf.mxu2 }
 0x2a6   : > { %7290 = vst [vmem:[#allocation106_spill] sm:$0xff] %v6542_v46 }
 0x2a7   : > { %7286 = vst [vmem:[#allocation102_spill] sm:$0xff] %v6525_v30 }
 0x2ab   : > { %v6533_v29 = vpop.f32.mrf.mxu3 }
 0x2ac   : > { %7288 = vst [vmem:[#allocation104_spill] sm:$0xff] %v6533_v29  ;;  %v6535_v19 = vpop.f32.mrf.mxu1  ;;  %v7292_v29 = vld [vmem:[#allocation55_spill] sm:$0xff]  ;;  %v6557_v46 = vpop.f32.mrf.mxu0 }
 0x2ad   : > { %7289 = vst [vmem:[#allocation105_spill] sm:$0xff] %v6535_v19  ;;  %v3030_v19 = vadd.f32 %v7292_v29, %v6347_v43 }
 0x2b0   : > { %3256 = vmatmul.bf16.gmra.mxu3 %v6149_v35  ;;  %v6553_v35 = vld [vmem:[%s7084_s5] ss:$0 sm:$0xff] }
 0x2b3   : > { %v3217_v28 = vpop.f32.mrf.mxu3 }
 0x2b4   : > { %v2985_v1 = vpop.f32.mrf.mxu1  ;;  %v3307_v27 = vadd.f32 %v3306_v41, %v3217_v28  ;;  %v6562_v28 = vpop.f32.mrf.mxu2 }
 0x2b5   : > { %v6544_v20 = vadd.f32 %v2985_v1, %v2822_v48  ;;  %4461 = vmatmul.msk.bf16.gmra.mxu0 %vm435_vm0, %v6168_v25 }
 0x2b6   : > { %v3386_v30 = vadd.f32 %v3307_v27, %v3030_v19  ;;  %v2827_v19 = vadd.f32 %v6298_v52, %v6415_v44 }
 0x2b7   : > { %7291 = vst [vmem:[#allocation107_spill] sm:$0xff] %v6544_v20 }
 0x2b8   : > { %v3421_v25 = vadd.f32 %v6553_v35, %v3386_v30 }
 0x2ba   : > { %v3453_v27 = vmax.f32 %v3421_v25, 0.0 }
 0x2bb   : > { %v3219_v23 = vpop.f32.mrf.mxu3 }
 0x2bc   : > { %v3309_v48 = vadd.f32 %v3308_v4, %v3219_v23  ;;  %v6559_v1 = vpop.f32.mrf.mxu1  ;;  %v7294_v23 = vld [vmem:[#allocation73_spill] sm:$0xff]  ;;  %v6578_v25 = vpop.f32.mrf.mxu2 }
 0x2be   : > { %v3387_v41 = vadd.f32 %v3309_v48, %v3032_v61  ;;  %v6572_v61 = vpop.f32.mrf.mxu0 }
 0x2c0   : > { %v3422_v43 = vadd.f32 %v6553_v35, %v3387_v41  ;;  %3261 = vmatmul.bf16.gmra.mxu3 %v6193_v14  ;;  %v7295_v14 = vld [vmem:[#allocation60_spill] sm:$0xff] }
 0x2c1   : > { %v3035_v48 = vadd.f32 %v7295_v14, %v6379_v7 }
 0x2c2   : > { %v3454_v29 = vmax.f32 %v3422_v43, 0.0 }
 0x2c3   : > { %v3222_v63 = vpop.f32.mrf.mxu3 }
 0x2c4   : > { %v3485_v5 = vpack.c.bf16 %v3454_v29, %v3453_v27  ;;  %v2990_v20 = vpop.f32.mrf.mxu1  ;;  %v3312_v30 = vadd.f32 %v3311_v33, %v3222_v63 }
 0x2c5   : > { %v6568_v4 = vadd.f32 %v2990_v20, %v2827_v19  ;;  %4462 = vmatmul.msk.bf16.gmra.mxu0 %vm435_vm0, %v7294_v23  ;;  %v7296_v20 = vld [vmem:[#allocation64_spill] sm:$0xff]  ;;  %v6589_v23 = vpop.f32.mrf.mxu2 }
 0x2c6   : > { %4495 = vmatmul.msk.bf16.vlgmr.msra.gmra.mxu1 %vm435_vm0, %v3485_v5  ;;  %4511 = vmatmul.msk.bf16.vlgmr.msra.gmra.mxu2 %vm435_vm0, %v3485_v5  ;;  %v3388_v52 = vadd.f32 %v3312_v30, %v3035_v48  ;;  %v3037_v41 = vadd.f32 %v7296_v20, %v6390_v13  ;;  %v6585_v19 = vpop.f32.mrf.mxu0  ;;  %v2832_v30 = vadd.f32 %v6322_v49, %v6437_v21  ;;  %v7298_v21 = vld [vmem:[#allocation69_spill] sm:$0xff] }
 0x2c8   : > { %v3423_v29 = vadd.f32 %v6553_v35, %v3388_v52 }
 0x2ca   : > { %v3455_v7 = vmax.f32 %v3423_v29, 0.0 }
 0x2cb   : > { %v3224_v44 = vpop.f32.mrf.mxu3 }
 0x2cc   : > { %v3314_v43 = vadd.f32 %v3313_v3, %v3224_v44  ;;  %v6582_v27 = vpop.f32.mrf.mxu1 }
 0x2ce   : > { %v3389_v33 = vadd.f32 %v3314_v43, %v3037_v41  ;;  %v6601_v20 = vpop.f32.mrf.mxu0  ;;  %v3042_v43 = vadd.f32 %v7298_v21, %v6408_v34 }
 0x2d0   : > { %v3424_v63 = vadd.f32 %v6553_v35, %v3389_v33  ;;  %3266 = vmatmul.bf16.gmra.mxu3 %v6231_v37  ;;  %v7297_v37 = vld [vmem:[#allocation66_spill] sm:$0xff] }
 0x2d1   : > { %v3040_v44 = vadd.f32 %v7297_v37, %v6399_v8 }
 0x2d2   : > { %v3456_v5 = vmax.f32 %v3424_v63, 0.0 }
 0x2d3   : > { %v3227_v13 = vpop.f32.mrf.mxu3 }
 0x2d4   : > { %v2995_v3 = vpop.f32.mrf.mxu1  ;;  %v3486_v14 = vpack.c.bf16 %v3456_v5, %v3455_v7  ;;  %v3317_v52 = vadd.f32 %v6516_v50, %v3227_v13 }
 0x2d5   : > { %v6593_v48 = vadd.f32 %v2995_v3, %v2832_v30  ;;  %3380 = vmatmul.bf16.gmra.mxu0 %v7152_v42  ;;  %v6608_v42 = vpop.f32.mrf.mxu2  ;;  %v2837_v30 = vadd.f32 %v6351_v18, %v6469_v6  ;;  %v7300_v6 = vld [vmem:[#allocation75_spill] sm:$0xff] }
 0x2d6   : > { %4496 = vmatmul.msk.bf16.gmra.mxu1 %vm435_vm0, %v3486_v14  ;;  %4512 = vmatmul.msk.bf16.gmra.mxu2 %vm435_vm0, %v3486_v14  ;;  %v3390_v41 = vadd.f32 %v3317_v52, %v3040_v44  ;;  %v6615_v34 = vpop.f32.mrf.mxu0 }
 0x2d8   : > { %v3425_v50 = vadd.f32 %v6553_v35, %v3390_v41 }
 0x2da   : > { %v3457_v8 = vmax.f32 %v3425_v50, 0.0 }
 0x2db   : > { %v3229_v49 = vpop.f32.mrf.mxu3 }
 0x2dc   : > { %v3319_v29 = vadd.f32 %v6529_v57, %v3229_v49  ;;  %v6606_v33 = vpop.f32.mrf.mxu1  ;;  %v3047_v49 = vadd.f32 %v7300_v6, %v6430_v16  ;;  %v2842_v16 = vadd.f32 %v6384_v60, %v6487_v15 }
 0x2dd   : > { %v6622_v37 = vpop.f32.mrf.mxu2 }
 0x2de   : > { %v3391_v63 = vadd.f32 %v3319_v29, %v3042_v43  ;;  %v6631_v29 = vpop.f32.mrf.mxu0 }
 0x2e0   : > { %v3426_v7 = vadd.f32 %v6553_v35, %v3391_v63  ;;  %3271 = vmatmul.bf16.gmra.mxu3 %v6266_v17  ;;  %v7299_v17 = vld [vmem:[#allocation72_spill] sm:$0xff] }
 0x2e1   : > { %v3045_v44 = vadd.f32 %v7299_v17, %v6417_v32 }
 0x2e2   : > { %v3458_v5 = vmax.f32 %v3426_v7, 0.0 }
 0x2e3   : > { %v3232_v13 = vpop.f32.mrf.mxu3 }
 0x2e4   : > { %v3000_v57 = vpop.f32.mrf.mxu1  ;;  %v3487_v3 = vpack.c.bf16 %v3458_v5, %v3457_v8  ;;  %v3322_v52 = vadd.f32 %v6538_v47, %v3232_v13 }
 0x2e5   : > { %v6617_v14 = vadd.f32 %v3000_v57, %v2837_v30  ;;  %v6636_v7 = vpop.f32.mrf.mxu2  ;;  %v7301_v57 = vld [vmem:[#allocation82_spill] sm:$0xff] }
 0x2e6   : > { %4497 = vmatmul.msk.bf16.gmra.mxu1 %vm435_vm0, %v3487_v3  ;;  %4513 = vmatmul.msk.bf16.gmra.mxu2 %vm435_vm0, %v3487_v3  ;;  %v3392_v41 = vadd.f32 %v3322_v52, %v3045_v44  ;;  %v7302_v3 = vld [vmem:[#allocation62_spill] sm:$0xff]  ;;  %v3338_v60 = vpop.f32.mrf.mxu0 }
 0x2e7   : > { %v2799_v52 = vadd.f32 %v7302_v3, %v7301_v57 }
 0x2e8   : > { %v3427_v47 = vadd.f32 %v6553_v35, %v3392_v41 }
 0x2e9   : > { %v2963_v44 = vadd.f32 %v6456_v36, %v2799_v52 }
 0x2ea   : > { %v3459_v32 = vmax.f32 %v3427_v47, 0.0 }
 0x2eb   : > { %v3234_v18 = vpop.f32.mrf.mxu3  ;;  %v3052_v6 = vadd.f32 %v6439_v0, %v2963_v44 }
 0x2ec   : > { %v3324_v21 = vadd.f32 %v6557_v46, %v3234_v18  ;;  %v6629_v43 = vpop.f32.mrf.mxu1 }
 0x2ed   : > { %v6650_v41 = vpop.f32.mrf.mxu2 }
 0x2ee   : > { %v3393_v50 = vadd.f32 %v3324_v21, %v3047_v49 }
 0x2f0   : > { %v3428_v63 = vadd.f32 %v6553_v35, %v3393_v50  ;;  %3276 = vmatmul.bf16.gmra.mxu3 %v6294_v22  ;;  %v3050_v22 = vadd.f32 %v6424_v11, %v6441_v62  ;;  %v3341_v11 = vpop.f32.mrf.mxu0 }
 0x2f2   : > { %v3460_v8 = vmax.f32 %v3428_v63, 0.0  ;;  %v2847_v63 = vadd.f32 %v6410_v9, %v6503_v51 }
 0x2f3   : > { %v3237_v5 = vpop.f32.mrf.mxu3 }
 0x2f4   : > { %v3005_v46 = vpop.f32.mrf.mxu1  ;;  %v3488_v30 = vpack.c.bf16 %v3460_v8, %v3459_v32  ;;  %v3327_v17 = vadd.f32 %v6572_v61, %v3237_v5  ;;  %v7303_v5 = vld [vmem:[#allocation67_spill] sm:$0xff] }
 0x2f5   : > { %v6640_v13 = vadd.f32 %v3005_v46, %v2842_v16  ;;  %v6661_v16 = vpop.f32.mrf.mxu2  ;;  %v2804_v46 = vadd.f32 %v7303_v5, %v6310_v58  ;;  %v7305_v5 = vld [vmem:[#allocation61_spill] sm:$0xff] }
 0x2f6   : > { %4498 = vmatmul.msk.bf16.gmra.mxu1 %vm435_vm0, %v3488_v30  ;;  %4514 = vmatmul.msk.bf16.gmra.mxu2 %vm435_vm0, %v3488_v30  ;;  %v3394_v15 = vadd.f32 %v3327_v17, %v3050_v22 }
 0x2f7   : > { %v2968_v9 = vadd.f32 %v6480_v2, %v2804_v46  ;;  %v2852_v2 = vadd.f32 %v6433_v12, %v6523_v26 }
 0x2f8   : > { %v3429_v61 = vadd.f32 %v6553_v35, %v3394_v15  ;;  %v3343_v52 = vpop.f32.mrf.mxu0 }
 0x2f9   : > { %v3057_v3 = vadd.f32 %v6476_v55, %v2968_v9 }
 0x2fa   : > { %v3461_v62 = vmax.f32 %v3429_v61, 0.0 }
 0x2fb   : > { %v3239_v18 = vpop.f32.mrf.mxu3 }
 0x2fc   : > { %v3329_v49 = vadd.f32 %v6585_v19, %v3239_v18  ;;  %v6654_v21 = vpop.f32.mrf.mxu1 }
 0x2fd   : > { %v6678_v44 = vpop.f32.mrf.mxu2 }
 0x2fe   : > { %v3395_v47 = vadd.f32 %v3329_v49, %v3052_v6  ;;  %v7304_v49 = vld [vmem:[#allocation70_spill] sm:$0xff] }
 0x2ff   : > { %v2809_v61 = vadd.f32 %v7304_v49, %v6332_v38 }
 0x300   : > { %v3430_v50 = vadd.f32 %v6553_v35, %v3395_v47  ;;  %3281 = vmatmul.bf16.gmra.mxu3 %v6317_v59  ;;  %v3055_v59 = vadd.f32 %v6458_v53, %v6471_v54  ;;  %v3346_v47 = vpop.f32.mrf.mxu0 }
 0x301   : > { %v2973_v12 = vadd.f32 %v6496_v45, %v2809_v61 }
 0x302   : > { %v3462_v36 = vmax.f32 %v3430_v50, 0.0 }
 0x303   : > { %v3242_v32 = vpop.f32.mrf.mxu3 }
 0x304   : > { %v3489_v8 = vpack.c.bf16 %v3462_v36, %v3461_v62  ;;  %v3010_v0 = vpop.f32.mrf.mxu1  ;;  %v3332_v30 = vadd.f32 %v6601_v20, %v3242_v32 }
 0x305   : > { %v6663_v19 = vadd.f32 %v3010_v0, %v2847_v63  ;;  %v6694_v26 = vpop.f32.mrf.mxu2  ;;  %v3062_v63 = vadd.f32 %v6498_v40, %v2973_v12  ;;  %v7307_v40 = vld [vmem:[#allocation98_spill] sm:$0xff] }
 0x306   : > { %4499 = vmatmul.msk.bf16.gmra.mxu1 %vm435_vm0, %v3489_v8  ;;  %4515 = vmatmul.msk.bf16.gmra.mxu2 %vm435_vm0, %v3489_v8  ;;  %v3396_v51 = vadd.f32 %v3332_v30, %v3055_v59  ;;  %v7306_v59 = vld [vmem:[#allocation76_spill] sm:$0xff] }
 0x307   : > { %v2814_v9 = vadd.f32 %v7306_v59, %v6362_v10 }
 0x308   : > { %v3431_v58 = vadd.f32 %v6553_v35, %v3396_v51 }
 0x30a   : > { %v3463_v54 = vmax.f32 %v3431_v58, 0.0 }
 0x30b   : > { %v3244_v57 = vpop.f32.mrf.mxu3 }
 0x30c   : > { %v3334_v17 = vadd.f32 %v6615_v34, %v3244_v57  ;;  %v6675_v22 = vpop.f32.mrf.mxu1  ;;  %v7308_v57 = vld [vmem:[#allocation100_spill] sm:$0xff] }
 0x30e   : > { %v3397_v20 = vadd.f32 %v3334_v17, %v3057_v3  ;;  %v2978_v3 = vadd.f32 %v7308_v57, %v2814_v9 }
 0x310   : > { %v3432_v15 = vadd.f32 %v6553_v35, %v3397_v20  ;;  %3286 = vmatmul.bf16.gmra.mxu3 %v6340_v39  ;;  %v3060_v39 = vadd.f32 %v6483_v56, %v6489_v31  ;;  %v6700_v56 = vpop.f32.mrf.mxu2 }
 0x312   : > { %v3464_v53 = vmax.f32 %v3432_v15, 0.0  ;;  %v7309_v15 = vld [vmem:[#allocation101_spill] sm:$0xff] }
 0x313   : > { %v3247_v55 = vpop.f32.mrf.mxu3 }
 0x314   : > { %v3490_v18 = vpack.c.bf16 %v3464_v53, %v3463_v54  ;;  %v3015_v6 = vpop.f32.mrf.mxu1  ;;  %v3337_v50 = vadd.f32 %v6631_v29, %v3247_v55  ;;  %v3348_v29 = vpop.f32.mrf.mxu0  ;;  %v3067_v54 = vadd.f32 %v7309_v15, %v2978_v3 }
 0x315   : > { %v6684_v34 = vadd.f32 %v3015_v6, %v2852_v2 }
 0x316   : > { %4500 = vmatmul.msk.bf16.gmra.mxu1 %vm435_vm0, %v3490_v18  ;;  %4516 = vmatmul.msk.bf16.gmra.mxu2 %vm435_vm0, %v3490_v18  ;;  %v3398_v62 = vadd.f32 %v3337_v50, %v3060_v39  ;;  %v7310_v50 = vld [vmem:[#allocation90_spill] sm:$0xff]  ;;  %v7311_v39 = vld [vmem:[#allocation79_spill] sm:$0xff] }
 0x317   : > { %v2819_v12 = vadd.f32 %v7311_v39, %v7310_v50  ;;  %v7319_v39 = vld [vmem:[#allocation5_spill] sm:$0xff] }
 0x318   : > { %v3433_v38 = vadd.f32 %v6553_v35, %v3398_v62  ;;  %v6710_v2 = vpop.f32.mrf.mxu2 }
 0x31a   : > { %v3465_v46 = vmax.f32 %v3433_v38, 0.0  ;;  %v7314_v38 = vld [vmem:[#allocation105_spill] sm:$0xff] }
 0x31b   : > { %v3249_v36 = vpop.f32.mrf.mxu3 }
 0x31c   : > { %v3339_v32 = vadd.f32 %v3338_v60, %v3249_v36  ;;  %v3065_v60 = vadd.f32 %v7307_v40, %v6505_v24  ;;  %v3351_v17 = vpop.f32.mrf.mxu0  ;;  %v7312_v36 = vld [vmem:[#allocation102_spill] sm:$0xff] }
 0x31e   : > { %v3399_v8 = vadd.f32 %v3339_v32, %v3062_v63  ;;  %v7313_v63 = vld [vmem:[#allocation103_spill] sm:$0xff] }
 0x31f   : > { %v3070_v32 = vadd.f32 %v7313_v63, %v7312_v36 }
 0x320   : > { %v3434_v0 = vadd.f32 %v6553_v35, %v3399_v8  ;;  %3291 = vmatmul.bf16.gmra.mxu3 %v7305_v5  ;;  %v2983_v8 = vadd.f32 %v7314_v38, %v2819_v12  ;;  %v6723_v5 = vpop.f32.mrf.mxu1  ;;  %v7320_v38 = vld [vmem:[#allocation42_spill] sm:$0xff] }
 0x322   : > { %v3466_v30 = vmax.f32 %v3434_v0, 0.0 }
 0x323   : > { %v3252_v45 = vpop.f32.mrf.mxu3 }
 0x324   : > { %v3491_v31 = vpack.c.bf16 %v3466_v30, %v3465_v46  ;;  %v3342_v51 = vadd.f32 %v3341_v11, %v3252_v45  ;;  %v3353_v61 = vpop.f32.mrf.mxu0  ;;  %v7315_v30 = vld [vmem:[#allocation106_spill] sm:$0xff] }
 0x325   : > { %v3072_v45 = vadd.f32 %v7315_v30, %v2983_v8 }
 0x326   : > { %4501 = vmatmul.msk.bf16.gmra.mxu1 %vm435_vm0, %v3491_v31  ;;  %4517 = vmatmul.msk.bf16.gmra.mxu2 %vm435_vm0, %v3491_v31  ;;  %v3400_v58 = vadd.f32 %v3342_v51, %v3065_v60  ;;  %v3509_v51 = vld [vmem:[%s7086_s7] sm:$0x3] }
 0x328   : > { %v3435_v10 = vadd.f32 %v6553_v35, %v3400_v58  ;;  %v6733_v58 = vperm.slane %v3509_v51, 0 }
 0x32a   : > { %v3467_v18 = vmax.f32 %v3435_v10, 0.0 }
 0x32b   : > { %v3254_v20 = vpop.f32.mrf.mxu3 }
 0x32c   : > { %v3344_v53 = vadd.f32 %v3343_v52, %v3254_v20  ;;  %v6718_v52 = vpop.f32.mrf.mxu2  ;;  %v3356_v59 = vpop.f32.mrf.mxu0 }
 0x32e   : > { %v3401_v11 = vadd.f32 %v3344_v53, %v3067_v54 }
 0x330   : > { %v3436_v55 = vadd.f32 %v6553_v35, %v3401_v11  ;;  %v7316_v11 = vld [vmem:[#allocation92_spill] sm:$0xff] }
 0x332   : > { %v3468_v6 = vmax.f32 %v3436_v55, 0.0  ;;  %v7317_v55 = vld [vmem:[#allocation81_spill] sm:$0xff] }
 0x333   : > { %v3257_v49 = vpop.f32.mrf.mxu3 }
 0x334   : > { %v3492_v24 = vpack.c.bf16 %v3468_v6, %v3467_v18  ;;  %v3347_v62 = vadd.f32 %v3346_v47, %v3257_v49  ;;  %v6731_v60 = vpop.f32.mrf.mxu2  ;;  %v2824_v18 = vadd.f32 %v7317_v55, %v7316_v11  ;;  %v6745_v49 = vperm.slane %v3509_v51, 1  ;;  %v3358_v36 = vpop.f32.mrf.mxu0 }
 0x336   : > { %4502 = vmatmul.msk.bf16.gmra.mxu1 %vm435_vm0, %v3492_v24  ;;  %4518 = vmatmul.msk.bf16.gmra.mxu2 %vm435_vm0, %v3492_v24  ;;  %v3402_v0 = vadd.f32 %v3347_v62, %v3070_v32  ;;  %v7318_v24 = vld [vmem:[#allocation107_spill] sm:$0xff]  ;;  %v2988_v62 = vadd.f32 %v6559_v1, %v2824_v18 }
 0x337   : > { %v3075_v50 = vadd.f32 %v6562_v28, %v7318_v24 }
 0x338   : > { %v3437_v47 = vadd.f32 %v6553_v35, %v3402_v0  ;;  %v3077_v28 = vadd.f32 %v6578_v25, %v2988_v62 }
 0x33a   : > { %v3469_v57 = vmax.f32 %v3437_v47, 0.0 }
 0x33b   : > { %v3259_v46 = vpop.f32.mrf.mxu3 }
 0x33c   : > { %v3349_v31 = vadd.f32 %v3348_v29, %v3259_v46  ;;  %v751_v29 = vld [vmem:[%s7082_s3] sm:$0x3]  ;;  %v3361_v11 = vpop.f32.mrf.mxu0 }
 0x33d   : > { %v6738_v10 = vperm.slane %v751_v29, 0  ;;  %v6751_v12 = vperm.slane %v751_v29, 1 }
 0x33e   : > { %v3403_v9 = vadd.f32 %v3349_v31, %v3072_v45 }
 0x33f   : > { %v758_v8 = vadd.f32 %v6751_v12, %v7320_v38 }
 0x340   : > { %v3438_v40 = vadd.f32 %v6553_v35, %v3403_v9 }
 0x342   : > { %v3470_v3 = vmax.f32 %v3438_v40, 0.0 }
 0x343   : > { %v3262_v20 = vpop.f32.mrf.mxu3  ;;  %v3612_v15 = vpop.f32.mrf.mxu1 }
 0x344   : > { %v3493_v54 = vpack.c.bf16 %v3470_v3, %v3469_v57  ;;  %v3352_v53 = vadd.f32 %v3351_v17, %v3262_v20  ;;  %v3613_v6 = vadd.f32 %v3612_v15, %v6733_v58  ;;  %v757_v17 = vadd.f32 %v6738_v10, %v7319_v39  ;;  %v7321_v3 = vld [vmem:[#allocation7_spill] sm:$0xff] }
 0x345   : > { %v759_v29 = vadd.f32 %v6738_v10, %v7321_v3 }
 0x346   : > { %4503 = vmatmul.msk.bf16.gmra.mxu1 %vm435_vm0, %v3493_v54  ;;  %4519 = vmatmul.msk.bf16.gmra.mxu2 %vm435_vm0, %v3493_v54  ;;  %v3404_v63 = vadd.f32 %v3352_v53, %v3075_v50  ;;  %v3781_v0 = vadd.f32 %v3613_v6, %v757_v17  ;;  %v7322_v54 = vld [vmem:[#allocation44_spill] sm:$0xff] }
 0x347   : > { %v760_v25 = vadd.f32 %v6751_v12, %v7322_v54 }
 0x348   : > { %v3439_v1 = vadd.f32 %v6553_v35, %v3404_v63  ;;  %v3845_v9 = vmax.f32 %v3781_v0, 0.0  ;;  %v7323_v63 = vld [vmem:[#allocation94_spill] sm:$0xff] }
 0x349   : > { %v3701_v32 = vpop.f32.mrf.mxu2 }
 0x34a   : > { %v3702_v46 = vadd.f32 %v3701_v32, %v6745_v49  ;;  %v3471_v55 = vmax.f32 %v3439_v1, 0.0  ;;  %v7324_v32 = vld [vmem:[#allocation85_spill] sm:$0xff] }
 0x34b   : > { %v3264_v30 = vpop.f32.mrf.mxu3  ;;  %v3614_v45 = vpop.f32.mrf.mxu1  ;;  %v2829_v38 = vadd.f32 %v7324_v32, %v7323_v63 }
 0x34c   : > { %v3782_v31 = vadd.f32 %v3702_v46, %v758_v8  ;;  %v3354_v47 = vadd.f32 %v3353_v61, %v3264_v30  ;;  %v3615_v57 = vadd.f32 %v3614_v45, %v6733_v58  ;;  %v3080_v30 = vadd.f32 %v6589_v23, %v6568_v4  ;;  %v7325_v45 = vld [vmem:[#allocation9_spill] sm:$0xff]  ;;  %v3363_v23 = vpop.f32.mrf.mxu0 }
 0x34e   : > { %v3846_v51 = vmax.f32 %v3782_v31, 0.0  ;;  %v3405_v40 = vadd.f32 %v3354_v47, %v3077_v28  ;;  %v3783_v18 = vadd.f32 %v3615_v57, %v759_v29  ;;  %v761_v28 = vadd.f32 %v6738_v10, %v7325_v45  ;;  %v7330_v45 = vld [vmem:[#allocation88_spill] sm:$0xff] }
 0x34f   : > { %v2993_v31 = vadd.f32 %v6582_v27, %v2829_v38 }
 0x350   : > { %v3909_v20 = vpack.c.bf16 %v3846_v51, %v3845_v9  ;;  %v3440_v15 = vadd.f32 %v6553_v35, %v3405_v40  ;;  %v3847_v8 = vmax.f32 %v3783_v18, 0.0  ;;  %v7326_v9 = vld [vmem:[#allocation46_spill] sm:$0xff] }
 0x351   : > { %v3703_v53 = vpop.f32.mrf.mxu2  ;;  %v762_v51 = vadd.f32 %v6751_v12, %v7326_v9  ;;  %v3082_v4 = vadd.f32 %v6608_v42, %v2993_v31  ;;  %v3085_v9 = vadd.f32 %v6622_v37, %v6593_v48 }
 0x352   : > { %3941 = vst [vmem:[%s6768_s23] sm:$0xff] %v3909_v20  ;;  %v3472_v61 = vmax.f32 %v3440_v15, 0.0  ;;  %v3704_v6 = vadd.f32 %v3703_v53, %v6745_v49 }
 0x353   : > { %v3267_v24 = vpop.f32.mrf.mxu3  ;;  %v3617_v50 = vpop.f32.mrf.mxu1 }
 0x354   : > { %v3494_v39 = vpack.c.bf16 %v3472_v61, %v3471_v55  ;;  %v3784_v17 = vadd.f32 %v3704_v6, %v760_v25  ;;  %v3357_v62 = vadd.f32 %v3356_v59, %v3267_v24  ;;  %v3618_v46 = vadd.f32 %v3617_v50, %v6733_v58  ;;  %v7327_v61 = vld [vmem:[#allocation11_spill] sm:$0xff]  ;;  %v7328_v50 = vld [vmem:[#allocation48_spill] sm:$0xff]  ;;  %v3366_v31 = vpop.f32.mrf.mxu0 }
 0x355   : > { %v763_v18 = vadd.f32 %v6738_v10, %v7327_v61 }
 0x356   : > { %v3848_v0 = vmax.f32 %v3784_v17, 0.0  ;;  %4504 = vmatmul.msk.bf16.gmra.mxu1 %vm435_vm0, %v3494_v39  ;;  %4520 = vmatmul.msk.bf16.gmra.mxu2 %vm435_vm0, %v3494_v39  ;;  %v3406_v47 = vadd.f32 %v3357_v62, %v3080_v30  ;;  %v3785_v40 = vadd.f32 %v3618_v46, %v761_v28  ;;  %v764_v39 = vadd.f32 %v6751_v12, %v7328_v50  ;;  %v7329_v30 = vld [vmem:[#allocation95_spill] sm:$0xff] }
 0x357   : > { %v2834_v28 = vadd.f32 %v7330_v45, %v7329_v30 }
 0x358   : > { %v3910_v59 = vpack.c.bf16 %v3848_v0, %v3847_v8  ;;  %v3441_v27 = vadd.f32 %v6553_v35, %v3406_v47  ;;  %v3849_v54 = vmax.f32 %v3785_v40, 0.0 }
 0x359   : > { %v3706_v1 = vpop.f32.mrf.mxu2 }
 0x35a   : > { %3942 = vst [vmem:[%s6768_s23 + $0x8] sm:$0xff] %v3910_v59  ;;  %v3707_v57 = vadd.f32 %v3706_v1, %v6745_v49  ;;  %v3473_v17 = vmax.f32 %v3441_v27, 0.0 }
 0x35b   : > { %v3269_v3 = vpop.f32.mrf.mxu3  ;;  %v3619_v29 = vpop.f32.mrf.mxu1 }
 0x35c   : > { %v3786_v20 = vadd.f32 %v3707_v57, %v762_v51  ;;  %v3359_v15 = vadd.f32 %v3358_v36, %v3269_v3  ;;  %v3620_v55 = vadd.f32 %v3619_v29, %v6733_v58  ;;  %v7331_v51 = vld [vmem:[#allocation13_spill] sm:$0xff] }
 0x35d   : > { %v765_v40 = vadd.f32 %v6738_v10, %v7331_v51 }
 0x35e   : > { %v3850_v25 = vmax.f32 %v3786_v20, 0.0  ;;  %v3407_v53 = vadd.f32 %v3359_v15, %v3082_v4  ;;  %v3787_v62 = vadd.f32 %v3620_v55, %v763_v18  ;;  %v7332_v4 = vld [vmem:[#allocation49_spill] sm:$0xff] }
 0x35f   : > { %v766_v20 = vadd.f32 %v6751_v12, %v7332_v4 }
 0x360   : > { %v3911_v6 = vpack.c.bf16 %v3850_v25, %v3849_v54  ;;  %v3442_v24 = vadd.f32 %v6553_v35, %v3407_v53  ;;  %v3851_v59 = vmax.f32 %v3787_v62, 0.0 }
 0x361   : > { %v3708_v42 = vpop.f32.mrf.mxu2 }
 0x362   : > { %3943 = vst [vmem:[%s6768_s23 + $0x10] sm:$0xff] %v3911_v6  ;;  %v3474_v36 = vmax.f32 %v3442_v24, 0.0  ;;  %v3709_v63 = vadd.f32 %v3708_v42, %v6745_v49  ;;  %v7333_v24 = vld [vmem:[#allocation15_spill] sm:$0xff] }
 0x363   : > { %v3272_v32 = vpop.f32.mrf.mxu3  ;;  %v3622_v38 = vpop.f32.mrf.mxu1  ;;  %v767_v50 = vadd.f32 %v6738_v10, %v7333_v24 }
 0x364   : > { %v3495_v8 = vpack.c.bf16 %v3474_v36, %v3473_v17  ;;  %v3788_v0 = vadd.f32 %v3709_v63, %v764_v39  ;;  %v3362_v46 = vadd.f32 %v3361_v11, %v3272_v32  ;;  %v3623_v1 = vadd.f32 %v3622_v38, %v6733_v58  ;;  %v3368_v39 = vpop.f32.mrf.mxu0  ;;  %v7334_v36 = vld [vmem:[#allocation50_spill] sm:$0xff] }
 0x365   : > { %v2998_v11 = vadd.f32 %v6606_v33, %v2834_v28  ;;  %v768_v62 = vadd.f32 %v6751_v12, %v7334_v36  ;;  %v7335_v28 = vld [vmem:[#allocation97_spill] sm:$0xff] }
 0x366   : > { %v3852_v47 = vmax.f32 %v3788_v0, 0.0  ;;  %4505 = vmatmul.msk.bf16.gmra.mxu1 %vm435_vm0, %v3495_v8  ;;  %4521 = vmatmul.msk.bf16.gmra.mxu2 %vm435_vm0, %v3495_v8  ;;  %v3408_v3 = vadd.f32 %v3362_v46, %v3085_v9  ;;  %v3789_v15 = vadd.f32 %v3623_v1, %v765_v40  ;;  %v3090_v40 = vadd.f32 %v6650_v41, %v6617_v14 }
 0x367   : > { %v3087_v48 = vadd.f32 %v6636_v7, %v2998_v11  ;;  %v7337_v11 = vld [vmem:[#allocation17_spill] sm:$0xff] }
 0x368   : > { %v3912_v57 = vpack.c.bf16 %v3852_v47, %v3851_v59  ;;  %v3443_v55 = vadd.f32 %v6553_v35, %v3408_v3  ;;  %v3853_v33 = vmax.f32 %v3789_v15, 0.0  ;;  %v7336_v59 = vld [vmem:[#allocation89_spill] sm:$0xff] }
 0x369   : > { %v3711_v29 = vpop.f32.mrf.mxu2  ;;  %v2839_v47 = vadd.f32 %v7336_v59, %v7335_v28 }
 0x36a   : > { %3944 = vst [vmem:[%s6768_s23 + $0x18] sm:$0xff] %v3912_v57  ;;  %v3712_v27 = vadd.f32 %v3711_v29, %v6745_v49  ;;  %v3475_v63 = vmax.f32 %v3443_v55, 0.0  ;;  %v769_v57 = vadd.f32 %v6738_v10, %v7337_v11 }
 0x36b   : > { %v3274_v54 = vpop.f32.mrf.mxu3  ;;  %v3624_v25 = vpop.f32.mrf.mxu1  ;;  %v3003_v3 = vadd.f32 %v6629_v43, %v2839_v47 }
 0x36c   : > { %v3790_v37 = vadd.f32 %v3712_v27, %v766_v20  ;;  %v3364_v53 = vadd.f32 %v3363_v23, %v3274_v54  ;;  %v3625_v6 = vadd.f32 %v3624_v25, %v6733_v58  ;;  %v7338_v20 = vld [vmem:[#allocation51_spill] sm:$0xff]  ;;  %v3371_v27 = vpop.f32.mrf.mxu0 }
 0x36d   : > { %v770_v15 = vadd.f32 %v6751_v12, %v7338_v20  ;;  %v3092_v14 = vadd.f32 %v6661_v16, %v3003_v3 }
 0x36e   : > { %v3854_v61 = vmax.f32 %v3790_v37, 0.0  ;;  %v3409_v18 = vadd.f32 %v3364_v53, %v3087_v48  ;;  %v3791_v32 = vadd.f32 %v3625_v6, %v767_v50  ;;  %v7339_v6 = vld [vmem:[#allocation19_spill] sm:$0xff] }
 0x36f   : > { %v771_v24 = vadd.f32 %v6738_v10, %v7339_v6 }
 0x370   : > { %v3913_v42 = vpack.c.bf16 %v3854_v61, %v3853_v33  ;;  %v3444_v17 = vadd.f32 %v6553_v35, %v3409_v18  ;;  %v3855_v1 = vmax.f32 %v3791_v32, 0.0 }
 0x371   : > { %v3713_v7 = vpop.f32.mrf.mxu2 }
 0x372   : > { %3945 = vst [vmem:[%s6768_s23 + $0x20] sm:$0xff] %v3913_v42  ;;  %v3476_v23 = vmax.f32 %v3444_v17, 0.0  ;;  %v3714_v38 = vadd.f32 %v3713_v7, %v6745_v49  ;;  %v7340_v17 = vld [vmem:[#allocation52_spill] sm:$0xff] }
 0x373   : > { %v3277_v8 = vpop.f32.mrf.mxu3  ;;  %v3627_v0 = vpop.f32.mrf.mxu1  ;;  %v772_v36 = vadd.f32 %v6751_v12, %v7340_v17 }
 0x374   : > { %v3496_v46 = vpack.c.bf16 %v3476_v23, %v3475_v63  ;;  %v3792_v30 = vadd.f32 %v3714_v38, %v768_v62  ;;  %v3367_v45 = vadd.f32 %v3366_v31, %v3277_v8  ;;  %v3628_v51 = vadd.f32 %v3627_v0, %v6733_v58  ;;  %v3373_v38 = vpop.f32.mrf.mxu0 }
 0x376   : > { %v3856_v9 = vmax.f32 %v3792_v30, 0.0  ;;  %4506 = vmatmul.msk.bf16.gmra.mxu1 %vm435_vm0, %v3496_v46  ;;  %4522 = vmatmul.msk.bf16.gmra.mxu2 %vm435_vm0, %v3496_v46  ;;  %v3410_v29 = vadd.f32 %v3367_v45, %v3090_v40  ;;  %v3793_v54 = vadd.f32 %v3628_v51, %v769_v57  ;;  %v7341_v30 = vld [vmem:[#allocation56_spill] sm:$0xff]  ;;  %v7342_v45 = vld [vmem:[#allocation91_spill] sm:$0xff]  ;;  %v7343_v51 = vld [vmem:[#allocation21_spill] sm:$0xff] }
 0x377   : > { %v2844_v28 = vadd.f32 %v7342_v45, %v7341_v30  ;;  %v773_v40 = vadd.f32 %v6738_v10, %v7343_v51  ;;  %v7349_v30 = vld [vmem:[#allocation25_spill] sm:$0xff] }
 0x378   : > { %v3914_v31 = vpack.c.bf16 %v3856_v9, %v3855_v1  ;;  %v3445_v43 = vadd.f32 %v6553_v35, %v3410_v29  ;;  %v3857_v55 = vmax.f32 %v3793_v54, 0.0  ;;  %v3095_v9 = vadd.f32 %v6678_v44, %v6640_v13  ;;  %v7344_v29 = vld [vmem:[#allocation53_spill] sm:$0xff] }
 0x379   : > { %v3716_v4 = vpop.f32.mrf.mxu2  ;;  %v3008_v11 = vadd.f32 %v6654_v21, %v2844_v28  ;;  %v777_v45 = vadd.f32 %v6738_v10, %v7349_v30  ;;  %v7350_v51 = vld [vmem:[#allocation57_spill] sm:$0xff] }
 0x37a   : > { %3946 = vst [vmem:[%s6768_s23 + $0x28] sm:$0xff] %v3914_v31  ;;  %v3717_v25 = vadd.f32 %v3716_v4, %v6745_v49  ;;  %v3477_v16 = vmax.f32 %v3445_v43, 0.0  ;;  %v774_v4 = vadd.f32 %v6751_v12, %v7344_v29  ;;  %v7345_v43 = vld [vmem:[#allocation23_spill] sm:$0xff] }
 0x37b   : > { %v3279_v48 = vpop.f32.mrf.mxu3  ;;  %v3629_v37 = vpop.f32.mrf.mxu1  ;;  %v3097_v13 = vadd.f32 %v6694_v26, %v3008_v11 }
 0x37c   : > { %v3794_v41 = vadd.f32 %v3717_v25, %v770_v15  ;;  %v3369_v53 = vadd.f32 %v3368_v39, %v3279_v48  ;;  %v3630_v18 = vadd.f32 %v3629_v37, %v6733_v58  ;;  %v3376_v21 = vpop.f32.mrf.mxu0 }
 0x37e   : > { %v3858_v33 = vmax.f32 %v3794_v41, 0.0  ;;  %v3411_v61 = vadd.f32 %v3369_v53, %v3092_v14  ;;  %v3795_v7 = vadd.f32 %v3630_v18, %v771_v24  ;;  %v7346_v18 = vld [vmem:[#allocation54_spill] sm:$0xff] }
 0x37f   : > { %v776_v6 = vadd.f32 %v6751_v12, %v7346_v18 }
 0x380   : > { %v3915_v50 = vpack.c.bf16 %v3858_v33, %v3857_v55  ;;  %v3446_v42 = vadd.f32 %v6553_v35, %v3411_v61  ;;  %v3859_v59 = vmax.f32 %v3795_v7, 0.0  ;;  %v775_v55 = vadd.f32 %v6738_v10, %v7345_v43 }
 0x381   : > { %v3718_v62 = vpop.f32.mrf.mxu2 }
 0x382   : > { %3947 = vst [vmem:[%s6768_s23 + $0x30] sm:$0xff] %v3915_v50  ;;  %v3478_v39 = vmax.f32 %v3446_v42, 0.0  ;;  %v3719_v63 = vadd.f32 %v3718_v62, %v6745_v49 }
 0x383   : > { %v3282_v23 = vpop.f32.mrf.mxu3  ;;  %v3632_v32 = vpop.f32.mrf.mxu1 }
 0x384   : > { %v3497_v8 = vpack.c.bf16 %v3478_v39, %v3477_v16  ;;  %v3796_v0 = vadd.f32 %v3719_v63, %v772_v36  ;;  %v3372_v46 = vadd.f32 %v3371_v27, %v3282_v23  ;;  %v3633_v1 = vadd.f32 %v3632_v32, %v6733_v58  ;;  %v7347_v63 = vld [vmem:[#allocation99_spill] sm:$0xff]  ;;  %v7348_v23 = vld [vmem:[#allocation93_spill] sm:$0xff] }
 0x385   : > { %v2849_v32 = vadd.f32 %v7348_v23, %v7347_v63 }
 0x386   : > { %v3860_v47 = vmax.f32 %v3796_v0, 0.0  ;;  %4507 = vmatmul.msk.bf16.gmra.mxu1 %vm435_vm0, %v3497_v8  ;;  %4523 = vmatmul.msk.bf16.gmra.mxu2 %vm435_vm0, %v3497_v8  ;;  %v3412_v3 = vadd.f32 %v3372_v46, %v3095_v9  ;;  %v3797_v20 = vadd.f32 %v3633_v1, %v773_v40  ;;  %v3100_v46 = vadd.f32 %v6700_v56, %v6663_v19 }
 0x387   : > { %v3013_v28 = vadd.f32 %v6675_v22, %v2849_v32  ;;  %v778_v40 = vadd.f32 %v6751_v12, %v7350_v51 }
 0x388   : > { %v3916_v57 = vpack.c.bf16 %v3860_v47, %v3859_v59  ;;  %v3447_v48 = vadd.f32 %v6553_v35, %v3412_v3  ;;  %v3861_v37 = vmax.f32 %v3797_v20, 0.0  ;;  %v3378_v59 = vpop.f32.mrf.mxu0 }
 0x389   : > { %v3721_v31 = vpop.f32.mrf.mxu2  ;;  %v3102_v19 = vadd.f32 %v6710_v2, %v3013_v28 }
 0x38a   : > { %3948 = vst [vmem:[%s6768_s23 + $0x38] sm:$0xff] %v3916_v57  ;;  %v3722_v15 = vadd.f32 %v3721_v31, %v6745_v49  ;;  %v3479_v24 = vmax.f32 %v3447_v48, 0.0 }
 0x38b   : > { %v3284_v27 = vpop.f32.mrf.mxu3  ;;  %v3634_v54 = vpop.f32.mrf.mxu1 }
 0x38c   : > { %v3798_v44 = vadd.f32 %v3722_v15, %v774_v4  ;;  %v3374_v25 = vadd.f32 %v3373_v38, %v3284_v27  ;;  %v3635_v53 = vadd.f32 %v3634_v54, %v6733_v58  ;;  %v7351_v54 = vld [vmem:[#allocation27_spill] sm:$0xff] }
 0x38e   : > { %v3862_v14 = vmax.f32 %v3798_v44, 0.0  ;;  %v3413_v41 = vadd.f32 %v3374_v25, %v3097_v13  ;;  %v3799_v42 = vadd.f32 %v3635_v53, %v775_v55  ;;  %v779_v13 = vadd.f32 %v6738_v10, %v7351_v54 }
 0x390   : > { %v3917_v33 = vpack.c.bf16 %v3862_v14, %v3861_v37  ;;  %v3448_v61 = vadd.f32 %v6553_v35, %v3413_v41  ;;  %v3863_v38 = vmax.f32 %v3799_v42, 0.0  ;;  %v3381_v48 = vpop.f32.mrf.mxu0 }
 0x391   : > { %v3723_v26 = vpop.f32.mrf.mxu2 }
 0x392   : > { %3949 = vst [vmem:[%s6768_s23 + $0x40] sm:$0xff] %v3917_v33  ;;  %v3480_v50 = vmax.f32 %v3448_v61, 0.0  ;;  %v3724_v17 = vadd.f32 %v3723_v26, %v6745_v49  ;;  %v7353_v26 = vld [vmem:[#allocation104_spill] sm:$0xff] }
 0x393   : > { %v3287_v36 = vpop.f32.mrf.mxu3  ;;  %v3637_v62 = vpop.f32.mrf.mxu1 }
 0x394   : > { %v3498_v16 = vpack.c.bf16 %v3480_v50, %v3479_v24  ;;  %v3800_v39 = vadd.f32 %v3724_v17, %v776_v6  ;;  %v3377_v7 = vadd.f32 %v3376_v21, %v3287_v36  ;;  %v3638_v0 = vadd.f32 %v3637_v62, %v6733_v58  ;;  %v7352_v21 = vld [vmem:[#allocation59_spill] sm:$0xff]  ;;  %v7354_v24 = vld [vmem:[#allocation96_spill] sm:$0xff] }
 0x395   : > { %v780_v37 = vadd.f32 %v6751_v12, %v7352_v21  ;;  %v2854_v50 = vadd.f32 %v7354_v24, %v7353_v26  ;;  %v3105_v62 = vadd.f32 %v6718_v52, %v6684_v34 }
 0x396   : > { %v3864_v8 = vmax.f32 %v3800_v39, 0.0  ;;  %4508 = vmatmul.msk.bf16.gmra.mxu1 %vm435_vm0, %v3498_v16  ;;  %4524 = vmatmul.msk.bf16.gmra.mxu2 %vm435_vm0, %v3498_v16  ;;  %v3414_v1 = vadd.f32 %v3377_v7, %v3100_v46  ;;  %v3801_v11 = vadd.f32 %v3638_v0, %v777_v45  ;;  %v7355_v16 = vld [vmem:[#allocation29_spill] sm:$0xff] }
 0x397   : > { %v781_v39 = vadd.f32 %v6738_v10, %v7355_v16  ;;  %v3018_v7 = vadd.f32 %v6723_v5, %v2854_v50  ;;  %v7362_v50 = vld [vmem:[#allocation71_spill] sm:$0xff] }
 0x398   : > { %v3918_v47 = vpack.c.bf16 %v3864_v8, %v3863_v38  ;;  %v3449_v22 = vadd.f32 %v6553_v35, %v3414_v1  ;;  %v3865_v4 = vmax.f32 %v3801_v11, 0.0  ;;  %v7356_v38 = vld [vmem:[#allocation63_spill] sm:$0xff]  ;;  %v3383_v0 = vpop.f32.mrf.mxu0 }
 0x399   : > { %v3726_v9 = vpop.f32.mrf.mxu2  ;;  %v782_v8 = vadd.f32 %v6751_v12, %v7356_v38  ;;  %v3107_v34 = vadd.f32 %v6731_v60, %v3018_v7 }
 0x39a   : > { %3950 = vst [vmem:[%s6768_s23 + $0x48] sm:$0xff] %v3918_v47  ;;  %v3727_v57 = vadd.f32 %v3726_v9, %v6745_v49  ;;  %v3481_v14 = vmax.f32 %v3449_v22, 0.0 }
 0x39b   : > { %v3289_v3 = vpop.f32.mrf.mxu3  ;;  %v3639_v31 = vpop.f32.mrf.mxu1 }
 0x39c   : > { %v3802_v56 = vadd.f32 %v3727_v57, %v778_v40  ;;  %v3379_v29 = vadd.f32 %v3378_v59, %v3289_v3  ;;  %v3640_v27 = vadd.f32 %v3639_v31, %v6733_v58  ;;  %v7357_v40 = vld [vmem:[#allocation31_spill] sm:$0xff]  ;;  %v7358_v31 = vld [vmem:[#allocation65_spill] sm:$0xff] }
 0x39d   : > { %v783_v11 = vadd.f32 %v6738_v10, %v7357_v40  ;;  %v7366_v40 = vld [vmem:[#allocation77_spill] sm:$0xff] }
 0x39e   : > { %v3866_v20 = vmax.f32 %v3802_v56, 0.0  ;;  %v3415_v15 = vadd.f32 %v3379_v29, %v3102_v19  ;;  %v3803_v53 = vadd.f32 %v3640_v27, %v779_v13  ;;  %v784_v19 = vadd.f32 %v6751_v12, %v7358_v31 }
 0x3a0   : > { %v3919_v44 = vpack.c.bf16 %v3866_v20, %v3865_v4  ;;  %v3450_v25 = vadd.f32 %v6553_v35, %v3415_v15  ;;  %v3867_v42 = vmax.f32 %v3803_v53, 0.0 }
 0x3a1   : > { %v3728_v2 = vpop.f32.mrf.mxu2 }
 0x3a2   : > { %3951 = vst [vmem:[%s6768_s23 + $0x50] sm:$0xff] %v3919_v44  ;;  %v3482_v41 = vmax.f32 %v3450_v25, 0.0  ;;  %v3729_v43 = vadd.f32 %v3728_v2, %v6745_v49 }
 0x3a3   : > { %v3292_v55 = vpop.f32.mrf.mxu3  ;;  %v3642_v33 = vpop.f32.mrf.mxu1 }
 0x3a4   : > { %v3499_v61 = vpack.c.bf16 %v3482_v41, %v3481_v14  ;;  %v3804_v18 = vadd.f32 %v3729_v43, %v780_v37  ;;  %v3382_v6 = vadd.f32 %v3381_v48, %v3292_v55  ;;  %v3643_v36 = vadd.f32 %v3642_v33, %v6733_v58  ;;  %v7360_v37 = vld [vmem:[#allocation68_spill] sm:$0xff] }
 0x3a5   : > { %v786_v2 = vadd.f32 %v6751_v12, %v7360_v37 }
 0x3a6   : > { %v3868_v17 = vmax.f32 %v3804_v18, 0.0  ;;  %4509 = vmatmul.msk.bf16.gmra.mxu1 %vm435_vm0, %v3499_v61  ;;  %4525 = vmatmul.msk.bf16.gmra.mxu2 %vm435_vm0, %v3499_v61  ;;  %v3416_v23 = vadd.f32 %v3382_v6, %v3105_v62  ;;  %v3805_v46 = vadd.f32 %v3643_v36, %v781_v39  ;;  %v7361_v18 = vld [vmem:[#allocation35_spill] sm:$0xff] }
 0x3a7   : > { %v787_v6 = vadd.f32 %v6738_v10, %v7361_v18 }
 0x3a8   : > { %v3920_v63 = vpack.c.bf16 %v3868_v17, %v3867_v42  ;;  %v3451_v5 = vadd.f32 %v6553_v35, %v3416_v23  ;;  %v3869_v47 = vmax.f32 %v3805_v46, 0.0  ;;  %v788_v42 = vadd.f32 %v6751_v12, %v7362_v50  ;;  %v7363_v23 = vld [vmem:[#allocation37_spill] sm:$0xff] }
 0x3a9   : > { %v3731_v32 = vpop.f32.mrf.mxu2 }
 0x3aa   : > { %3952 = vst [vmem:[%s6768_s23 + $0x58] sm:$0xff] %v3920_v63  ;;  %v3732_v30 = vadd.f32 %v3731_v32, %v6745_v49  ;;  %v3483_v60 = vmax.f32 %v3451_v5, 0.0  ;;  %v789_v32 = vadd.f32 %v6738_v10, %v7363_v23 }
 0x3ab   : > { %v3294_v45 = vpop.f32.mrf.mxu3  ;;  %v3644_v28 = vpop.f32.mrf.mxu1 }
 0x3ac   : > { %v3806_v52 = vadd.f32 %v3732_v30, %v782_v8  ;;  %v3384_v59 = vadd.f32 %v3383_v0, %v3294_v45  ;;  %v3645_v51 = vadd.f32 %v3644_v28, %v6733_v58  ;;  %v7364_v0 = vld [vmem:[#allocation74_spill] sm:$0xff] }
 0x3ad   : > { %v790_v46 = vadd.f32 %v6751_v12, %v7364_v0 }
 0x3ae   : > { %v3870_v1 = vmax.f32 %v3806_v52, 0.0  ;;  %v3417_v9 = vadd.f32 %v3384_v59, %v3107_v34  ;;  %v3807_v22 = vadd.f32 %v3645_v51, %v783_v11  ;;  %v792_v11 = vadd.f32 %v6751_v12, %v7366_v40 }
 0x3b0   : > { %v3921_v57 = vpack.c.bf16 %v3870_v1, %v3869_v47  ;;  %v3452_v3 = vadd.f32 %v6553_v35, %v3417_v9  ;;  %v3871_v54 = vmax.f32 %v3807_v22, 0.0  ;;  %v7359_v35 = vld [vmem:[#allocation33_spill] sm:$0xff]  ;;  %v7365_v47 = vld [vmem:[#allocation38_spill] sm:$0xff]  ;;  %v7367_v22 = vld [vmem:[#allocation39_spill] sm:$0xff] }
 0x3b1   : > { %v3733_v56 = vpop.f32.mrf.mxu2  ;;  %v785_v25 = vadd.f32 %v6738_v10, %v7359_v35  ;;  %v791_v1 = vadd.f32 %v6738_v10, %v7365_v47 }
 0x3b2   : > { %3953 = vst [vmem:[%s6768_s23 + $0x60] sm:$0xff] %v3921_v57  ;;  %v3484_v29 = vmax.f32 %v3452_v3, 0.0  ;;  %v3734_v4 = vadd.f32 %v3733_v56, %v6745_v49 }
 0x3b3   : > { %v3647_v20 = vpop.f32.mrf.mxu1 }
 0x3b4   : > { %v3500_v15 = vpack.c.bf16 %v3484_v29, %v3483_v60  ;;  %v3808_v27 = vadd.f32 %v3734_v4, %v784_v19  ;;  %v3648_v44 = vadd.f32 %v3647_v20, %v6733_v58  ;;  %v793_v4 = vadd.f32 %v6738_v10, %v7367_v22 }
 0x3b6   : > { %v3872_v13 = vmax.f32 %v3808_v27, 0.0  ;;  %4510 = vmatmul.msk.bf16.gmra.mxu1 %vm435_vm0, %v3500_v15  ;;  %4526 = vmatmul.msk.bf16.gmra.mxu2 %vm435_vm0, %v3500_v15  ;;  %v3809_v14 = vadd.f32 %v3648_v44, %v785_v25  ;;  %v7368_v27 = vld [vmem:[#allocation78_spill] sm:$0xff] }
 0x3b8   : > { %v3922_v48 = vpack.c.bf16 %v3872_v13, %v3871_v54  ;;  %v3873_v55 = vmax.f32 %v3809_v14, 0.0  ;;  %v794_v54 = vadd.f32 %v6751_v12, %v7368_v27 }
 0x3b9   : > { %v3736_v21 = vpop.f32.mrf.mxu2 }
 0x3ba   : > { %3954 = vst [vmem:[%s6768_s23 + $0x68] sm:$0xff] %v3922_v48  ;;  %v3737_v41 = vadd.f32 %v3736_v21, %v6745_v49 }
 0x3bb   : > { %v3649_v53 = vpop.f32.mrf.mxu1 }
 0x3bc   : > { %v3810_v43 = vadd.f32 %v3737_v41, %v786_v2  ;;  %v3650_v61 = vadd.f32 %v3649_v53, %v6733_v58  ;;  %v7369_v2 = vld [vmem:[#allocation40_spill] sm:$0xff] }
 0x3bd   : > { %v795_v14 = vadd.f32 %v6738_v10, %v7369_v2 }
 0x3be   : > { %v3874_v33 = vmax.f32 %v3810_v43, 0.0  ;;  %v3811_v17 = vadd.f32 %v3650_v61, %v787_v6  ;;  %v7370_v43 = vld [vmem:[#allocation80_spill] sm:$0xff] }
 0x3c0   : > { %v3923_v26 = vpack.c.bf16 %v3874_v33, %v3873_v55  ;;  %v3875_v39 = vmax.f32 %v3811_v17, 0.0  ;;  %v796_v55 = vadd.f32 %v6751_v12, %v7370_v43 }
 0x3c1   : > { %v3738_v24 = vpop.f32.mrf.mxu2 }
 0x3c2   : > { %3955 = vst [vmem:[%s6768_s23 + $0x70] sm:$0xff] %v3923_v26  ;;  %v3739_v36 = vadd.f32 %v3738_v24, %v6745_v49 }
 0x3c3   : > { %v3652_v62 = vpop.f32.mrf.mxu1 }
 0x3c4   : > { %v3812_v16 = vadd.f32 %v3739_v36, %v788_v42  ;;  %v3653_v63 = vadd.f32 %v3652_v62, %v6733_v58  ;;  %v7371_v42 = vld [vmem:[#allocation41_spill] sm:$0xff] }
 0x3c5   : > { %v797_v17 = vadd.f32 %v6738_v10, %v7371_v42 }
 0x3c6   : > { %v3876_v7 = vmax.f32 %v3812_v16, 0.0  ;;  %v3813_v30 = vadd.f32 %v3653_v63, %v789_v32  ;;  %v7372_v16 = vld [vmem:[#allocation83_spill] sm:$0xff] }
 0x3c8   : > { %v3924_v38 = vpack.c.bf16 %v3876_v7, %v3875_v39  ;;  %v3877_v52 = vmax.f32 %v3813_v30, 0.0  ;;  %v798_v39 = vadd.f32 %v6751_v12, %v7372_v16 }
 0x3c9   : > { %v3741_v8 = vpop.f32.mrf.mxu2 }
 0x3ca   : > { %3956 = vst [vmem:[%s6768_s23 + $0x78] sm:$0xff] %v3924_v38  ;;  %v3742_v45 = vadd.f32 %v3741_v8, %v6745_v49 }
 0x3cb   : > { %v3654_v28 = vpop.f32.mrf.mxu1 }
 0x3cc   : > { %v3814_v34 = vadd.f32 %v3742_v45, %v790_v46  ;;  %v3655_v5 = vadd.f32 %v3654_v28, %v6733_v58  ;;  %v7373_v46 = vld [vmem:[#allocation43_spill] sm:$0xff] }
 0x3cd   : > { %v799_v30 = vadd.f32 %v6738_v10, %v7373_v46 }
 0x3ce   : > { %v3878_v59 = vmax.f32 %v3814_v34, 0.0  ;;  %v3815_v57 = vadd.f32 %v3655_v5, %v791_v1  ;;  %v7374_v34 = vld [vmem:[#allocation84_spill] sm:$0xff] }
 0x3d0   : > { %v3925_v9 = vpack.c.bf16 %v3878_v59, %v3877_v52  ;;  %v3879_v56 = vmax.f32 %v3815_v57, 0.0  ;;  %v800_v52 = vadd.f32 %v6751_v12, %v7374_v34 }
 0x3d1   : > { %v3743_v51 = vpop.f32.mrf.mxu2 }
 0x3d2   : > { %3957 = vst [vmem:[%s6768_s23 + $0x80] sm:$0xff] %v3925_v9  ;;  %v3744_v3 = vadd.f32 %v3743_v51, %v6745_v49 }
 0x3d3   : > { %v3657_v31 = vpop.f32.mrf.mxu1 }
 0x3d4   : > { %v3816_v19 = vadd.f32 %v3744_v3, %v792_v11  ;;  %v3658_v29 = vadd.f32 %v3657_v31, %v6733_v58  ;;  %v7375_v11 = vld [vmem:[#allocation45_spill] sm:$0xff] }
 0x3d5   : > { %v801_v57 = vadd.f32 %v6738_v10, %v7375_v11 }
 0x3d6   : > { %v3880_v60 = vmax.f32 %v3816_v19, 0.0  ;;  %v3817_v13 = vadd.f32 %v3658_v29, %v793_v4  ;;  %v7376_v19 = vld [vmem:[#allocation86_spill] sm:$0xff] }
 0x3d8   : > { %v3926_v20 = vpack.c.bf16 %v3880_v60, %v3879_v56  ;;  %v3881_v48 = vmax.f32 %v3817_v13, 0.0  ;;  %v802_v56 = vadd.f32 %v6751_v12, %v7376_v19 }
 0x3d9   : > { %v3746_v15 = vpop.f32.mrf.mxu2 }
 0x3da   : > { %3958 = vst [vmem:[%s6768_s23 + $0x88] sm:$0xff] %v3926_v20  ;;  %v3747_v44 = vadd.f32 %v3746_v15, %v6745_v49 }
 0x3db   : > { %v3659_v35 = vpop.f32.mrf.mxu1 }
 0x3dc   : > { %v3818_v25 = vadd.f32 %v3747_v44, %v794_v54  ;;  %v3660_v37 = vadd.f32 %v3659_v35, %v6733_v58  ;;  %v7377_v54 = vld [vmem:[#allocation47_spill] sm:$0xff] }
 0x3dd   : > { %v803_v13 = vadd.f32 %v6738_v10, %v7377_v54 }
 0x3de   : > { %v3882_v21 = vmax.f32 %v3818_v25, 0.0  ;;  %v3819_v33 = vadd.f32 %v3660_v37, %v795_v14  ;;  %v7378_v25 = vld [vmem:[#allocation87_spill] sm:$0xff] }
 0x3e0   : > { %v3927_v41 = vpack.c.bf16 %v3882_v21, %v3881_v48  ;;  %v3883_v26 = vmax.f32 %v3819_v33, 0.0  ;;  %v804_v48 = vadd.f32 %v6751_v12, %v7378_v25 }
 0x3e1   : > { %v3748_v53 = vpop.f32.mrf.mxu2 }
 0x3e2   : > { %3959 = vst [vmem:[%s6768_s23 + $0x90] sm:$0xff] %v3927_v41  ;;  %v3749_v61 = vadd.f32 %v3748_v53, %v6745_v49 }
 0x3e3   : > { %v3662_v18 = vpop.f32.mrf.mxu1 }
 0x3e4   : > { %v3820_v6 = vadd.f32 %v3749_v61, %v796_v55  ;;  %v3663_v50 = vadd.f32 %v3662_v18, %v6733_v58  ;;  %v7379_v55 = vld [vmem:[#allocation6_spill] sm:$0xff] }
 0x3e5   : > { %v805_v33 = vadd.f32 %v6738_v10, %v7379_v55 }
 0x3e6   : > { %v3884_v24 = vmax.f32 %v3820_v6, 0.0  ;;  %v3821_v7 = vadd.f32 %v3663_v50, %v797_v17  ;;  %v7380_v6 = vld [vmem:[#allocation22_spill] sm:$0xff] }
 0x3e8   : > { %v3928_v36 = vpack.c.bf16 %v3884_v24, %v3883_v26  ;;  %v3885_v38 = vmax.f32 %v3821_v7, 0.0  ;;  %v806_v26 = vadd.f32 %v6751_v12, %v7380_v6 }
 0x3e9   : > { %v3751_v62 = vpop.f32.mrf.mxu2 }
 0x3ea   : > { %3960 = vst [vmem:[%s6768_s23 + $0x98] sm:$0xff] %v3928_v36  ;;  %v3752_v63 = vadd.f32 %v3751_v62, %v6745_v49 }
 0x3eb   : > { %v3664_v23 = vpop.f32.mrf.mxu1 }
 0x3ec   : > { %v3822_v32 = vadd.f32 %v3752_v63, %v798_v39  ;;  %v3665_v0 = vadd.f32 %v3664_v23, %v6733_v58  ;;  %v7381_v39 = vld [vmem:[#allocation8_spill] sm:$0xff] }
 0x3ed   : > { %v807_v7 = vadd.f32 %v6738_v10, %v7381_v39 }
 0x3ee   : > { %v3886_v8 = vmax.f32 %v3822_v32, 0.0  ;;  %v3823_v59 = vadd.f32 %v3665_v0, %v799_v30  ;;  %v7382_v32 = vld [vmem:[#allocation24_spill] sm:$0xff] }
 0x3f0   : > { %v3929_v45 = vpack.c.bf16 %v3886_v8, %v3885_v38  ;;  %v3887_v9 = vmax.f32 %v3823_v59, 0.0  ;;  %v808_v38 = vadd.f32 %v6751_v12, %v7382_v32 }
 0x3f1   : > { %v3753_v28 = vpop.f32.mrf.mxu2 }
 0x3f2   : > { %3961 = vst [vmem:[%s6768_s23 + $0xa0] sm:$0xff] %v3929_v45  ;;  %v3754_v5 = vadd.f32 %v3753_v28, %v6745_v49 }
 0x3f3   : > { %v3667_v47 = vpop.f32.mrf.mxu1 }
 0x3f4   : > { %v3824_v1 = vadd.f32 %v3754_v5, %v800_v52  ;;  %v3668_v40 = vadd.f32 %v3667_v47, %v6733_v58  ;;  %v7383_v52 = vld [vmem:[#allocation10_spill] sm:$0xff] }
 0x3f5   : > { %v809_v59 = vadd.f32 %v6738_v10, %v7383_v52 }
 0x3f6   : > { %v3888_v51 = vmax.f32 %v3824_v1, 0.0  ;;  %v3825_v60 = vadd.f32 %v3668_v40, %v801_v57  ;;  %v7384_v1 = vld [vmem:[#allocation26_spill] sm:$0xff] }
 0x3f8   : > { %v3930_v3 = vpack.c.bf16 %v3888_v51, %v3887_v9  ;;  %v3889_v20 = vmax.f32 %v3825_v60, 0.0  ;;  %v810_v9 = vadd.f32 %v6751_v12, %v7384_v1 }
 0x3f9   : > { %v3756_v31 = vpop.f32.mrf.mxu2 }
 0x3fa   : > { %3962 = vst [vmem:[%s6768_s23 + $0xa8] sm:$0xff] %v3930_v3  ;;  %v3757_v29 = vadd.f32 %v3756_v31, %v6745_v49 }
 0x3fb   : > { %v3669_v22 = vpop.f32.mrf.mxu1 }
 0x3fc   : > { %v3826_v4 = vadd.f32 %v3757_v29, %v802_v56  ;;  %v3670_v27 = vadd.f32 %v3669_v22, %v6733_v58  ;;  %v7385_v56 = vld [vmem:[#allocation12_spill] sm:$0xff] }
 0x3fd   : > { %v811_v60 = vadd.f32 %v6738_v10, %v7385_v56 }
 0x3fe   : > { %v3890_v15 = vmax.f32 %v3826_v4, 0.0  ;;  %v3827_v21 = vadd.f32 %v3670_v27, %v803_v13  ;;  %v7386_v4 = vld [vmem:[#allocation28_spill] sm:$0xff] }
 0x400   : > { %v3931_v44 = vpack.c.bf16 %v3890_v15, %v3889_v20  ;;  %v3891_v41 = vmax.f32 %v3827_v21, 0.0  ;;  %v812_v20 = vadd.f32 %v6751_v12, %v7386_v4 }
 0x401   : > { %v3758_v35 = vpop.f32.mrf.mxu2 }
 0x402   : > { %3963 = vst [vmem:[%s6768_s23 + $0xb0] sm:$0xff] %v3931_v44  ;;  %v3759_v37 = vadd.f32 %v3758_v35, %v6745_v49 }
 0x403   : > { %v3672_v2 = vpop.f32.mrf.mxu1 }
 0x404   : > { %v3828_v14 = vadd.f32 %v3759_v37, %v804_v48  ;;  %v3673_v43 = vadd.f32 %v3672_v2, %v6733_v58  ;;  %v7387_v48 = vld [vmem:[#allocation14_spill] sm:$0xff] }
 0x405   : > { %v813_v21 = vadd.f32 %v6738_v10, %v7387_v48 }
 0x406   : > { %v3892_v53 = vmax.f32 %v3828_v14, 0.0  ;;  %v3829_v24 = vadd.f32 %v3673_v43, %v805_v33  ;;  %v7388_v14 = vld [vmem:[#allocation30_spill] sm:$0xff] }
 0x408   : > { %v3932_v61 = vpack.c.bf16 %v3892_v53, %v3891_v41  ;;  %v3893_v36 = vmax.f32 %v3829_v24, 0.0  ;;  %v814_v41 = vadd.f32 %v6751_v12, %v7388_v14 }
 0x409   : > { %v3761_v18 = vpop.f32.mrf.mxu2 }
 0x40a   : > { %3964 = vst [vmem:[%s6768_s23 + $0xb8] sm:$0xff] %v3932_v61  ;;  %v3762_v50 = vadd.f32 %v3761_v18, %v6745_v49 }
 0x40b   : > { %v3674_v42 = vpop.f32.mrf.mxu1 }
 0x40c   : > { %v3830_v17 = vadd.f32 %v3762_v50, %v806_v26  ;;  %v3675_v16 = vadd.f32 %v3674_v42, %v6733_v58  ;;  %v7389_v26 = vld [vmem:[#allocation16_spill] sm:$0xff] }
 0x40d   : > { %v815_v24 = vadd.f32 %v6738_v10, %v7389_v26 }
 0x40e   : > { %v3894_v62 = vmax.f32 %v3830_v17, 0.0  ;;  %v3831_v8 = vadd.f32 %v3675_v16, %v807_v7  ;;  %v7390_v17 = vld [vmem:[#allocation32_spill] sm:$0xff] }
 0x410   : > { %v3933_v63 = vpack.c.bf16 %v3894_v62, %v3893_v36  ;;  %v3895_v45 = vmax.f32 %v3831_v8, 0.0  ;;  %v816_v36 = vadd.f32 %v6751_v12, %v7390_v17 }
 0x411   : > { %v3763_v23 = vpop.f32.mrf.mxu2 }
 0x412   : > { %3965 = vst [vmem:[%s6768_s23 + $0xc0] sm:$0xff] %v3933_v63  ;;  %v3764_v0 = vadd.f32 %v3763_v23, %v6745_v49 }
 0x413   : > { %v3677_v46 = vpop.f32.mrf.mxu1 }
 0x414   : > { %v3832_v30 = vadd.f32 %v3764_v0, %v808_v38  ;;  %v3678_v34 = vadd.f32 %v3677_v46, %v6733_v58  ;;  %v7391_v38 = vld [vmem:[#allocation18_spill] sm:$0xff] }
 0x415   : > { %v817_v8 = vadd.f32 %v6738_v10, %v7391_v38 }
 0x416   : > { %v3896_v28 = vmax.f32 %v3832_v30, 0.0  ;;  %v3833_v51 = vadd.f32 %v3678_v34, %v809_v59  ;;  %v7392_v30 = vld [vmem:[#allocation34_spill] sm:$0xff] }
 0x418   : > { %v3934_v5 = vpack.c.bf16 %v3896_v28, %v3895_v45  ;;  %v3897_v3 = vmax.f32 %v3833_v51, 0.0  ;;  %v818_v45 = vadd.f32 %v6751_v12, %v7392_v30 }
 0x419   : > { %v3766_v47 = vpop.f32.mrf.mxu2 }
 0x41a   : > { %3966 = vst [vmem:[%s6768_s23 + $0xc8] sm:$0xff] %v3934_v5  ;;  %v3767_v40 = vadd.f32 %v3766_v47, %v6745_v49 }
 0x41b   : > { %v3679_v11 = vpop.f32.mrf.mxu1 }
 0x41c   : > { %v3834_v57 = vadd.f32 %v3767_v40, %v810_v9  ;;  %v3680_v19 = vadd.f32 %v3679_v11, %v6733_v58  ;;  %v7393_v9 = vld [vmem:[#allocation20_spill] sm:$0xff] }
 0x41d   : > { %v819_v51 = vadd.f32 %v6738_v10, %v7393_v9 }
 0x41e   : > { %v3898_v31 = vmax.f32 %v3834_v57, 0.0  ;;  %v3835_v15 = vadd.f32 %v3680_v19, %v811_v60  ;;  %v7394_v57 = vld [vmem:[#allocation36_spill] sm:$0xff] }
 0x420   : > { %v3935_v29 = vpack.c.bf16 %v3898_v31, %v3897_v3  ;;  %v3899_v44 = vmax.f32 %v3835_v15, 0.0  ;;  %v820_v3 = vadd.f32 %v6751_v12, %v7394_v57 }
 0x421   : > { %v3768_v22 = vpop.f32.mrf.mxu2 }
 0x422   : > { %3967 = vst [vmem:[%s6768_s23 + $0xd0] sm:$0xff] %v3935_v29  ;;  %v3769_v27 = vadd.f32 %v3768_v22, %v6745_v49 }
 0x423   : > { %v3682_v54 = vpop.f32.mrf.mxu1 }
 0x424   : > { %v3836_v13 = vadd.f32 %v3769_v27, %v812_v20  ;;  %v3683_v25 = vadd.f32 %v3682_v54, %v6733_v58 }
 0x426   : > { %v3900_v35 = vmax.f32 %v3836_v13, 0.0  ;;  %v3837_v53 = vadd.f32 %v3683_v25, %v813_v21 }
 0x428   : > { %v3936_v37 = vpack.c.bf16 %v3900_v35, %v3899_v44  ;;  %v3901_v61 = vmax.f32 %v3837_v53, 0.0 }
 0x429   : > { %v3771_v2 = vpop.f32.mrf.mxu2 }
 0x42a   : > { %3968 = vst [vmem:[%s6768_s23 + $0xd8] sm:$0xff] %v3936_v37  ;;  %v3772_v43 = vadd.f32 %v3771_v2, %v6745_v49 }
 0x42b   : > { %v3684_v55 = vpop.f32.mrf.mxu1 }
 0x42c   : > { %v3838_v33 = vadd.f32 %v3772_v43, %v814_v41  ;;  %v3685_v6 = vadd.f32 %v3684_v55, %v6733_v58 }
 0x42e   : > { %v3902_v18 = vmax.f32 %v3838_v33, 0.0  ;;  %v3839_v62 = vadd.f32 %v3685_v6, %v815_v24 }
 0x430   : > { %v3937_v50 = vpack.c.bf16 %v3902_v18, %v3901_v61  ;;  %v3903_v63 = vmax.f32 %v3839_v62, 0.0 }
 0x431   : > { %v3773_v42 = vpop.f32.mrf.mxu2 }
 0x432   : > { %3969 = vst [vmem:[%s6768_s23 + $0xe0] sm:$0xff] %v3937_v50  ;;  %v3774_v16 = vadd.f32 %v3773_v42, %v6745_v49 }
 0x433   : > { %v3687_v39 = vpop.f32.mrf.mxu1 }
 0x434   : > { %v3840_v7 = vadd.f32 %v3774_v16, %v816_v36  ;;  %v3688_v32 = vadd.f32 %v3687_v39, %v6733_v58 }
 0x436   : > { %v3904_v23 = vmax.f32 %v3840_v7, 0.0  ;;  %v3841_v28 = vadd.f32 %v3688_v32, %v817_v8 }
 0x438   : > { %v3938_v0 = vpack.c.bf16 %v3904_v23, %v3903_v63  ;;  %v3905_v5 = vmax.f32 %v3841_v28, 0.0 }
 0x439   : > { %v3776_v46 = vpop.f32.mrf.mxu2 }
 0x43a   : > { %3970 = vst [vmem:[%s6768_s23 + $0xe8] sm:$0xff] %v3938_v0  ;;  %v3777_v34 = vadd.f32 %v3776_v46, %v6745_v49 }
 0x43b   : > { %v3689_v52 = vpop.f32.mrf.mxu1 }
 0x43c   : > { %v3842_v59 = vadd.f32 %v3777_v34, %v818_v45  ;;  %v3690_v1 = vadd.f32 %v3689_v52, %v6733_v58 }
 0x43e   : > { %v3906_v47 = vmax.f32 %v3842_v59, 0.0  ;;  %v3843_v31 = vadd.f32 %v3690_v1, %v819_v51 }
 0x440   : > { %v3939_v40 = vpack.c.bf16 %v3906_v47, %v3905_v5  ;;  %v3907_v10 = vmax.f32 %v3843_v31, 0.0 }
 0x441   : > { %v3778_v11 = vpop.f32.mrf.mxu2 }
 0x442   : > { %3971 = vst [vmem:[%s6768_s23 + $0xf0] sm:$0xff] %v3939_v40  ;;  %v3779_v58 = vadd.f32 %v3778_v11, %v6745_v49 }
 0x444   : > { %v3844_v19 = vadd.f32 %v3779_v58, %v820_v3 }
 0x446   : > { %v3908_v56 = vmax.f32 %v3844_v19, 0.0 }
 0x448   : > { %v3940_v60 = vpack.c.bf16 %v3908_v56, %v3907_v10 }
 0x44a   : > { %3972 = vst [vmem:[%s6768_s23 + $0xf8] sm:$0xff] %v3940_v60 }
 0x44b   : > { %4676 = shalt.err (!%p4673_p3)
}
 0x44c   : > { %s4716_s21 = smov 128   ;;  %s4717_s23 = smov 8  }
 0x44d   : > { %4602 = dma.vmem_to_hbm [thread:$0]  (%p4801_p5), %s3987_s9, 4096, %s3989_s10, %s3974_s13, %s4716_s21, %s4716_s21, %s4717_s23  }
 0x44e PF: > { %p4608_p4 = scmp.ge.s32.totalorder %s4711_s30, 2  ;;  %s4003_s26 = sand.u32 1, %s4699_s27  }
 0x44f   : > { %s4004_s12 = scalar_lea.sflag [#allocation3], %s4003_s26 }
 0x450   : > { %p4605_p7 = pnand %p4608_p4, %p4805_p6 }
 0x452   : > { %p4606_p8 = pneg %p4605_p7 }
 0x454   : > { %4694 = dma.done.wait (%p4606_p8), %s4004_s12, 4096  }
 0x455   : > { %4696 = vsyncadd (%p4606_p8), %s4004_s12, 4294963200  ;;  %p18_p9 = scmp.ge.s32.totalorder %s4788_s11, 4   ;;  %s7395_s27 = smov %s4703_s28 }
 0x456   : > { %s7396_s28 = smov %s4707_s29  ;;  %s7397_s29 = smov %s4799_s14 }
 0x457   : > { %s7398_s30 = smov %s4788_s11  ;;  %20 = sbr.rel (!%p18_p9) target bundleno = 3 (0x3), region = 89 }
 0x45c   :  { %4010 = vsyncpa [#allocation3], 1 }
 0x45d   :  { %4012 = vsyncpa [#allocation3 + $0x1], 1 }

</bundles_post_ra>
